<compile_context>
chip_gen: v6e
topology: v6e:2x2x1
jax: 0.10.0
libtpu: 0.0.40
codegen_flags: <defaults>
</compile_context>

<pallas_src>
import functools

import jax
import jax.numpy as jnp
from jax.experimental import pallas as pl
from jax.experimental.pallas import tpu as pltpu

# Lane-dense padded sizes (multiples of 128).
CP = 128      # padded backbone/stem channel count
HP = 128      # padded mask-head hidden channels
NCP = 128     # padded classifier / mask-logit output lanes


# ----------------------------------------------------------------------------
# Pallas kernels
# ----------------------------------------------------------------------------
def _matmul_bias_kernel(x_ref, w_ref, b_ref, o_ref, *, relu):
    """o = x @ w + b (+ReLU).  bf16 inputs, f32 accumulate, f32 store."""
    acc = jnp.dot(x_ref[...], w_ref[...], preferred_element_type=jnp.float32)
    acc = acc + b_ref[...]
    if relu:
        acc = jnp.maximum(acc, 0.0)
    o_ref[...] = acc.astype(o_ref.dtype)


def _box_head_kernel(x_ref, w6_ref, b6_ref, w7_ref, b7_ref, wcb_ref, bcb_ref,
                     o_ref):
    """Fused TwoMLPHead + FastRCNNPredictor: relu(relu(x@w6+b6)@w7+b7)@wcb+bcb."""
    h = jnp.dot(x_ref[...], w6_ref[...], preferred_element_type=jnp.float32)
    h = jnp.maximum(h + b6_ref[...], 0.0).astype(w7_ref.dtype)
    h = jnp.dot(h, w7_ref[...], preferred_element_type=jnp.float32)
    h = jnp.maximum(h + b7_ref[...], 0.0).astype(wcb_ref.dtype)
    out = jnp.dot(h, wcb_ref[...], preferred_element_type=jnp.float32)
    o_ref[...] = (out + bcb_ref[...]).astype(o_ref.dtype)


def _mask_head_kernel(x_ref, wd_ref, bd_ref, wm_ref, bm_ref, o_ref, *, hp, ncp):
    """Fused MaskRCNNPredictor per RoI pixel.

    x: [M, CP] pooled features.  wd packs the ConvTranspose2d(k=2,s=2) weight as
    [CP, 4*hp] (position-major: k = a*2 + c), so relu(x@wd+bd) yields the 2x2
    upsampled hidden features; each hp-wide slice is then sent through the 1x1
    mask_fcn_logits matmul and stored at a lane-dense 128-wide offset.
    """
    h = jnp.dot(x_ref[...], wd_ref[...], preferred_element_type=jnp.float32)
    h = jnp.maximum(h + bd_ref[...], 0.0).astype(wm_ref.dtype)
    wm = wm_ref[...]
    bm = bm_ref[...]
    for k in range(4):                       # static unroll, 4 MXU calls
        blk = jnp.dot(h[:, k * hp:(k + 1) * hp], wm,
                      preferred_element_type=jnp.float32)
        o_ref[:, k * ncp:(k + 1) * ncp] = (blk + bm).astype(o_ref.dtype)


# ----------------------------------------------------------------------------
# pallas_call wrappers
# ----------------------------------------------------------------------------
def _stem_call(cols, w, b):
    """[M, 9*Cin] @ [9*Cin, CP] + b, ReLU.  2 parallel row blocks."""
    M, K = cols.shape
    Np = w.shape[1]
    nblk = 2 if (M % 2 == 0 and (M // 2) % 8 == 0) else 1
    tm = M // nblk
    return pl.pallas_call(
        functools.partial(_matmul_bias_kernel, relu=True),
        out_shape=jax.ShapeDtypeStruct((M, Np), jnp.float32),
        grid=(nblk,),
        in_specs=[
            pl.BlockSpec((tm, K), lambda i: (i, 0)),
            pl.BlockSpec((K, Np), lambda i: (0, 0)),
            pl.BlockSpec((1, Np), lambda i: (0, 0)),
        ],
        out_specs=pl.BlockSpec((tm, Np), lambda i: (i, 0)),
        compiler_params=pltpu.CompilerParams(
            dimension_semantics=("parallel",)),
    )(cols, w, b)


def _box_head_call(x, w6, b6, w7, b7, wcb, bcb):
    Bp, Kin = x.shape
    R = w6.shape[1]
    Nout = wcb.shape[1]
    return pl.pallas_call(
        _box_head_kernel,
        out_shape=jax.ShapeDtypeStruct((Bp, Nout), jnp.float32),
        grid=(1,),
        in_specs=[
            pl.BlockSpec((Bp, Kin), lambda i: (0, 0)),
            pl.BlockSpec((Kin, R), lambda i: (0, 0)),
            pl.BlockSpec((1, R), lambda i: (0, 0)),
            pl.BlockSpec((R, R), lambda i: (0, 0)),
            pl.BlockSpec((1, R), lambda i: (0, 0)),
            pl.BlockSpec((R, Nout), lambda i: (0, 0)),
            pl.BlockSpec((1, Nout), lambda i: (0, 0)),
        ],
        out_specs=pl.BlockSpec((Bp, Nout), lambda i: (0, 0)),
        compiler_params=pltpu.CompilerParams(
            dimension_semantics=("arbitrary",)),
    )(x, w6, b6, w7, b7, wcb, bcb)


def _mask_head_call(x, wd, bd, wm, bm, *, hp, ncp):
    M, Cp = x.shape
    Nd = wd.shape[1]
    assert Nd == 4 * hp
    Nout = 4 * ncp
    nblk = 2 if (M % 2 == 0 and (M // 2) % 8 == 0) else 1
    tm = M // nblk
    return pl.pallas_call(
        functools.partial(_mask_head_kernel, hp=hp, ncp=ncp),
        out_shape=jax.ShapeDtypeStruct((M, Nout), jnp.float32),
        grid=(nblk,),
        in_specs=[
            pl.BlockSpec((tm, Cp), lambda i: (i, 0)),
            pl.BlockSpec((Cp, Nd), lambda i: (0, 0)),
            pl.BlockSpec((1, Nd), lambda i: (0, 0)),
            pl.BlockSpec((hp, ncp), lambda i: (0, 0)),
            pl.BlockSpec((1, ncp), lambda i: (0, 0)),
        ],
        out_specs=pl.BlockSpec((tm, Nout), lambda i: (i, 0)),
        compiler_params=pltpu.CompilerParams(
            dimension_semantics=("parallel",)),
    )(x, wd, bd, wm, bm)


# ----------------------------------------------------------------------------
# Model: parameters (true shapes), one-time padded/bf16 prep, forward
# ----------------------------------------------------------------------------
def init_params(key, *, num_classes, hidden_layer, stem_c, repr_dim, pool):
    ks = jax.random.split(key, 8)
    s = 0.05
    p = {}
    # backbone stem (stand-in for ResNet-50-FPN)
    p["stem_w"] = s * jax.random.normal(ks[0], (stem_c, 3, 3, 3), jnp.float32)
    p["stem_b"] = jnp.zeros((stem_c,), jnp.float32)
    # TwoMLPHead (box head) fc6 / fc7.  fc6 rows are in channels-last (i,j,c)
    # flatten order (weights are random stand-ins; only internal consistency
    # matters).
    box_in = pool * pool * stem_c
    p["fc6_w"] = s * jax.random.normal(ks[1], (box_in, repr_dim), jnp.float32)
    p["fc6_b"] = jnp.zeros((repr_dim,), jnp.float32)
    p["fc7_w"] = s * jax.random.normal(ks[2], (repr_dim, repr_dim), jnp.float32)
    p["fc7_b"] = jnp.zeros((repr_dim,), jnp.float32)
    # FastRCNNPredictor (replaced in __init__): cls_score + bbox_pred
    p["cls_w"] = s * jax.random.normal(ks[3], (repr_dim, num_classes), jnp.float32)
    p["cls_b"] = jnp.zeros((num_classes,), jnp.float32)
    p["bbox_w"] = s * jax.random.normal(ks[4], (repr_dim, num_classes * 4), jnp.float32)
    p["bbox_b"] = jnp.zeros((num_classes * 4,), jnp.float32)
    # MaskRCNNPredictor (replaced in __init__): conv5_mask (deconv) + mask_fcn_logits
    p["conv5_w"] = s * jax.random.normal(ks[5], (stem_c, hidden_layer, 2, 2), jnp.float32)
    p["conv5_b"] = jnp.zeros((hidden_layer,), jnp.float32)
    p["mlog_w"] = s * jax.random.normal(ks[6], (num_classes, hidden_layer, 1, 1), jnp.float32)
    p["mlog_b"] = jnp.zeros((num_classes,), jnp.float32)
    return p


def prepare_params(p, *, num_classes, hidden, stem_c, repr_dim, pool):
    """Pad every weight to lane-dense (multiple-of-128) shapes, cast to bf16.

    Padded channels are exact zeros (weights + biases), so padded lanes carry
    zeros through ReLU and contribute nothing downstream -> no wrapper slices
    are needed until the very end.
    """
    assert repr_dim % 128 == 0
    cin = p["stem_w"].shape[1]
    bf = lambda a: a.astype(jnp.bfloat16)
    o = {}
    # stem 3x3 conv: [Cout, Cin, 3, 3] -> [9*Cin, CP]
    w = jnp.transpose(p["stem_w"], (2, 3, 1, 0)).reshape(9 * cin, stem_c)
    o["stem_w"] = bf(jnp.pad(w, ((0, 0), (0, CP - stem_c))))
    o["stem_b"] = jnp.pad(p["stem_b"], (0, CP - stem_c)).reshape(1, CP)
    # fc6: interleave channel padding to match the padded (i,j,CP) flatten.
    w6 = p["fc6_w"].reshape(pool, pool, stem_c, repr_dim)
    w6 = jnp.pad(w6, ((0, 0), (0, 0), (0, CP - stem_c), (0, 0)))
    o["fc6_w"] = bf(w6.reshape(pool * pool * CP, repr_dim))
    o["fc6_b"] = p["fc6_b"].reshape(1, repr_dim)
    o["fc7_w"] = bf(p["fc7_w"])
    o["fc7_b"] = p["fc7_b"].reshape(1, repr_dim)
    # cls_score + bbox_pred fused into one [R, NCP] matmul.
    nout = num_classes * 5
    wcb = jnp.concatenate([p["cls_w"], p["bbox_w"]], axis=1)
    o["cb_w"] = bf(jnp.pad(wcb, ((0, 0), (0, NCP - nout))))
    bcb = jnp.concatenate([p["cls_b"], p["bbox_b"]])
    o["cb_b"] = jnp.pad(bcb, (0, NCP - nout)).reshape(1, NCP)
    # conv5_mask deconv: [Cin, hid, 2, 2] -> position-major [CP, 4*HP]
    wd = jnp.transpose(p["conv5_w"], (0, 2, 3, 1))          # [Cin, 2, 2, hid]
    wd = jnp.pad(wd, ((0, CP - stem_c), (0, 0), (0, 0), (0, HP - hidden)))
    o["deconv_w"] = bf(wd.reshape(CP, 4 * HP))
    bd = jnp.pad(p["conv5_b"], (0, HP - hidden))
    o["deconv_b"] = jnp.tile(bd, 4).reshape(1, 4 * HP)
    # mask_fcn_logits 1x1 conv: [ncls, hid, 1, 1] -> [HP, NCP]
    wm = p["mlog_w"].reshape(num_classes, hidden).T
    o["mlog_w"] = bf(jnp.pad(wm, ((0, HP - hidden), (0, NCP - num_classes))))
    o["mlog_b"] = jnp.pad(p["mlog_b"], (0, NCP - num_classes)).reshape(1, NCP)
    return o


def mask_rcnn_forward(pp, x, *, num_classes, pool):
    """x: [B, 3, H, W] float32 (NCHW, torchvision convention)."""
    B, Cin, H, W = x.shape

    # One-time layout conversion; everything downstream is channels-last.
    xt = jnp.transpose(x, (0, 2, 3, 1)).astype(jnp.bfloat16)      # [B, H, W, 3]

    # --- backbone stem: 3x3 conv (stride 1, pad 1) + ReLU, one Pallas matmul.
    # im2col patches are built directly in bf16 (no f32 9x-expanded copy).
    xp = jnp.pad(xt, ((0, 0), (1, 1), (1, 1), (0, 0)))
    cols = jnp.stack([xp[:, di:di + H, dj:dj + W, :]
                      for di in range(3) for dj in range(3)], axis=3)
    cols = cols.reshape(B * H * W, 9 * Cin)
    feat = _stem_call(cols, pp["stem_w"], pp["stem_b"])           # [BHW, CP] f32
    feat = feat.reshape(B, H, W, CP)

    # TODO(synk): full ResNet-50-FPN backbone, RPN (anchor generation,
    # objectness, NMS) and RoIAlign are data-dependent control flow with no
    # clean Pallas equivalent here; whole-image proposals plus a fixed average
    # pool stand in for proposal generation + RoIAlign.
    roi = feat.reshape(B, pool, H // pool, pool, W // pool, CP).mean(axis=(2, 4))

    # --- box branch: TwoMLPHead + FastRCNNPredictor, fused in one pallas_call.
    bp = max(8, ((B + 7) // 8) * 8)
    box_feat = roi.reshape(B, pool * pool * CP)
    box_feat = jnp.pad(box_feat, ((0, bp - B), (0, 0))).astype(jnp.bfloat16)
    head = _box_head_call(box_feat, pp["fc6_w"], pp["fc6_b"],
                          pp["fc7_w"], pp["fc7_b"],
                          pp["cb_w"], pp["cb_b"])                 # [bp, NCP]
    cls_logits = head[:B, :num_classes]
    bbox_deltas = head[:B, num_classes:num_classes * 5]

    # --- mask branch: MaskRCNNPredictor, fused in one pallas_call.
    mrows = roi.reshape(B * pool * pool, CP).astype(jnp.bfloat16)
    mh = _mask_head_call(mrows, pp["deconv_w"], pp["deconv_b"],
                         pp["mlog_w"], pp["mlog_b"], hp=HP, ncp=NCP)
    mh = mh.reshape(B, pool, pool, 2, 2, NCP)
    mh = mh.transpose(0, 1, 3, 2, 4, 5).reshape(B, 2 * pool, 2 * pool, NCP)
    mask_logits = jnp.transpose(mh[..., :num_classes], (0, 3, 1, 2))

    # TODO(synk): box decoding, score softmax + NMS and mask paste-back
    # (torchvision postprocess_detections) are host-style control flow.
    return {"cls_logits": cls_logits,
            "bbox_deltas": bbox_deltas,
            "mask_logits": mask_logits}


# ----------------------------------------------------------------------------
if __name__ == "__main__":
    num_classes = 5
    hidden_layer = 64       # stand-in for the default 256
    stem_c = 32             # stand-in backbone channels
    repr_dim = 128          # stand-in for box_predictor in_features (1024)
    pool = 8                # RoI pooled spatial size (stand-in for 7 / 14)

    key = jax.random.PRNGKey(0)
    pkey, xkey = jax.random.split(key)
    params = init_params(pkey, num_classes=num_classes, hidden_layer=hidden_layer,
                         stem_c=stem_c, repr_dim=repr_dim, pool=pool)
    pp = prepare_params(params, num_classes=num_classes, hidden=hidden_layer,
                        stem_c=stem_c, repr_dim=repr_dim, pool=pool)

    x = jax.random.normal(xkey, (2, 3, 16, 16), jnp.float32)   # NCHW images

    fwd = jax.jit(functools.partial(mask_rcnn_forward,
                                    num_classes=num_classes, pool=pool))
    out = fwd(pp, x)
    jax.block_until_ready(out)

    assert out["cls_logits"].shape == (2, num_classes)
    assert out["bbox_deltas"].shape == (2, num_classes * 4)
    assert out["mask_logits"].shape == (2, num_classes, 2 * pool, 2 * pool)
    assert all(bool(jnp.all(jnp.isfinite(v))) for v in out.values())

    print("KERNEL_OK")
</pallas_src>

<mosaic_0001>
module attributes {stable_mosaic.version = 11 : i64} {
  func.func @_matmul_bias_kernel(%arg0: i32, %arg1: memref<256x27xbf16, #tpu.memory_space<vmem>>, %arg2: memref<27x128xbf16, #tpu.memory_space<vmem>>, %arg3: memref<1x128xf32, #tpu.memory_space<vmem>>, %arg4: memref<256x128xf32, #tpu.memory_space<vmem>>) attributes {dimension_semantics = [#tpu.dimension_semantics<parallel>], iteration_bounds = array<i64: 2>, scalar_prefetch = 0 : i64, scratch_operands = 0 : i64, tpu.core_type = #tpu.core_type<tc>, window_params = [{transform_indices = @transform_0, window_bounds = array<i64: 256, 27>}, {pipeline_mode = #tpu.pipeline_mode<synchronous>, transform_indices = @transform_1, window_bounds = array<i64: 27, 128>}, {pipeline_mode = #tpu.pipeline_mode<synchronous>, transform_indices = @transform_2, window_bounds = array<i64: 1, 128>}, {transform_indices = @transform_3, window_bounds = array<i64: 256, 128>}]} {
    %c0 = arith.constant 0 : index
    %c0_0 = arith.constant 0 : index
    %0 = vector.load %arg1[%c0, %c0_0] : memref<256x27xbf16, #tpu.memory_space<vmem>>, vector<256x27xbf16>
    %c0_1 = arith.constant 0 : index
    %c0_2 = arith.constant 0 : index
    %1 = vector.load %arg2[%c0_1, %c0_2] : memref<27x128xbf16, #tpu.memory_space<vmem>>, vector<27x128xbf16>
    %cst = arith.constant dense<0.000000e+00> : vector<256x128xf32>
    %2 = tpu.matmul %0, %1, %cst {dimension_numbers = #tpu.dot_dimension_numbers<[1], [0], [0], [1], [0, 0, 1, 1], [], []>} : vector<256x27xbf16>, vector<27x128xbf16>, vector<256x128xf32> -> vector<256x128xf32>
    %c0_3 = arith.constant 0 : index
    %c0_4 = arith.constant 0 : index
    %3 = vector.load %arg3[%c0_3, %c0_4] : memref<1x128xf32, #tpu.memory_space<vmem>>, vector<1x128xf32>
    %4 = vector.broadcast %3 : vector<1x128xf32> to vector<256x128xf32>
    %5 = arith.addf %2, %4 : vector<256x128xf32>
    %cst_5 = arith.constant 0.000000e+00 : f32
    %6 = vector.broadcast %cst_5 : f32 to vector<256x128xf32>
    %7 = arith.maximumf %5, %6 : vector<256x128xf32>
    %c0_6 = arith.constant 0 : index
    %c0_7 = arith.constant 0 : index
    %8 = vector.load %arg4[%c0_6, %c0_7] : memref<256x128xf32, #tpu.memory_space<vmem>>, vector<256x128xf32>
    tpu.vector_store %arg4[%c0_6, %c0_7], %7 {strides = array<i32>} : memref<256x128xf32, #tpu.memory_space<vmem>>, vector<256x128xf32>,
    return
  }
  func.func @transform_0(%arg0: i32) -> (i32, i32) {
    %c0_i32 = arith.constant 0 : i32
    %c0_i32_0 = arith.constant 0 : i32
    return %arg0, %c0_i32 : i32, i32
  }
  func.func @transform_1(%arg0: i32) -> (i32, i32) {
    %c0_i32 = arith.constant 0 : i32
    %c0_i32_0 = arith.constant 0 : i32
    %c0_i32_1 = arith.constant 0 : i32
    return %c0_i32, %c0_i32_0 : i32, i32
  }
  func.func @transform_2(%arg0: i32) -> (i32, i32) {
    %c0_i32 = arith.constant 0 : i32
    %c0_i32_0 = arith.constant 0 : i32
    %c0_i32_1 = arith.constant 0 : i32
    return %c0_i32, %c0_i32_0 : i32, i32
  }
  func.func @transform_3(%arg0: i32) -> (i32, i32) {
    %c0_i32 = arith.constant 0 : i32
    %c0_i32_0 = arith.constant 0 : i32
    return %arg0, %c0_i32 : i32, i32
  }
}

module attributes {stable_mosaic.version = 11 : i64} {
  func.func @_box_head_kernel(%arg0: i32, %arg1: memref<8x8192xbf16, #tpu.memory_space<vmem>>, %arg2: memref<8192x128xbf16, #tpu.memory_space<vmem>>, %arg3: memref<1x128xf32, #tpu.memory_space<vmem>>, %arg4: memref<128x128xbf16, #tpu.memory_space<vmem>>, %arg5: memref<1x128xf32, #tpu.memory_space<vmem>>, %arg6: memref<128x128xbf16, #tpu.memory_space<vmem>>, %arg7: memref<1x128xf32, #tpu.memory_space<vmem>>, %arg8: memref<8x128xf32, #tpu.memory_space<vmem>>) attributes {dimension_semantics = [#tpu.dimension_semantics<arbitrary>], iteration_bounds = array<i64: 1>, scalar_prefetch = 0 : i64, scratch_operands = 0 : i64, tpu.core_type = #tpu.core_type<tc>, window_params = [{pipeline_mode = #tpu.pipeline_mode<synchronous>, transform_indices = @transform_0, window_bounds = array<i64: 8, 8192>}, {pipeline_mode = #tpu.pipeline_mode<synchronous>, transform_indices = @transform_1, window_bounds = array<i64: 8192, 128>}, {pipeline_mode = #tpu.pipeline_mode<synchronous>, transform_indices = @transform_2, window_bounds = array<i64: 1, 128>}, {pipeline_mode = #tpu.pipeline_mode<synchronous>, transform_indices = @transform_3, window_bounds = array<i64: 128, 128>}, {pipeline_mode = #tpu.pipeline_mode<synchronous>, transform_indices = @transform_4, window_bounds = array<i64: 1, 128>}, {pipeline_mode = #tpu.pipeline_mode<synchronous>, transform_indices = @transform_5, window_bounds = array<i64: 128, 128>}, {pipeline_mode = #tpu.pipeline_mode<synchronous>, transform_indices = @transform_6, window_bounds = array<i64: 1, 128>}, {pipeline_mode = #tpu.pipeline_mode<synchronous>, transform_indices = @transform_7, window_bounds = array<i64: 8, 128>}]} {
    %c0 = arith.constant 0 : index
    %c0_0 = arith.constant 0 : index
    %0 = vector.load %arg1[%c0, %c0_0] : memref<8x8192xbf16, #tpu.memory_space<vmem>>, vector<8x8192xbf16>
    %c0_1 = arith.constant 0 : index
    %c0_2 = arith.constant 0 : index
    %1 = vector.load %arg2[%c0_1, %c0_2] : memref<8192x128xbf16, #tpu.memory_space<vmem>>, vector<8192x128xbf16>
    %cst = arith.constant dense<0.000000e+00> : vector<8x128xf32>
    %2 = tpu.matmul %0, %1, %cst {dimension_numbers = #tpu.dot_dimension_numbers<[1], [0], [0], [1], [0, 0, 1, 1], [], []>} : vector<8x8192xbf16>, vector<8192x128xbf16>, vector<8x128xf32> -> vector<8x128xf32>
    %c0_3 = arith.constant 0 : index
    %c0_4 = arith.constant 0 : index
    %3 = vector.load %arg3[%c0_3, %c0_4] : memref<1x128xf32, #tpu.memory_space<vmem>>, vector<1x128xf32>
    %4 = vector.broadcast %3 : vector<1x128xf32> to vector<8x128xf32>
    %5 = arith.addf %2, %4 : vector<8x128xf32>
    %cst_5 = arith.constant 0.000000e+00 : f32
    %6 = vector.broadcast %cst_5 : f32 to vector<8x128xf32>
    %7 = arith.maximumf %5, %6 : vector<8x128xf32>
    %8 = arith.truncf %7 : vector<8x128xf32> to vector<8x128xbf16>
    %c0_6 = arith.constant 0 : index
    %c0_7 = arith.constant 0 : index
    %9 = vector.load %arg4[%c0_6, %c0_7] : memref<128x128xbf16, #tpu.memory_space<vmem>>, vector<128x128xbf16>
    %cst_8 = arith.constant dense<0.000000e+00> : vector<8x128xf32>
    %10 = tpu.matmul %8, %9, %cst_8 {dimension_numbers = #tpu.dot_dimension_numbers<[1], [0], [0], [1], [0, 0, 1, 1], [], []>} : vector<8x128xbf16>, vector<128x128xbf16>, vector<8x128xf32> -> vector<8x128xf32>
    %c0_9 = arith.constant 0 : index
    %c0_10 = arith.constant 0 : index
    %11 = vector.load %arg5[%c0_9, %c0_10] : memref<1x128xf32, #tpu.memory_space<vmem>>, vector<1x128xf32>
    %12 = vector.broadcast %11 : vector<1x128xf32> to vector<8x128xf32>
    %13 = arith.addf %10, %12 : vector<8x128xf32>
    %cst_11 = arith.constant 0.000000e+00 : f32
    %14 = vector.broadcast %cst_11 : f32 to vector<8x128xf32>
    %15 = arith.maximumf %13, %14 : vector<8x128xf32>
    %16 = arith.truncf %15 : vector<8x128xf32> to vector<8x128xbf16>
    %c0_12 = arith.constant 0 : index
    %c0_13 = arith.constant 0 : index
    %17 = vector.load %arg6[%c0_12, %c0_13] : memref<128x128xbf16, #tpu.memory_space<vmem>>, vector<128x128xbf16>
    %cst_14 = arith.constant dense<0.000000e+00> : vector<8x128xf32>
    %18 = tpu.matmul %16, %17, %cst_14 {dimension_numbers = #tpu.dot_dimension_numbers<[1], [0], [0], [1], [0, 0, 1, 1], [], []>} : vector<8x128xbf16>, vector<128x128xbf16>, vector<8x128xf32> -> vector<8x128xf32>
    %c0_15 = arith.constant 0 : index
    %c0_16 = arith.constant 0 : index
    %19 = vector.load %arg7[%c0_15, %c0_16] : memref<1x128xf32, #tpu.memory_space<vmem>>, vector<1x128xf32>
    %20 = vector.broadcast %19 : vector<1x128xf32> to vector<8x128xf32>
    %21 = arith.addf %18, %20 : vector<8x128xf32>
    %c0_17 = arith.constant 0 : index
    %c0_18 = arith.constant 0 : index
    %22 = vector.load %arg8[%c0_17, %c0_18] : memref<8x128xf32, #tpu.memory_space<vmem>>, vector<8x128xf32>
    tpu.vector_store %arg8[%c0_17, %c0_18], %21 {strides = array<i32>} : memref<8x128xf32, #tpu.memory_space<vmem>>, vector<8x128xf32>,
    return
  }
  func.func @transform_0(%arg0: i32) -> (i32, i32) {
    %c0_i32 = arith.constant 0 : i32
    %c0_i32_0 = arith.constant 0 : i32
    %c0_i32_1 = arith.constant 0 : i32
    return %c0_i32, %c0_i32_0 : i32, i32
  }
  func.func @transform_1(%arg0: i32) -> (i32, i32) {
    %c0_i32 = arith.constant 0 : i32
    %c0_i32_0 = arith.constant 0 : i32
    %c0_i32_1 = arith.constant 0 : i32
    return %c0_i32, %c0_i32_0 : i32, i32
  }
  func.func @transform_2(%arg0: i32) -> (i32, i32) {
    %c0_i32 = arith.constant 0 : i32
    %c0_i32_0 = arith.constant 0 : i32
    %c0_i32_1 = arith.constant 0 : i32
    return %c0_i32, %c0_i32_0 : i32, i32
  }
  func.func @transform_3(%arg0: i32) -> (i32, i32) {
    %c0_i32 = arith.constant 0 : i32
    %c0_i32_0 = arith.constant 0 : i32
    %c0_i32_1 = arith.constant 0 : i32
    return %c0_i32, %c0_i32_0 : i32, i32
  }
  func.func @transform_4(%arg0: i32) -> (i32, i32) {
    %c0_i32 = arith.constant 0 : i32
    %c0_i32_0 = arith.constant 0 : i32
    %c0_i32_1 = arith.constant 0 : i32
    return %c0_i32, %c0_i32_0 : i32, i32
  }
  func.func @transform_5(%arg0: i32) -> (i32, i32) {
    %c0_i32 = arith.constant 0 : i32
    %c0_i32_0 = arith.constant 0 : i32
    %c0_i32_1 = arith.constant 0 : i32
    return %c0_i32, %c0_i32_0 : i32, i32
  }
  func.func @transform_6(%arg0: i32) -> (i32, i32) {
    %c0_i32 = arith.constant 0 : i32
    %c0_i32_0 = arith.constant 0 : i32
    %c0_i32_1 = arith.constant 0 : i32
    return %c0_i32, %c0_i32_0 : i32, i32
  }
  func.func @transform_7(%arg0: i32) -> (i32, i32) {
    %c0_i32 = arith.constant 0 : i32
    %c0_i32_0 = arith.constant 0 : i32
    %c0_i32_1 = arith.constant 0 : i32
    return %c0_i32, %c0_i32_0 : i32, i32
  }
}

module attributes {stable_mosaic.version = 11 : i64} {
  func.func @_mask_head_kernel(%arg0: i32, %arg1: memref<64x128xbf16, #tpu.memory_space<vmem>>, %arg2: memref<128x512xbf16, #tpu.memory_space<vmem>>, %arg3: memref<1x512xf32, #tpu.memory_space<vmem>>, %arg4: memref<128x128xbf16, #tpu.memory_space<vmem>>, %arg5: memref<1x128xf32, #tpu.memory_space<vmem>>, %arg6: memref<64x512xf32, #tpu.memory_space<vmem>>) attributes {dimension_semantics = [#tpu.dimension_semantics<parallel>], iteration_bounds = array<i64: 2>, scalar_prefetch = 0 : i64, scratch_operands = 0 : i64, tpu.core_type = #tpu.core_type<tc>, window_params = [{transform_indices = @transform_0, window_bounds = array<i64: 64, 128>}, {pipeline_mode = #tpu.pipeline_mode<synchronous>, transform_indices = @transform_1, window_bounds = array<i64: 128, 512>}, {pipeline_mode = #tpu.pipeline_mode<synchronous>, transform_indices = @transform_2, window_bounds = array<i64: 1, 512>}, {pipeline_mode = #tpu.pipeline_mode<synchronous>, transform_indices = @transform_3, window_bounds = array<i64: 128, 128>}, {pipeline_mode = #tpu.pipeline_mode<synchronous>, transform_indices = @transform_4, window_bounds = array<i64: 1, 128>}, {transform_indices = @transform_5, window_bounds = array<i64: 64, 512>}]} {
    %c0 = arith.constant 0 : index
    %c0_0 = arith.constant 0 : index
    %0 = vector.load %arg1[%c0, %c0_0] : memref<64x128xbf16, #tpu.memory_space<vmem>>, vector<64x128xbf16>
    %c0_1 = arith.constant 0 : index
    %c0_2 = arith.constant 0 : index
    %1 = vector.load %arg2[%c0_1, %c0_2] : memref<128x512xbf16, #tpu.memory_space<vmem>>, vector<128x512xbf16>
    %cst = arith.constant dense<0.000000e+00> : vector<64x512xf32>
    %2 = tpu.matmul %0, %1, %cst {dimension_numbers = #tpu.dot_dimension_numbers<[1], [0], [0], [1], [0, 0, 1, 1], [], []>} : vector<64x128xbf16>, vector<128x512xbf16>, vector<64x512xf32> -> vector<64x512xf32>
    %c0_3 = arith.constant 0 : index
    %c0_4 = arith.constant 0 : index
    %3 = vector.load %arg3[%c0_3, %c0_4] : memref<1x512xf32, #tpu.memory_space<vmem>>, vector<1x512xf32>
    %4 = vector.broadcast %3 : vector<1x512xf32> to vector<64x512xf32>
    %5 = arith.addf %2, %4 : vector<64x512xf32>
    %cst_5 = arith.constant 0.000000e+00 : f32
    %6 = vector.broadcast %cst_5 : f32 to vector<64x512xf32>
    %7 = arith.maximumf %5, %6 : vector<64x512xf32>
    %8 = arith.truncf %7 : vector<64x512xf32> to vector<64x512xbf16>
    %c0_6 = arith.constant 0 : index
    %c0_7 = arith.constant 0 : index
    %9 = vector.load %arg4[%c0_6, %c0_7] : memref<128x128xbf16, #tpu.memory_space<vmem>>, vector<128x128xbf16>
    %c0_8 = arith.constant 0 : index
    %c0_9 = arith.constant 0 : index
    %10 = vector.load %arg5[%c0_8, %c0_9] : memref<1x128xf32, #tpu.memory_space<vmem>>, vector<1x128xf32>
    %11 = vector.extract_strided_slice %8 {offsets = [0, 0], sizes = [64, 128], strides = [1, 1]} : vector<64x512xbf16> to vector<64x128xbf16>
    %cst_10 = arith.constant dense<0.000000e+00> : vector<64x128xf32>
    %12 = tpu.matmul %11, %9, %cst_10 {dimension_numbers = #tpu.dot_dimension_numbers<[1], [0], [0], [1], [0, 0, 1, 1], [], []>} : vector<64x128xbf16>, vector<128x128xbf16>, vector<64x128xf32> -> vector<64x128xf32>
    %13 = vector.broadcast %10 : vector<1x128xf32> to vector<64x128xf32>
    %14 = arith.addf %12, %13 : vector<64x128xf32>
    %c0_11 = arith.constant 0 : index
    %c0_12 = arith.constant 0 : index
    %15 = vector.load %arg6[%c0_11, %c0_12] : memref<64x512xf32, #tpu.memory_space<vmem>>, vector<64x128xf32>
    tpu.vector_store %arg6[%c0_11, %c0_12], %14 {strides = array<i32>} : memref<64x512xf32, #tpu.memory_space<vmem>>, vector<64x128xf32>,
    %16 = vector.extract_strided_slice %8 {offsets = [0, 128], sizes = [64, 128], strides = [1, 1]} : vector<64x512xbf16> to vector<64x128xbf16>
    %cst_13 = arith.constant dense<0.000000e+00> : vector<64x128xf32>
    %17 = tpu.matmul %16, %9, %cst_13 {dimension_numbers = #tpu.dot_dimension_numbers<[1], [0], [0], [1], [0, 0, 1, 1], [], []>} : vector<64x128xbf16>, vector<128x128xbf16>, vector<64x128xf32> -> vector<64x128xf32>
    %18 = vector.broadcast %10 : vector<1x128xf32> to vector<64x128xf32>
    %19 = arith.addf %17, %18 : vector<64x128xf32>
    %c0_14 = arith.constant 0 : index
    %c128 = arith.constant 128 : index
    %20 = vector.load %arg6[%c0_14, %c128] : memref<64x512xf32, #tpu.memory_space<vmem>>, vector<64x128xf32>
    tpu.vector_store %arg6[%c0_14, %c128], %19 {strides = array<i32>} : memref<64x512xf32, #tpu.memory_space<vmem>>, vector<64x128xf32>,
    %21 = vector.extract_strided_slice %8 {offsets = [0, 256], sizes = [64, 128], strides = [1, 1]} : vector<64x512xbf16> to vector<64x128xbf16>
    %cst_15 = arith.constant dense<0.000000e+00> : vector<64x128xf32>
    %22 = tpu.matmul %21, %9, %cst_15 {dimension_numbers = #tpu.dot_dimension_numbers<[1], [0], [0], [1], [0, 0, 1, 1], [], []>} : vector<64x128xbf16>, vector<128x128xbf16>, vector<64x128xf32> -> vector<64x128xf32>
    %23 = vector.broadcast %10 : vector<1x128xf32> to vector<64x128xf32>
    %24 = arith.addf %22, %23 : vector<64x128xf32>
    %c0_16 = arith.constant 0 : index
    %c256 = arith.constant 256 : index
    %25 = vector.load %arg6[%c0_16, %c256] : memref<64x512xf32, #tpu.memory_space<vmem>>, vector<64x128xf32>
    tpu.vector_store %arg6[%c0_16, %c256], %24 {strides = array<i32>} : memref<64x512xf32, #tpu.memory_space<vmem>>, vector<64x128xf32>,
    %26 = vector.extract_strided_slice %8 {offsets = [0, 384], sizes = [64, 128], strides = [1, 1]} : vector<64x512xbf16> to vector<64x128xbf16>
    %cst_17 = arith.constant dense<0.000000e+00> : vector<64x128xf32>
    %27 = tpu.matmul %26, %9, %cst_17 {dimension_numbers = #tpu.dot_dimension_numbers<[1], [0], [0], [1], [0, 0, 1, 1], [], []>} : vector<64x128xbf16>, vector<128x128xbf16>, vector<64x128xf32> -> vector<64x128xf32>
    %28 = vector.broadcast %10 : vector<1x128xf32> to vector<64x128xf32>
    %29 = arith.addf %27, %28 : vector<64x128xf32>
    %c0_18 = arith.constant 0 : index
    %c384 = arith.constant 384 : index
    %30 = vector.load %arg6[%c0_18, %c384] : memref<64x512xf32, #tpu.memory_space<vmem>>, vector<64x128xf32>
    tpu.vector_store %arg6[%c0_18, %c384], %29 {strides = array<i32>} : memref<64x512xf32, #tpu.memory_space<vmem>>, vector<64x128xf32>,
    return
  }
  func.func @transform_0(%arg0: i32) -> (i32, i32) {
    %c0_i32 = arith.constant 0 : i32
    %c0_i32_0 = arith.constant 0 : i32
    return %arg0, %c0_i32 : i32, i32
  }
  func.func @transform_1(%arg0: i32) -> (i32, i32) {
    %c0_i32 = arith.constant 0 : i32
    %c0_i32_0 = arith.constant 0 : i32
    %c0_i32_1 = arith.constant 0 : i32
    return %c0_i32, %c0_i32_0 : i32, i32
  }
  func.func @transform_2(%arg0: i32) -> (i32, i32) {
    %c0_i32 = arith.constant 0 : i32
    %c0_i32_0 = arith.constant 0 : i32
    %c0_i32_1 = arith.constant 0 : i32
    return %c0_i32, %c0_i32_0 : i32, i32
  }
  func.func @transform_3(%arg0: i32) -> (i32, i32) {
    %c0_i32 = arith.constant 0 : i32
    %c0_i32_0 = arith.constant 0 : i32
    %c0_i32_1 = arith.constant 0 : i32
    return %c0_i32, %c0_i32_0 : i32, i32
  }
  func.func @transform_4(%arg0: i32) -> (i32, i32) {
    %c0_i32 = arith.constant 0 : i32
    %c0_i32_0 = arith.constant 0 : i32
    %c0_i32_1 = arith.constant 0 : i32
    return %c0_i32, %c0_i32_0 : i32, i32
  }
  func.func @transform_5(%arg0: i32) -> (i32, i32) {
    %c0_i32 = arith.constant 0 : i32
    %c0_i32_0 = arith.constant 0 : i32
    return %arg0, %c0_i32 : i32, i32
  }
}

</mosaic_0001>

<bundles_post_ra>
// kernel: mask_rcnn_forward.3
= control target key start
LH: loop header
LB: loop body
LE: loop exit
PB: predicated region body
PF: predicated region fallthrough
CT: control target
= control target key end

     0   :  { %8 = vsyncpa [#allocation3], 0  ;;  %s1118_s0 = inlined_call_operand.vmem [shape: bf16[512,27], index: 0, kind: input, shape index: {}]   ;;  %s1119_s1 = inlined_call_operand.hbm [shape: bf16[27,128], index: 1, kind: input, shape index: {}]   ;;  %s1120_s2 = inlined_call_operand.hbm [shape: f32[1,128], index: 2, kind: input, shape index: {}]   ;;  %s1121_s3 = inlined_call_operand.vmem [shape: f32[512,128], index: 3, kind: output, shape index: {}]  }
   0x1   :  { %9 = vsyncpa [#allocation5], 0  ;;  %s947_s12 = smov 0  }
   0x2 LB: > { %s696_s13 = sadd.s32 4294967295, %s920_s12   ;;  %p698_p0 = scmp.ge.s32.totalorder %s920_s12, 1  ;;  %s920_s12 = sphi %s947_s12, %s15_s12  }
   0x3   : > { %p114_p1 = scmp.lt.s32.totalorder %s920_s12, 3  ;;  %s922_s14 = smov [#allocation2]  }
   0x4   : > { %s126_s15 = sshll.u32 %s922_s14, 4  ;;  %p961_p3 = scmp.eq.s32.totalorder %s696_s13, 0  ;;  %s127_s15 = int_to_ptr.vmem [resolvable:$true] %s126_s15 }
   0x5   : > { %p955_p2 = pnand %p698_p0, %p114_p1  ;;  %s923_s18 = smov [#allocation4]  }
   0x6   : > { %s140_s19 = sshll.u32 %s923_s18, 4  ;;  %s865_s21 = scalar_lea.vmem %s127_s15, 256  ;;  %s141_s19 = int_to_ptr.vmem [resolvable:$true] %s140_s19 }
   0x7   : > { %p812_p4 = pneg %p955_p2  ;;  %p866_p7 = scmp.ne.s32.totalorder %s127_s15, %s865_s21 }
   0x8   : > { %p873_p10 = scmp.lt.s32.totalorder %s127_s15, %s127_s15  ;;  %p874_p11 = scmp.lt.s32.totalorder %s865_s21, %s865_s21 }
   0x9   : > { %p969_p5 = pnand %p961_p3, %p812_p4 }
   0xa   : > { %p875_p12 = por %p874_p11, %p873_p10 }
   0xb   : > { %p856_p6 = pneg %p969_p5 }
   0xd   : > { %p868_p8 = pnand %p866_p7, %p856_p6 }
   0xf   : > { %p869_p9 = pneg %p868_p8 }
  0x11   : > { %p876_p13 = pnand %p875_p12, %p869_p9 }
  0x13   : > { %879 = shalt.err (!%p876_p13)
}
  0x14   : > { %s924_s22 = smov 64   ;;  %s925_s23 = smov 4  }
  0x15   : > { %815 = dma.hbm_to_vmem [thread:$0]  (!%p969_p5), %s1119_s1, 256, %s127_s15, [#allocation3], %s924_s22, %s924_s22, %s925_s23  }
  0x16   : > { %s891_s26 = scalar_lea.vmem %s141_s19, 16  ;;  %s898_s27 = scalar_lea.vmem %s141_s19, 32 }
  0x17   : > { %p892_p0 = scmp.ne.s32.totalorder %s141_s19, %s891_s26  ;;  %p899_p7 = scmp.lt.s32.totalorder %s141_s19, %s141_s19 }
  0x18   : > { %p900_p8 = scmp.lt.s32.totalorder %s898_s27, %s891_s26 }
  0x19   : > { %p894_p1 = pnand %p892_p0, %p856_p6 }
  0x1a   : > { %p901_p9 = por %p900_p8, %p899_p7 }
  0x1b   : > { %p895_p4 = pneg %p894_p1 }
  0x1d   : > { %p902_p10 = pnand %p901_p9, %p895_p4 }
  0x1f   : > { %905 = shalt.err (!%p902_p10)
}
  0x20   : > { %818 = dma.hbm_to_vmem [thread:$0]  (!%p969_p5), %s1120_s2, 16, %s141_s19, [#allocation5]  }
  0x21   : > { %162 = sbr.rel (%p955_p2) target bundleno = 282 (0x11a), region = 32 }
  0x26   : > { %911 = dma.done.wait (%p961_p3), [#allocation3], 256  }
  0x27   : > { %913 = vsyncadd (%p961_p3), [#allocation3], 4294967040 }
  0x28   : > { %915 = dma.done.wait (%p961_p3), [#allocation5], 16  }
  0x29   : > { %917 = vsyncadd (%p961_p3), [#allocation5], 4294967280  ;;  %vm386_vm0 = vcmask 1044480   ;;  %s705_s30 = sshll.u32 %s696_s13, 5  ;;  %vm387_vm1 = vcmask 1045504   ;;  %v926_v0 = vmov 65535  }
  0x2a   : > { %p191_p5 = scmp.lt.s32.totalorder %s705_s30, 63  ;;  %v388_v1 = vsel %vm386_vm0, 4294967295, %v926_v0  ;;  %v836_v3 = vld [vmem:[#allocation2 + $0x8] sm:$0x3f]   ;;  %v837_v4 = vld [vmem:[#allocation2] sm:$0xff]   ;;  %vm337_vm2 = vcmask 220160  }
  0x2b   : > { %v389_v2 = vsel %vm387_vm1, %v388_v1, 0  ;;  %v1043_v22 = vld [vmem:[#allocation4] ss:$0 sm:$0xff] }
  0x2c   : > { %s1126_s30 = smov (!%p191_p5, %s705_s30), 63  ;;  %v391_v5 = vand.u32 %v836_v3, %v389_v2 }
  0x2d   : > { %s706_s4 = sshll.u32 %s1126_s30, 2  ;;  %s708_s8 = sshll.u32 %s1126_s30, 3 }
  0x2e   : > { %s1009_s7 = scalar_lea.vmem %s1118_s0, %s706_s4  ;;  %764 = vmatprep.subr.bf16.mxu0 %v391_v5  ;;  %800 = vmatprep.subr.bf16.mxu1 %v391_v5  ;;  %s1051_s11 = scalar_lea.vmem %s1121_s3, %s708_s8 }
  0x2f   : > { %v838_v6 = vld [vmem:[%s1009_s7] sm:$0xff]   ;;  %765 = vmatpush3.bf16.msra.mxu0 %v391_v5  ;;  %802 = vmatpush3.bf16.msra.mxu1 %v391_v5  ;;  %v840_v8 = vld [vmem:[%s1009_s7 + $0x8] sm:$0xff]   ;;  %v842_v10 = vld [vmem:[%s1009_s7 + $0x10] sm:$0xff]  }
  0x30   : > { %v839_v7 = vld [vmem:[%s1009_s7 + $0x40] sm:$0xff]   ;;  %766 = vmatprep.subr.bf16.mxu0 %v837_v4  ;;  %801 = vmatprep.subr.bf16.mxu1 %v837_v4  ;;  %v841_v9 = vld [vmem:[%s1009_s7 + $0x48] sm:$0xff]   ;;  %v843_v11 = vld [vmem:[%s1009_s7 + $0x50] sm:$0xff]  }
  0x31   : > { %768 = vmatprep.mubr.msk.bf16.mxu0 %vm337_vm2, %v838_v6  ;;  %784 = vmatprep.mubr.msk.bf16.mxu1 %vm337_vm2, %v839_v7  ;;  %v844_v12 = vld [vmem:[%s1009_s7 + $0x18] sm:$0xff]   ;;  %v846_v14 = vld [vmem:[%s1009_s7 + $0x20] sm:$0xff]   ;;  %v848_v16 = vld [vmem:[%s1009_s7 + $0x28] sm:$0xff]  }
  0x32   : > { %v845_v13 = vld [vmem:[%s1009_s7 + $0x58] sm:$0xff]   ;;  %v847_v15 = vld [vmem:[%s1009_s7 + $0x60] sm:$0xff]   ;;  %v849_v17 = vld [vmem:[%s1009_s7 + $0x68] sm:$0xff]  }
  0x33   : > { %767 = vmatpush3.bf16.msra.mxu0 %v837_v4  ;;  %803 = vmatpush3.bf16.msra.mxu1 %v837_v4  ;;  %v850_v18 = vld [vmem:[%s1009_s7 + $0x30] sm:$0xff]   ;;  %v852_v20 = vld [vmem:[%s1009_s7 + $0x38] sm:$0xff]  }
  0x34   : > { %v851_v19 = vld [vmem:[%s1009_s7 + $0x70] sm:$0xff]   ;;  %v853_v21 = vld [vmem:[%s1009_s7 + $0x78] sm:$0xff]  }
  0x36   : > { %769 = vmatmul.mubr.msk.bf16.vlgmr.msra.gmra.mxu0 %vm337_vm2, %v840_v8  ;;  %785 = vmatmul.mubr.msk.bf16.vlgmr.msra.gmra.mxu1 %vm337_vm2, %v841_v9 }
  0x37   : > { %772 = vmatprep.mubr.msk.bf16.mxu0 %vm337_vm2, %v842_v10  ;;  %788 = vmatprep.mubr.msk.bf16.mxu1 %vm337_vm2, %v843_v11 }
  0x3e   : > { %773 = vmatmul.mubr.msk.bf16.gmra.mxu0 %vm337_vm2, %v844_v12  ;;  %789 = vmatmul.mubr.msk.bf16.gmra.mxu1 %vm337_vm2, %v845_v13 }
  0x3f   : > { %776 = vmatprep.mubr.msk.bf16.mxu0 %vm337_vm2, %v846_v14  ;;  %792 = vmatprep.mubr.msk.bf16.mxu1 %vm337_vm2, %v847_v15 }
  0x46   : > { %777 = vmatmul.mubr.msk.bf16.gmra.mxu0 %vm337_vm2, %v848_v16  ;;  %793 = vmatmul.mubr.msk.bf16.gmra.mxu1 %vm337_vm2, %v849_v17 }
  0x47   : > { %780 = vmatprep.mubr.msk.bf16.mxu0 %vm337_vm2, %v850_v18  ;;  %796 = vmatprep.mubr.msk.bf16.mxu1 %vm337_vm2, %v851_v19 }
  0x4e   : > { %781 = vmatmul.mubr.msk.bf16.gmra.mxu0 %vm337_vm2, %v852_v20  ;;  %797 = vmatmul.mubr.msk.bf16.gmra.mxu1 %vm337_vm2, %v853_v21 }
  0xf6   : > { %v770_v23 = vpop.f32.mrf.mxu0  ;;  %v786_v24 = vpop.f32.mrf.mxu1 }
  0xf7   : > { %v436_v25 = vadd.f32 %v770_v23, %v1043_v22  ;;  %v500_v26 = vadd.f32 %v786_v24, %v1043_v22 }
  0xf8   : > { %v427_v27 = vpop.f32.mrf.mxu0  ;;  %v491_v28 = vpop.f32.mrf.mxu1 }
  0xf9   : > { %v556_v29 = vmax.f32 %v436_v25, 0.0  ;;  %v572_v30 = vmax.f32 %v500_v26, 0.0  ;;  %v428_v31 = vadd.f32 %v1043_v22, %v427_v27  ;;  %v492_v32 = vadd.f32 %v1043_v22, %v491_v28 }
  0xfa   : > { %v771_v33 = vpop.f32.mrf.mxu0  ;;  %v787_v34 = vpop.f32.mrf.mxu1 }
  0xfb   : > { %588 = vst [vmem:[%s1051_s11 + $0x10] sm:$0xff] %v556_v29  ;;  %604 = vst [vmem:[%s1051_s11 + $0x90] sm:$0xff] %v572_v30  ;;  %v554_v35 = vmax.f32 %v428_v31, 0.0  ;;  %v570_v36 = vmax.f32 %v492_v32, 0.0  ;;  %v439_v37 = vadd.f32 %v771_v33, %v1043_v22  ;;  %v503_v38 = vadd.f32 %v787_v34, %v1043_v22 }
  0xfc   : > { %v430_v39 = vpop.f32.mrf.mxu0  ;;  %v494_v40 = vpop.f32.mrf.mxu1 }
  0xfd   : > { %586 = vst [vmem:[%s1051_s11] sm:$0xff] %v554_v35  ;;  %602 = vst [vmem:[%s1051_s11 + $0x80] sm:$0xff] %v570_v36  ;;  %v557_v41 = vmax.f32 %v439_v37, 0.0  ;;  %v573_v42 = vmax.f32 %v503_v38, 0.0  ;;  %v431_v43 = vadd.f32 %v1043_v22, %v430_v39  ;;  %v495_v44 = vadd.f32 %v1043_v22, %v494_v40 }
  0xfe   : > { %v774_v45 = vpop.f32.mrf.mxu0  ;;  %v790_v46 = vpop.f32.mrf.mxu1 }
  0xff   : > { %589 = vst [vmem:[%s1051_s11 + $0x18] sm:$0xff] %v557_v41  ;;  %605 = vst [vmem:[%s1051_s11 + $0x98] sm:$0xff] %v573_v42  ;;  %v555_v47 = vmax.f32 %v431_v43, 0.0  ;;  %v571_v48 = vmax.f32 %v495_v44, 0.0  ;;  %v452_v49 = vadd.f32 %v774_v45, %v1043_v22  ;;  %v516_v50 = vadd.f32 %v790_v46, %v1043_v22 }
 0x100   : > { %v443_v51 = vpop.f32.mrf.mxu0  ;;  %v507_v52 = vpop.f32.mrf.mxu1 }
 0x101   : > { %587 = vst [vmem:[%s1051_s11 + $0x8] sm:$0xff] %v555_v47  ;;  %603 = vst [vmem:[%s1051_s11 + $0x88] sm:$0xff] %v571_v48  ;;  %v560_v53 = vmax.f32 %v452_v49, 0.0  ;;  %v576_v54 = vmax.f32 %v516_v50, 0.0  ;;  %v444_v55 = vadd.f32 %v1043_v22, %v443_v51  ;;  %v508_v56 = vadd.f32 %v1043_v22, %v507_v52 }
 0x102   : > { %v775_v57 = vpop.f32.mrf.mxu0  ;;  %v791_v58 = vpop.f32.mrf.mxu1 }
 0x103   : > { %592 = vst [vmem:[%s1051_s11 + $0x30] sm:$0xff] %v560_v53  ;;  %608 = vst [vmem:[%s1051_s11 + $0xb0] sm:$0xff] %v576_v54  ;;  %v558_v59 = vmax.f32 %v444_v55, 0.0  ;;  %v574_v60 = vmax.f32 %v508_v56, 0.0  ;;  %v455_v61 = vadd.f32 %v775_v57, %v1043_v22  ;;  %v519_v62 = vadd.f32 %v791_v58, %v1043_v22 }
 0x104   : > { %v446_v63 = vpop.f32.mrf.mxu0  ;;  %v510_v0 = vpop.f32.mrf.mxu1 }
 0x105   : > { %590 = vst [vmem:[%s1051_s11 + $0x20] sm:$0xff] %v558_v59  ;;  %606 = vst [vmem:[%s1051_s11 + $0xa0] sm:$0xff] %v574_v60  ;;  %v561_v1 = vmax.f32 %v455_v61, 0.0  ;;  %v577_v2 = vmax.f32 %v519_v62, 0.0  ;;  %v447_v3 = vadd.f32 %v1043_v22, %v446_v63  ;;  %v511_v4 = vadd.f32 %v1043_v22, %v510_v0 }
 0x106   : > { %v778_v5 = vpop.f32.mrf.mxu0  ;;  %v794_v6 = vpop.f32.mrf.mxu1 }
 0x107   : > { %593 = vst [vmem:[%s1051_s11 + $0x38] sm:$0xff] %v561_v1  ;;  %609 = vst [vmem:[%s1051_s11 + $0xb8] sm:$0xff] %v577_v2  ;;  %v559_v7 = vmax.f32 %v447_v3, 0.0  ;;  %v575_v8 = vmax.f32 %v511_v4, 0.0  ;;  %v468_v9 = vadd.f32 %v778_v5, %v1043_v22  ;;  %v532_v10 = vadd.f32 %v794_v6, %v1043_v22 }
 0x108   : > { %v459_v11 = vpop.f32.mrf.mxu0  ;;  %v523_v12 = vpop.f32.mrf.mxu1 }
 0x109   : > { %591 = vst [vmem:[%s1051_s11 + $0x28] sm:$0xff] %v559_v7  ;;  %607 = vst [vmem:[%s1051_s11 + $0xa8] sm:$0xff] %v575_v8  ;;  %v564_v13 = vmax.f32 %v468_v9, 0.0  ;;  %v580_v14 = vmax.f32 %v532_v10, 0.0  ;;  %v460_v15 = vadd.f32 %v1043_v22, %v459_v11  ;;  %v524_v16 = vadd.f32 %v1043_v22, %v523_v12 }
 0x10a   : > { %v779_v17 = vpop.f32.mrf.mxu0  ;;  %v795_v18 = vpop.f32.mrf.mxu1 }
 0x10b   : > { %596 = vst [vmem:[%s1051_s11 + $0x50] sm:$0xff] %v564_v13  ;;  %612 = vst [vmem:[%s1051_s11 + $0xd0] sm:$0xff] %v580_v14  ;;  %v562_v19 = vmax.f32 %v460_v15, 0.0  ;;  %v578_v20 = vmax.f32 %v524_v16, 0.0  ;;  %v471_v21 = vadd.f32 %v779_v17, %v1043_v22  ;;  %v535_v23 = vadd.f32 %v795_v18, %v1043_v22 }
 0x10c   : > { %v462_v24 = vpop.f32.mrf.mxu0  ;;  %v526_v25 = vpop.f32.mrf.mxu1 }
 0x10d   : > { %594 = vst [vmem:[%s1051_s11 + $0x40] sm:$0xff] %v562_v19  ;;  %610 = vst [vmem:[%s1051_s11 + $0xc0] sm:$0xff] %v578_v20  ;;  %v565_v26 = vmax.f32 %v471_v21, 0.0  ;;  %v581_v27 = vmax.f32 %v535_v23, 0.0  ;;  %v463_v28 = vadd.f32 %v1043_v22, %v462_v24  ;;  %v527_v29 = vadd.f32 %v1043_v22, %v526_v25 }
 0x10e   : > { %v782_v30 = vpop.f32.mrf.mxu0  ;;  %v798_v31 = vpop.f32.mrf.mxu1 }
 0x10f   : > { %597 = vst [vmem:[%s1051_s11 + $0x58] sm:$0xff] %v565_v26  ;;  %613 = vst [vmem:[%s1051_s11 + $0xd8] sm:$0xff] %v581_v27  ;;  %v563_v32 = vmax.f32 %v463_v28, 0.0  ;;  %v579_v33 = vmax.f32 %v527_v29, 0.0  ;;  %v484_v34 = vadd.f32 %v782_v30, %v1043_v22  ;;  %v548_v35 = vadd.f32 %v798_v31, %v1043_v22 }
 0x110   : > { %v475_v36 = vpop.f32.mrf.mxu0  ;;  %v539_v37 = vpop.f32.mrf.mxu1 }
 0x111   : > { %595 = vst [vmem:[%s1051_s11 + $0x48] sm:$0xff] %v563_v32  ;;  %611 = vst [vmem:[%s1051_s11 + $0xc8] sm:$0xff] %v579_v33  ;;  %v568_v38 = vmax.f32 %v484_v34, 0.0  ;;  %v584_v39 = vmax.f32 %v548_v35, 0.0  ;;  %v476_v40 = vadd.f32 %v1043_v22, %v475_v36  ;;  %v540_v41 = vadd.f32 %v1043_v22, %v539_v37 }
 0x112   : > { %v783_v42 = vpop.f32.mrf.mxu0  ;;  %v799_v43 = vpop.f32.mrf.mxu1 }
 0x113   : > { %600 = vst [vmem:[%s1051_s11 + $0x70] sm:$0xff] %v568_v38  ;;  %616 = vst [vmem:[%s1051_s11 + $0xf0] sm:$0xff] %v584_v39  ;;  %v566_v44 = vmax.f32 %v476_v40, 0.0  ;;  %v582_v45 = vmax.f32 %v540_v41, 0.0  ;;  %v487_v46 = vadd.f32 %v783_v42, %v1043_v22  ;;  %v551_v47 = vadd.f32 %v799_v43, %v1043_v22 }
 0x114   : > { %v478_v48 = vpop.f32.mrf.mxu0  ;;  %v542_v49 = vpop.f32.mrf.mxu1 }
 0x115   : > { %598 = vst [vmem:[%s1051_s11 + $0x60] sm:$0xff] %v566_v44  ;;  %614 = vst [vmem:[%s1051_s11 + $0xe0] sm:$0xff] %v582_v45  ;;  %v569_v50 = vmax.f32 %v487_v46, 0.0  ;;  %v585_v51 = vmax.f32 %v551_v47, 0.0  ;;  %v479_v52 = vadd.f32 %v1043_v22, %v478_v48  ;;  %v543_v53 = vadd.f32 %v1043_v22, %v542_v49 }
 0x117   : > { %601 = vst [vmem:[%s1051_s11 + $0x78] sm:$0xff] %v569_v50  ;;  %617 = vst [vmem:[%s1051_s11 + $0xf8] sm:$0xff] %v585_v51  ;;  %v567_v54 = vmax.f32 %v479_v52, 0.0  ;;  %v583_v55 = vmax.f32 %v543_v53, 0.0 }
 0x119   : > { %599 = vst [vmem:[%s1051_s11 + $0x68] sm:$0xff] %v567_v54  ;;  %615 = vst [vmem:[%s1051_s11 + $0xe8] sm:$0xff] %v583_v55 }
 0x11a PF: > { %s15_s12 = sadd.s32 1, %s920_s12  }
 0x11b   : > { %p12_p2 = scmp.ge.s32.totalorder %s15_s12, 4  }
 0x11d   :  { %14 = sbr.rel (!%p12_p2) target bundleno = 2 (0x2), region = 71 }
 0x122   :  { %640 = vsyncpa [#allocation3], 1 }
 0x123   :  { %642 = vsyncpa [#allocation3 + $0x1], 1 }
 0x124   :  { %643 = vsyncpa [#allocation5], 1 }

// kernel: mask_rcnn_forward.5
= control target key start
LH: loop header
LB: loop body
LE: loop exit
PB: predicated region body
PF: predicated region fallthrough
CT: control target
= control target key end

     0   :  { %s1402_s18 = smov 0   ;;  %s1775_s0 = inlined_call_operand.vmem [shape: bf16[128,128], index: 0, kind: input, shape index: {}]   ;;  %s1776_s1 = inlined_call_operand.vmem [shape: bf16[128,512], index: 1, kind: input, shape index: {}]   ;;  %s1777_s2 = inlined_call_operand.vmem [shape: f32[1,512], index: 2, kind: input, shape index: {}]   ;;  %s1778_s3 = inlined_call_operand.vmem [shape: bf16[128,128], index: 3, kind: input, shape index: {}]   ;;  %s1779_s4 = inlined_call_operand.vmem [shape: f32[1,128], index: 4, kind: input, shape index: {}]   ;;  %s1780_s5 = inlined_call_operand.vmem [shape: f32[128,512], index: 5, kind: output, shape index: {}]  }
   0x1 LB: > { %s1092_s19 = sadd.s32 4294967295, %s1369_s18   ;;  %p1096_p0 = scmp.ge.s32.totalorder %s1369_s18, 1  ;;  %s1369_s18 = sphi %s1402_s18, %s15_s18  }
   0x2   : > { %p188_p1 = scmp.lt.s32.totalorder %s1369_s18, 3 }
   0x4   : > { %p189_p2 = pnand %p1096_p0, %p188_p1 }
   0x5   : > { %s1097_s24 = sshll.u32 (!%p189_p2), %s1092_s19, 3 }
   0x6   : > { %192 = sbr.rel (%p189_p2) target bundleno = 500 (0x1f4), region = 40  ;;  %p218_p3 = scmp.lt.s32.totalorder (!%p189_p2), %s1097_s24, 15 }
   0xb   : > { %v1303_v0 = vld [vmem:[%s1776_s1 + $0xe4] ss:$16 sps:$4 sm:$0xff]   ;;  %v1305_v1 = vld [vmem:[%s1776_s1 + $0xe0] ss:$16 sps:$4 sm:$0xff]   ;;  %v1371_v2 = vmov 0   ;;  %s1782_s24 = smov (!%p218_p3, %s1097_s24), 15  ;;  %v273_v45 = vlaneseq }
   0xc   : > { %509 = vmatprep.mubr.bf16.mxu0 %v1371_v2  ;;  %582 = vmatprep.mubr.bf16.mxu1 %v1371_v2  ;;  %v1306_v3 = vld [vmem:[%s1776_s1 + $0xc4] ss:$16 sps:$4 sm:$0xff]   ;;  %v1308_v4 = vld [vmem:[%s1776_s1 + $0xc0] ss:$16 sps:$4 sm:$0xff]   ;;  %v1318_v7 = vld [vmem:[%s1776_s1 + $0xec] ss:$16 sps:$4 sm:$0xff]  }
   0xd   : > { %477 = vmatprep.subr.bf16.mxu0 %v1303_v0  ;;  %v1309_v5 = vld [vmem:[%s1776_s1 + $0xa4] ss:$16 sps:$4 sm:$0xff]   ;;  %v1311_v6 = vld [vmem:[%s1776_s1 + $0xa0] ss:$16 sps:$4 sm:$0xff]   ;;  %v1320_v8 = vld [vmem:[%s1776_s1 + $0xe8] ss:$16 sps:$4 sm:$0xff]   ;;  %550 = vmatprep.subr.bf16.mxu1 %v1318_v7 }
   0xe   : > { %478 = vmatpush1.bf16.msra.mxu0 %v1305_v1  ;;  %v1312_v9 = vld [vmem:[%s1776_s1 + $0x84] ss:$16 sps:$4 sm:$0xff]   ;;  %551 = vmatpush1.bf16.msra.mxu1 %v1320_v8  ;;  %v1324_v10 = vld [vmem:[%s1776_s1 + $0xcc] ss:$16 sps:$4 sm:$0xff]   ;;  %v1326_v11 = vld [vmem:[%s1776_s1 + $0xc8] ss:$16 sps:$4 sm:$0xff]  }
   0xf   : > { %479 = vmatprep.subr.bf16.mxu0 %v1306_v3  ;;  %v1314_v12 = vld [vmem:[%s1776_s1 + $0x80] ss:$16 sps:$4 sm:$0xff]   ;;  %v1315_v13 = vld [vmem:[%s1776_s1 + $0x64] ss:$16 sps:$4 sm:$0xff]   ;;  %552 = vmatprep.subr.bf16.mxu1 %v1324_v10  ;;  %v1330_v14 = vld [vmem:[%s1776_s1 + $0xac] ss:$16 sps:$4 sm:$0xff]  }
  0x10   : > { %s1098_s26 = sshll.u32 %s1782_s24, 2  ;;  %v1332_v15 = vld [vmem:[%s1776_s1 + $0xa8] ss:$16 sps:$4 sm:$0xff]   ;;  %v1317_v16 = vld [vmem:[%s1776_s1 + $0x60] ss:$16 sps:$4 sm:$0xff]   ;;  %v1600_v46 = vshrl.u32 %v273_v45, 7 }
  0x11   : > { %v1336_v17 = vld [vmem:[%s1776_s1 + $0x8c] ss:$16 sps:$4 sm:$0xff]   ;;  %s1469_s10 = scalar_lea.vmem %s1775_s0, %s1098_s26  ;;  %v1321_v18 = vld [vmem:[%s1776_s1 + $0x44] ss:$16 sps:$4 sm:$0xff]   ;;  %v1338_v19 = vld [vmem:[%s1776_s1 + $0x88] ss:$16 sps:$4 sm:$0xff]  }
  0x12   : > { %480 = vmatpush1.bf16.msra.mxu0 %v1308_v4  ;;  %553 = vmatpush1.bf16.msra.mxu1 %v1326_v11  ;;  %v1323_v20 = vld [vmem:[%s1776_s1 + $0x40] ss:$16 sps:$4 sm:$0xff]   ;;  %v1340_v21 = vld [vmem:[%s1776_s1 + $0x6c] ss:$16 sps:$4 sm:$0xff]   ;;  %v1327_v22 = vld [vmem:[%s1776_s1 + $0x24] ss:$16 sps:$4 sm:$0xff]  }
  0x13   : > { %481 = vmatprep.subr.bf16.mxu0 %v1309_v5  ;;  %554 = vmatprep.subr.bf16.mxu1 %v1330_v14  ;;  %v1329_v23 = vld [vmem:[%s1776_s1 + $0x20] ss:$16 sps:$4 sm:$0xff]   ;;  %v1342_v24 = vld [vmem:[%s1776_s1 + $0x68] ss:$16 sps:$4 sm:$0xff]   ;;  %v1343_v25 = vld [vmem:[%s1776_s1 + $0x4c] ss:$16 sps:$4 sm:$0xff]  }
  0x14   : > { %v1333_v26 = vld [vmem:[%s1776_s1 + $0x4] ss:$16 sps:$4 sm:$0xff]   ;;  %v1335_v27 = vld [vmem:[%s1776_s1] ss:$16 sps:$4 sm:$0xff]   ;;  %v1345_v28 = vld [vmem:[%s1776_s1 + $0x48] ss:$16 sps:$4 sm:$0xff]  }
  0x15   : > { %v1347_v29 = vld [vmem:[%s1776_s1 + $0x2c] ss:$16 sps:$4 sm:$0xff]   ;;  %v1339_v30 = vld [vmem:[%s1469_s10] sm:$0xff]   ;;  %v1349_v32 = vld [vmem:[%s1776_s1 + $0x28] ss:$16 sps:$4 sm:$0xff]   ;;  %v275_v47 = vsub.s32 0, %v1600_v46 }
  0x16   : > { %482 = vmatpush1.bf16.msra.mxu0 %v1311_v6  ;;  %555 = vmatpush1.bf16.msra.mxu1 %v1332_v15  ;;  %v1511_v31 = vld [vmem:[%s1778_s3 + $0x38] sm:$0xff]   ;;  %v1523_v34 = vld [vmem:[%s1778_s3 + $0x30] sm:$0xff]   ;;  %v1534_v36 = vld [vmem:[%s1778_s3 + $0x28] sm:$0xff]   ;;  %v279_v49 = vsub.s32 1, %v1600_v46  ;;  %s1149_s14 = sshll.u32 %s1782_s24, 5 }
  0x17   : > { %483 = vmatprep.subr.bf16.mxu0 %v1312_v9  ;;  %556 = vmatprep.subr.bf16.mxu1 %v1336_v17  ;;  %v1350_v33 = vld [vmem:[%s1776_s1 + $0xc] ss:$16 sps:$4 sm:$0xff]   ;;  %v1352_v35 = vld [vmem:[%s1776_s1 + $0x8] ss:$16 sps:$4 sm:$0xff]   ;;  %v1543_v38 = vld [vmem:[%s1778_s3 + $0x20] sm:$0xff]   ;;  %s1706_s20 = scalar_lea.vmem %s1780_s5, %s1149_s14 }
  0x18   : > { %v1346_v37 = vld [vmem:[%s1469_s10 + $0x8] sm:$0xff]   ;;  %v1353_v39 = vld [vmem:[%s1469_s10 + $0x10] sm:$0xff]   ;;  %v1354_v40 = vld [vmem:[%s1469_s10 + $0x18] sm:$0xff]  }
  0x19   : > { %v1565_v41 = vld [vmem:[%s1778_s3 + $0x18] sm:$0xff]   ;;  %v1574_v42 = vld [vmem:[%s1778_s3 + $0x10] sm:$0xff]   ;;  %v1583_v43 = vld [vmem:[%s1778_s3 + $0x8] sm:$0xff]  }
  0x1a   : > { %484 = vmatpush1.bf16.msra.mxu0 %v1314_v12  ;;  %557 = vmatpush1.bf16.msra.mxu1 %v1338_v19  ;;  %v1592_v44 = vld [vmem:[%s1778_s3] sm:$0xff]  }
  0x1b   : > { %485 = vmatprep.subr.bf16.mxu0 %v1315_v13  ;;  %558 = vmatprep.subr.bf16.mxu1 %v1340_v21  ;;  %v1606_v48 = vld [vmem:[%s1777_s2] sm:$0xf] }
  0x1c   : > { %v1610_v50 = vrot.slane %v1606_v48, %v275_v47  ;;  %v1613_v52 = vrot.slane %v1606_v48, %v279_v49 }
  0x1e   : > { %486 = vmatpush1.bf16.msra.mxu0 %v1317_v16  ;;  %559 = vmatpush1.bf16.msra.mxu1 %v1342_v24 }
  0x1f   : > { %487 = vmatprep.subr.bf16.mxu0 %v1321_v18  ;;  %560 = vmatprep.subr.bf16.mxu1 %v1343_v25 }
  0x22   : > { %488 = vmatpush1.bf16.msra.mxu0 %v1323_v20  ;;  %561 = vmatpush1.bf16.msra.mxu1 %v1345_v28  ;;  %v287_v28 = vsub.s32 3, %v1600_v46 }
  0x23   : > { %489 = vmatprep.subr.bf16.mxu0 %v1327_v22  ;;  %562 = vmatprep.subr.bf16.mxu1 %v1347_v29 }
  0x24   : > { %v1645_v47 = vrot.slane %v1606_v48, %v287_v28 }
  0x26   : > { %490 = vmatpush1.bf16.msra.mxu0 %v1329_v23  ;;  %563 = vmatpush1.bf16.msra.mxu1 %v1349_v32  ;;  %v283_v23 = vsub.s32 2, %v1600_v46 }
  0x27   : > { %491 = vmatprep.subr.bf16.mxu0 %v1333_v26  ;;  %564 = vmatprep.subr.bf16.mxu1 %v1350_v33 }
  0x2a   : > { %492 = vmatpush1.bf16.msra.mxu0 %v1335_v27  ;;  %565 = vmatpush1.bf16.msra.mxu1 %v1352_v35  ;;  %v1639_v35 = vrot.slane %v1606_v48, %v283_v23 }
  0x2b   : > { %1198 = vmatprep.subr.bf16.mxu0 %v1511_v31  ;;  %1222 = vmatprep.subr.bf16.mxu1 %v1511_v31 }
  0x2d   : > { %510 = vmatmul.mubr.bf16.vlgmr.msra.gmra.mxu0 %v1339_v30  ;;  %583 = vmatmul.mubr.bf16.vlgmr.msra.gmra.mxu1 %v1339_v30 }
  0x2e   : > { %519 = vmatprep.mubr.bf16.mxu0 %v1371_v2  ;;  %1199 = vmatpush3.bf16.msra.mxu0 %v1511_v31 }
  0x2f   : > { %1200 = vmatprep.subr.bf16.mxu0 %v1523_v34  ;;  %592 = vmatprep.mubr.bf16.mxu1 %v1371_v2 }
  0x30   : > { %1223 = vmatpush3.bf16.msra.mxu1 %v1511_v31 }
  0x31   : > { %1224 = vmatprep.subr.bf16.mxu1 %v1523_v34 }
  0x32   : > { %1201 = vmatpush3.bf16.msra.mxu0 %v1523_v34 }
  0x33   : > { %1202 = vmatprep.subr.bf16.mxu0 %v1534_v36 }
  0x34   : > { %1225 = vmatpush3.bf16.msra.mxu1 %v1523_v34 }
  0x35   : > { %520 = vmatmul.mubr.bf16.gmra.mxu0 %v1346_v37  ;;  %1226 = vmatprep.subr.bf16.mxu1 %v1534_v36 }
  0x36   : > { %529 = vmatprep.mubr.bf16.mxu0 %v1371_v2  ;;  %1203 = vmatpush3.bf16.msra.mxu0 %v1534_v36 }
  0x37   : > { %1204 = vmatprep.subr.bf16.mxu0 %v1543_v38  ;;  %593 = vmatmul.mubr.bf16.gmra.mxu1 %v1346_v37 }
  0x38   : > { %602 = vmatprep.mubr.bf16.mxu1 %v1371_v2  ;;  %1227 = vmatpush3.bf16.msra.mxu1 %v1534_v36 }
  0x39   : > { %1228 = vmatprep.subr.bf16.mxu1 %v1543_v38 }
  0x3a   : > { %1205 = vmatpush3.bf16.msra.mxu0 %v1543_v38 }
  0x3b   : > { %1206 = vmatprep.subr.bf16.mxu0 %v1565_v41 }
  0x3c   : > { %1229 = vmatpush3.bf16.msra.mxu1 %v1543_v38 }
  0x3d   : > { %530 = vmatmul.mubr.bf16.gmra.mxu0 %v1353_v39  ;;  %1230 = vmatprep.subr.bf16.mxu1 %v1565_v41 }
  0x3e   : > { %539 = vmatprep.mubr.bf16.mxu0 %v1371_v2  ;;  %1207 = vmatpush3.bf16.msra.mxu0 %v1565_v41 }
  0x3f   : > { %603 = vmatmul.mubr.bf16.gmra.mxu1 %v1353_v39  ;;  %1208 = vmatprep.subr.bf16.mxu0 %v1574_v42 }
  0x40   : > { %612 = vmatprep.mubr.bf16.mxu1 %v1371_v2  ;;  %1231 = vmatpush3.bf16.msra.mxu1 %v1565_v41 }
  0x41   : > { %1232 = vmatprep.subr.bf16.mxu1 %v1574_v42 }
  0x42   : > { %1209 = vmatpush3.bf16.msra.mxu0 %v1574_v42 }
  0x43   : > { %1210 = vmatprep.subr.bf16.mxu0 %v1583_v43 }
  0x44   : > { %1233 = vmatpush3.bf16.msra.mxu1 %v1574_v42 }
  0x45   : > { %540 = vmatmul.mubr.bf16.gmra.mxu0 %v1354_v40  ;;  %1234 = vmatprep.subr.bf16.mxu1 %v1583_v43 }
  0x46   : > { %1211 = vmatpush3.bf16.msra.mxu0 %v1583_v43 }
  0x47   : > { %613 = vmatmul.mubr.bf16.gmra.mxu1 %v1354_v40  ;;  %1212 = vmatprep.subr.bf16.mxu0 %v1592_v44 }
  0x48   : > { %1235 = vmatpush3.bf16.msra.mxu1 %v1583_v43 }
  0x49   : > { %1236 = vmatprep.subr.bf16.mxu1 %v1592_v44 }
  0x4a   : > { %1213 = vmatpush3.bf16.msra.mxu0 %v1592_v44 }
  0x4b   : > { %1246 = vmatprep.subr.bf16.mxu0 %v1511_v31 }
  0x4c   : > { %1237 = vmatpush3.bf16.msra.mxu1 %v1592_v44 }
  0x4d   : > { %1270 = vmatprep.subr.bf16.mxu1 %v1511_v31 }
  0xed   : > { %v511_v51 = vpop.f32.mrf.mxu0  ;;  %v584_v62 = vpop.f32.mrf.mxu1 }
  0xee   : > { %v512_v54 = vadd.f32 %v511_v51, %v1610_v50 }
  0xef   : > { %v513_v53 = vpop.f32.mrf.mxu0  ;;  %v586_v3 = vpop.f32.mrf.mxu1 }
  0xf0   : > { %v514_v56 = vadd.f32 %v513_v53, %v1613_v52  ;;  %v623_v59 = vmax.f32 %v512_v54, 0.0 }
  0xf1   : > { %v515_v55 = vpop.f32.mrf.mxu0  ;;  %v588_v7 = vpop.f32.mrf.mxu1 }
  0xf2   : > { %v516_v57 = vadd.f32 %v515_v55, %v1610_v50  ;;  %v624_v0 = vmax.f32 %v514_v56, 0.0  ;;  %v585_v55 = vadd.f32 %v584_v62, %v1639_v35  ;;  %v589_v56 = vadd.f32 %v588_v7, %v1639_v35 }
  0xf3   : > { %v517_v58 = vpop.f32.mrf.mxu0  ;;  %v590_v11 = vpop.f32.mrf.mxu1 }
  0xf4   : > { %v627_v60 = vmax.f32 %v516_v57, 0.0  ;;  %v518_v61 = vadd.f32 %v517_v58, %v1613_v52 }
  0xf5   : > { %v521_v63 = vpop.f32.mrf.mxu0 }
  0xf6   : > { %v655_v1 = vpack.c.bf16 %v627_v60, %v623_v59  ;;  %v628_v2 = vmax.f32 %v518_v61, 0.0  ;;  %v522_v6 = vadd.f32 %v521_v63, %v1610_v50  ;;  %v587_v59 = vadd.f32 %v586_v3, %v1645_v47 }
  0xf7   : > { %v523_v4 = vpop.f32.mrf.mxu0  ;;  %v1623_v16 = vpop.f32.mrf.mxu1  ;;  %v591_v60 = vadd.f32 %v590_v11, %v1645_v47 }
  0xf8   : > { %v656_v5 = vpack.c.bf16 %v628_v2, %v624_v0  ;;  %1214 = vmatprep.mubr.bf16.mxu0 %v655_v1  ;;  %v524_v9 = vadd.f32 %v523_v4, %v1613_v52  ;;  %v631_v13 = vmax.f32 %v522_v6, 0.0  ;;  %v629_v1 = vmax.f32 %v589_v56, 0.0 }
  0xf9   : > { %v525_v8 = vpop.f32.mrf.mxu0  ;;  %v1626_v22 = vpop.f32.mrf.mxu1  ;;  %v626_v6 = vmax.f32 %v587_v59, 0.0  ;;  %v630_v7 = vmax.f32 %v591_v60, 0.0 }
  0xfa   : > { %v526_v10 = vadd.f32 %v525_v8, %v1610_v50  ;;  %1238 = vmatprep.mubr.bf16.mxu1 %v656_v5  ;;  %v632_v18 = vmax.f32 %v524_v9, 0.0 }
  0xfb   : > { %v527_v12 = vpop.f32.mrf.mxu0  ;;  %v1630_v27 = vpop.f32.mrf.mxu1  ;;  %v658_v11 = vpack.c.bf16 %v630_v7, %v626_v6 }
  0xfc   : > { %v635_v14 = vmax.f32 %v526_v10, 0.0  ;;  %v528_v15 = vadd.f32 %v527_v12, %v1613_v52  ;;  %v595_v12 = vadd.f32 %v1623_v16, %v1639_v35 }
  0xfd   : > { %v531_v17 = vpop.f32.mrf.mxu0  ;;  %v1636_v33 = vpop.f32.mrf.mxu1 }
  0xfe   : > { %v659_v19 = vpack.c.bf16 %v635_v14, %v631_v13  ;;  %v636_v20 = vmax.f32 %v528_v15, 0.0  ;;  %v532_v21 = vadd.f32 %v531_v17, %v1610_v50  ;;  %v599_v13 = vadd.f32 %v1630_v27, %v1639_v35 }
  0xff   : > { %v533_v24 = vpop.f32.mrf.mxu0  ;;  %v604_v46 = vpop.f32.mrf.mxu1  ;;  %v601_v17 = vadd.f32 %v1636_v33, %v1645_v47 }
 0x100   : > { %v660_v25 = vpack.c.bf16 %v636_v20, %v632_v18  ;;  %v534_v26 = vadd.f32 %v533_v24, %v1613_v52  ;;  %1215 = vmatmul.mubr.bf16.vlgmr.msra.gmra.mxu0 %v659_v19  ;;  %v639_v30 = vmax.f32 %v532_v21, 0.0  ;;  %v605_v14 = vadd.f32 %v604_v46, %v1639_v35 }
 0x101   : > { %1247 = vmatpush3.bf16.msra.mxu0 %v1511_v31  ;;  %v535_v29 = vpop.f32.mrf.mxu0  ;;  %v633_v20 = vmax.f32 %v595_v12, 0.0  ;;  %v637_v21 = vmax.f32 %v599_v13, 0.0  ;;  %v638_v24 = vmax.f32 %v601_v17, 0.0 }
 0x102   : > { %v536_v32 = vadd.f32 %v535_v29, %v1610_v50  ;;  %1239 = vmatmul.mubr.bf16.vlgmr.msra.gmra.mxu1 %v660_v25  ;;  %1248 = vmatprep.subr.bf16.mxu0 %v1523_v34  ;;  %v640_v39 = vmax.f32 %v534_v26, 0.0 }
 0x103   : > { %1271 = vmatpush3.bf16.msra.mxu1 %v1511_v31  ;;  %v537_v37 = vpop.f32.mrf.mxu0  ;;  %v606_v31 = vpop.f32.mrf.mxu1  ;;  %v661_v28 = vpack.c.bf16 %v637_v21, %v633_v20 }
 0x104   : > { %v643_v40 = vmax.f32 %v536_v32, 0.0  ;;  %v538_v45 = vadd.f32 %v537_v37, %v1613_v52  ;;  %1272 = vmatprep.subr.bf16.mxu1 %v1523_v34  ;;  %v607_v16 = vadd.f32 %v606_v31, %v1645_v47 }
 0x105   : > { %1249 = vmatpush3.bf16.msra.mxu0 %v1523_v34  ;;  %v541_v49 = vpop.f32.mrf.mxu0  ;;  %v608_v63 = vpop.f32.mrf.mxu1 }
 0x106   : > { %v663_v51 = vpack.c.bf16 %v643_v40, %v639_v30  ;;  %v644_v53 = vmax.f32 %v538_v45, 0.0  ;;  %v542_v54 = vadd.f32 %v541_v49, %v1610_v50  ;;  %1250 = vmatprep.subr.bf16.mxu0 %v1534_v36  ;;  %v609_v15 = vadd.f32 %v608_v63, %v1639_v35 }
 0x107   : > { %1273 = vmatpush3.bf16.msra.mxu1 %v1523_v34  ;;  %v543_v57 = vpop.f32.mrf.mxu0  ;;  %v625_v34 = vmax.f32 %v585_v55, 0.0  ;;  %v610_v8 = vpop.f32.mrf.mxu1  ;;  %v642_v25 = vmax.f32 %v607_v16, 0.0 }
 0x108   : > { %v664_v58 = vpack.c.bf16 %v644_v53, %v640_v39  ;;  %v544_v48 = vadd.f32 %v543_v57, %v1613_v52  ;;  %1274 = vmatprep.subr.bf16.mxu1 %v1534_v36  ;;  %1218 = vmatprep.mubr.bf16.mxu0 %v663_v51  ;;  %v647_v62 = vmax.f32 %v542_v54, 0.0  ;;  %v611_v18 = vadd.f32 %v610_v8, %v1645_v47 }
 0x109   : > { %1251 = vmatpush3.bf16.msra.mxu0 %v1534_v36  ;;  %v545_v61 = vpop.f32.mrf.mxu0  ;;  %v657_v10 = vpack.c.bf16 %v629_v1, %v625_v34  ;;  %v645_v23 = vmax.f32 %v609_v15, 0.0 }
 0x10a   : > { %v546_v0 = vadd.f32 %v545_v61, %v1610_v50  ;;  %1242 = vmatprep.mubr.bf16.mxu1 %v664_v58  ;;  %1252 = vmatprep.subr.bf16.mxu0 %v1543_v38  ;;  %v648_v4 = vmax.f32 %v544_v48, 0.0  ;;  %v646_v26 = vmax.f32 %v611_v18, 0.0 }
 0x10b   : > { %1275 = vmatpush3.bf16.msra.mxu1 %v1534_v36  ;;  %v547_v2 = vpop.f32.mrf.mxu0 }
 0x10c   : > { %v651_v5 = vmax.f32 %v546_v0, 0.0  ;;  %v548_v3 = vadd.f32 %v547_v2, %v1613_v52  ;;  %1276 = vmatprep.subr.bf16.mxu1 %v1543_v38  ;;  %v614_v52 = vpop.f32.mrf.mxu1  ;;  %v666_v39 = vpack.c.bf16 %v646_v26, %v642_v25 }
 0x10d   : > { %1253 = vmatpush3.bf16.msra.mxu0 %v1543_v38  ;;  %v615_v29 = vadd.f32 %v614_v52, %v1639_v35 }
 0x10e   : > { %v667_v50 = vpack.c.bf16 %v651_v5, %v647_v62  ;;  %v652_v9 = vmax.f32 %v548_v3, 0.0  ;;  %1254 = vmatprep.subr.bf16.mxu0 %v1565_v41 }
 0x10f   : > { %1277 = vmatpush3.bf16.msra.mxu1 %v1543_v38  ;;  %v616_v38 = vpop.f32.mrf.mxu1  ;;  %v649_v40 = vmax.f32 %v615_v29, 0.0 }
 0x110   : > { %v668_v36 = vpack.c.bf16 %v652_v9, %v648_v4  ;;  %1219 = vmatmul.mubr.bf16.gmra.mxu0 %v667_v50  ;;  %1278 = vmatprep.subr.bf16.mxu1 %v1565_v41 }
 0x111   : > { %1255 = vmatpush3.bf16.msra.mxu0 %v1565_v41  ;;  %1262 = vmatprep.mubr.bf16.mxu0 %v657_v10  ;;  %v618_v19 = vpop.f32.mrf.mxu1 }
 0x112   : > { %1243 = vmatmul.mubr.bf16.gmra.mxu1 %v668_v36  ;;  %1256 = vmatprep.subr.bf16.mxu0 %v1574_v42  ;;  %v619_v30 = vadd.f32 %v618_v19, %v1639_v35 }
 0x113   : > { %1279 = vmatpush3.bf16.msra.mxu1 %v1565_v41  ;;  %1286 = vmatprep.mubr.bf16.mxu1 %v658_v11  ;;  %v597_v41 = vadd.f32 %v1626_v22, %v1645_v47  ;;  %v620_v27 = vpop.f32.mrf.mxu1 }
 0x114   : > { %1280 = vmatprep.subr.bf16.mxu1 %v1574_v42  ;;  %v621_v37 = vadd.f32 %v620_v27, %v1645_v47  ;;  %v653_v45 = vmax.f32 %v619_v30, 0.0 }
 0x115   : > { %1257 = vmatpush3.bf16.msra.mxu0 %v1574_v42  ;;  %v634_v22 = vmax.f32 %v597_v41, 0.0 }
 0x116   : > { %1258 = vmatprep.subr.bf16.mxu0 %v1583_v43  ;;  %v654_v49 = vmax.f32 %v621_v37, 0.0  ;;  %v669_v51 = vpack.c.bf16 %v653_v45, %v649_v40 }
 0x117   : > { %1281 = vmatpush3.bf16.msra.mxu1 %v1574_v42  ;;  %v641_v42 = vmax.f32 %v605_v14, 0.0  ;;  %v662_v33 = vpack.c.bf16 %v638_v24, %v634_v22 }
 0x118   : > { %1282 = vmatprep.subr.bf16.mxu1 %v1583_v43 }
 0x119   : > { %1259 = vmatpush3.bf16.msra.mxu0 %v1583_v43  ;;  %v665_v32 = vpack.c.bf16 %v645_v23, %v641_v42 }
 0x11a   : > { %1260 = vmatprep.subr.bf16.mxu0 %v1592_v44 }
 0x11b   : > { %1283 = vmatpush3.bf16.msra.mxu1 %v1583_v43  ;;  %v617_v43 = vadd.f32 %v616_v38, %v1645_v47 }
 0x11c   : > { %1284 = vmatprep.subr.bf16.mxu1 %v1592_v44 }
 0x11d   : > { %1261 = vmatpush3.bf16.msra.mxu0 %v1592_v44  ;;  %v650_v46 = vmax.f32 %v617_v43, 0.0 }
 0x11f   : > { %1285 = vmatpush3.bf16.msra.mxu1 %v1592_v44  ;;  %v670_v35 = vpack.c.bf16 %v654_v49, %v650_v46  ;;  %v1701_v44 = vld [vmem:[%s1779_s4] ss:$0 sm:$0xff] }
 0x120   : > { %1263 = vmatmul.mubr.bf16.vlgmr.msra.gmra.mxu0 %v661_v28 }
 0x121   : > { %1266 = vmatprep.mubr.bf16.mxu0 %v665_v32 }
 0x122   : > { %1287 = vmatmul.mubr.bf16.vlgmr.msra.gmra.mxu1 %v662_v33 }
 0x123   : > { %1290 = vmatprep.mubr.bf16.mxu1 %v666_v39 }
 0x128   : > { %1267 = vmatmul.mubr.bf16.gmra.mxu0 %v669_v51 }
 0x12a   : > { %1291 = vmatmul.mubr.bf16.gmra.mxu1 %v670_v35 }
 0x1c0   : > { %v1216_v47 = vpop.f32.mrf.mxu0 }
 0x1c1   : > { %v785_v53 = vadd.f32 %v1216_v47, %v1701_v44 }
 0x1c2   : > { %v776_v54 = vpop.f32.mrf.mxu0  ;;  %v1240_v31 = vpop.f32.mrf.mxu1 }
 0x1c3   : > { %809 = vst [vmem:[%s1706_s20 + $0x40] sm:$0xff] %v785_v53  ;;  %v777_v55 = vadd.f32 %v1701_v44, %v776_v54  ;;  %v858_v56 = vadd.f32 %v1240_v31, %v1701_v44 }
 0x1c4   : > { %v1217_v57 = vpop.f32.mrf.mxu0  ;;  %v849_v58 = vpop.f32.mrf.mxu1 }
 0x1c5   : > { %807 = vst [vmem:[%s1706_s20] sm:$0xff] %v777_v55  ;;  %882 = vst [vmem:[%s1706_s20 + $0x48] sm:$0xff] %v858_v56  ;;  %v788_v48 = vadd.f32 %v1217_v57, %v1701_v44  ;;  %v850_v59 = vadd.f32 %v1701_v44, %v849_v58 }
 0x1c6   : > { %v779_v60 = vpop.f32.mrf.mxu0  ;;  %v1241_v61 = vpop.f32.mrf.mxu1 }
 0x1c7   : > { %810 = vst [vmem:[%s1706_s20 + $0x60] sm:$0xff] %v788_v48  ;;  %880 = vst [vmem:[%s1706_s20 + $0x8] sm:$0xff] %v850_v59  ;;  %v780_v63 = vadd.f32 %v1701_v44, %v779_v60  ;;  %v861_v62 = vadd.f32 %v1241_v61, %v1701_v44 }
 0x1c8   : > { %v852_v0 = vpop.f32.mrf.mxu1 }
 0x1c9   : > { %808 = vst [vmem:[%s1706_s20 + $0x20] sm:$0xff] %v780_v63  ;;  %883 = vst [vmem:[%s1706_s20 + $0x68] sm:$0xff] %v861_v62  ;;  %v853_v34 = vadd.f32 %v1701_v44, %v852_v0 }
 0x1cb   : > { %881 = vst [vmem:[%s1706_s20 + $0x28] sm:$0xff] %v853_v34 }
 0x1d0   : > { %v1220_v1 = vpop.f32.mrf.mxu0 }
 0x1d1   : > { %v801_v2 = vadd.f32 %v1220_v1, %v1701_v44 }
 0x1d2   : > { %v792_v4 = vpop.f32.mrf.mxu0  ;;  %v1244_v5 = vpop.f32.mrf.mxu1 }
 0x1d3   : > { %813 = vst [vmem:[%s1706_s20 + $0xc0] sm:$0xff] %v801_v2  ;;  %v793_v3 = vadd.f32 %v1701_v44, %v792_v4  ;;  %v874_v6 = vadd.f32 %v1244_v5, %v1701_v44 }
 0x1d4   : > { %v1221_v7 = vpop.f32.mrf.mxu0  ;;  %v865_v8 = vpop.f32.mrf.mxu1 }
 0x1d5   : > { %811 = vst [vmem:[%s1706_s20 + $0x80] sm:$0xff] %v793_v3  ;;  %886 = vst [vmem:[%s1706_s20 + $0xc8] sm:$0xff] %v874_v6  ;;  %v804_v50 = vadd.f32 %v1221_v7, %v1701_v44  ;;  %v866_v9 = vadd.f32 %v1701_v44, %v865_v8 }
 0x1d6   : > { %v795_v10 = vpop.f32.mrf.mxu0  ;;  %v1245_v36 = vpop.f32.mrf.mxu1 }
 0x1d7   : > { %814 = vst [vmem:[%s1706_s20 + $0xe0] sm:$0xff] %v804_v50  ;;  %884 = vst [vmem:[%s1706_s20 + $0x88] sm:$0xff] %v866_v9  ;;  %v796_v11 = vadd.f32 %v1701_v44, %v795_v10  ;;  %v877_v52 = vadd.f32 %v1245_v36, %v1701_v44 }
 0x1d8   : > { %v868_v38 = vpop.f32.mrf.mxu1 }
 0x1d9   : > { %812 = vst [vmem:[%s1706_s20 + $0xa0] sm:$0xff] %v796_v11  ;;  %887 = vst [vmem:[%s1706_s20 + $0xe8] sm:$0xff] %v877_v52  ;;  %v869_v12 = vadd.f32 %v1701_v44, %v868_v38 }
 0x1db   : > { %885 = vst [vmem:[%s1706_s20 + $0xa8] sm:$0xff] %v869_v12 }
 0x1e0   : > { %v1264_v13 = vpop.f32.mrf.mxu0 }
 0x1e1   : > { %v931_v14 = vadd.f32 %v1264_v13, %v1701_v44 }
 0x1e2   : > { %v922_v15 = vpop.f32.mrf.mxu0  ;;  %v1288_v41 = vpop.f32.mrf.mxu1 }
 0x1e3   : > { %955 = vst [vmem:[%s1706_s20 + $0x50] sm:$0xff] %v931_v14  ;;  %v923_v17 = vadd.f32 %v1701_v44, %v922_v15  ;;  %v1004_v16 = vadd.f32 %v1288_v41, %v1701_v44 }
 0x1e4   : > { %v1265_v18 = vpop.f32.mrf.mxu0  ;;  %v995_v19 = vpop.f32.mrf.mxu1 }
 0x1e5   : > { %953 = vst [vmem:[%s1706_s20 + $0x10] sm:$0xff] %v923_v17  ;;  %1028 = vst [vmem:[%s1706_s20 + $0x58] sm:$0xff] %v1004_v16  ;;  %v934_v20 = vadd.f32 %v1265_v18, %v1701_v44  ;;  %v996_v21 = vadd.f32 %v1701_v44, %v995_v19 }
 0x1e6   : > { %v925_v42 = vpop.f32.mrf.mxu0  ;;  %v1289_v23 = vpop.f32.mrf.mxu1 }
 0x1e7   : > { %956 = vst [vmem:[%s1706_s20 + $0x70] sm:$0xff] %v934_v20  ;;  %1026 = vst [vmem:[%s1706_s20 + $0x18] sm:$0xff] %v996_v21  ;;  %v926_v22 = vadd.f32 %v1701_v44, %v925_v42  ;;  %v1007_v24 = vadd.f32 %v1289_v23, %v1701_v44 }
 0x1e8   : > { %v1268_v25 = vpop.f32.mrf.mxu0  ;;  %v998_v26 = vpop.f32.mrf.mxu1 }
 0x1e9   : > { %954 = vst [vmem:[%s1706_s20 + $0x30] sm:$0xff] %v926_v22  ;;  %1029 = vst [vmem:[%s1706_s20 + $0x78] sm:$0xff] %v1007_v24  ;;  %v947_v27 = vadd.f32 %v1268_v25, %v1701_v44  ;;  %v999_v28 = vadd.f32 %v1701_v44, %v998_v26 }
 0x1ea   : > { %v938_v29 = vpop.f32.mrf.mxu0  ;;  %v1292_v30 = vpop.f32.mrf.mxu1 }
 0x1eb   : > { %959 = vst [vmem:[%s1706_s20 + $0xd0] sm:$0xff] %v947_v27  ;;  %1027 = vst [vmem:[%s1706_s20 + $0x38] sm:$0xff] %v999_v28  ;;  %v939_v32 = vadd.f32 %v1701_v44, %v938_v29  ;;  %v1020_v33 = vadd.f32 %v1292_v30, %v1701_v44 }
 0x1ec   : > { %v1269_v43 = vpop.f32.mrf.mxu0  ;;  %v1011_v37 = vpop.f32.mrf.mxu1 }
 0x1ed   : > { %957 = vst [vmem:[%s1706_s20 + $0x90] sm:$0xff] %v939_v32  ;;  %1032 = vst [vmem:[%s1706_s20 + $0xd8] sm:$0xff] %v1020_v33  ;;  %v950_v39 = vadd.f32 %v1269_v43, %v1701_v44  ;;  %v1012_v40 = vadd.f32 %v1701_v44, %v1011_v37 }
 0x1ee   : > { %v941_v45 = vpop.f32.mrf.mxu0  ;;  %v1293_v46 = vpop.f32.mrf.mxu1 }
 0x1ef   : > { %960 = vst [vmem:[%s1706_s20 + $0xf0] sm:$0xff] %v950_v39  ;;  %1030 = vst [vmem:[%s1706_s20 + $0x98] sm:$0xff] %v1012_v40  ;;  %v942_v49 = vadd.f32 %v1701_v44, %v941_v45  ;;  %v1023_v51 = vadd.f32 %v1293_v46, %v1701_v44 }
 0x1f0   : > { %v1014_v35 = vpop.f32.mrf.mxu1 }
 0x1f1   : > { %958 = vst [vmem:[%s1706_s20 + $0xb0] sm:$0xff] %v942_v49  ;;  %1033 = vst [vmem:[%s1706_s20 + $0xf8] sm:$0xff] %v1023_v51  ;;  %v1015_v47 = vadd.f32 %v1701_v44, %v1014_v35 }
 0x1f3   : > { %1031 = vst [vmem:[%s1706_s20 + $0xb8] sm:$0xff] %v1015_v47 }
 0x1f4 PF: > { %s15_s18 = sadd.s32 1, %s1369_s18  }
 0x1f5   : > { %p12_p4 = scmp.ge.s32.totalorder %s15_s18, 4  }
 0x1f7   :  { %14 = sbr.rel (!%p12_p4) target bundleno = 1 (0x1), region = 70 }

// kernel: mask_rcnn_forward.4
= control target key start
LH: loop header
LB: loop body
LE: loop exit
PB: predicated region body
PF: predicated region fallthrough
CT: control target
= control target key end

     0   :  { %vm7849_vm0 = vmmov 0   ;;  %s9627_s1 = inlined_call_operand.vmem [shape: bf16[8192,128], index: 1, kind: input, shape index: {}]   ;;  %s9628_s0 = inlined_call_operand.vmem [shape: bf16[8,8192], index: 0, kind: input, shape index: {}]   ;;  %s9629_s2 = inlined_call_operand.vmem [shape: f32[1,128], index: 2, kind: input, shape index: {}]   ;;  %s9630_s3 = inlined_call_operand.vmem [shape: bf16[128,128], index: 3, kind: input, shape index: {}]   ;;  %s9631_s5 = inlined_call_operand.vmem [shape: bf16[128,128], index: 5, kind: input, shape index: {}]   ;;  %s9632_s4 = inlined_call_operand.vmem [shape: f32[1,128], index: 4, kind: input, shape index: {}]   ;;  %s9633_s6 = inlined_call_operand.vmem [shape: f32[1,128], index: 6, kind: input, shape index: {}]   ;;  %s9634_s7 = inlined_call_operand.vmem [shape: f32[8,128], index: 7, kind: output, shape index: {}]  }
   0x1   :  { %v7256_v0 = vld [vmem:[%s9627_s1 + $0x78] sm:$0xff]   ;;  %v7260_v4 = vld [vmem:[%s9627_s1 + $0x70] sm:$0xff]   ;;  %v7264_v8 = vld [vmem:[%s9627_s1 + $0x68] sm:$0xff]  }
   0x2   :  { %v7257_v1 = vld [vmem:[%s9627_s1 + $0xf8] sm:$0xff]   ;;  %6492 = vmatprep.subr.bf16.mxu0 %v7256_v0  ;;  %v7261_v5 = vld [vmem:[%s9627_s1 + $0xf0] sm:$0xff]   ;;  %v7265_v9 = vld [vmem:[%s9627_s1 + $0xe8] sm:$0xff]  }
   0x3   :  { %v7258_v2 = vld [vmem:[%s9627_s1 + $0x38] sm:$0xff]   ;;  %6514 = vmatprep.subr.bf16.mxu1 %v7257_v1  ;;  %v7262_v6 = vld [vmem:[%s9627_s1 + $0x30] sm:$0xff]   ;;  %v7266_v10 = vld [vmem:[%s9627_s1 + $0x28] sm:$0xff]  }
   0x4   :  { %v7259_v3 = vld [vmem:[%s9627_s1 + $0xb8] sm:$0xff]   ;;  %6493 = vmatpush3.bf16.msra.mxu0 %v7258_v2  ;;  %v7263_v7 = vld [vmem:[%s9627_s1 + $0xb0] sm:$0xff]   ;;  %v7267_v11 = vld [vmem:[%s9627_s1 + $0xa8] sm:$0xff]  }
   0x5   :  { %6515 = vmatpush3.bf16.msra.mxu1 %v7259_v3  ;;  %6494 = vmatprep.subr.bf16.mxu0 %v7260_v4  ;;  %v7268_v12 = vld [vmem:[%s9627_s1 + $0x60] sm:$0xff]   ;;  %v7272_v16 = vld [vmem:[%s9627_s1 + $0x58] sm:$0xff]   ;;  %v7276_v20 = vld [vmem:[%s9627_s1 + $0x50] sm:$0xff]  }
   0x6   :  { %6516 = vmatprep.subr.bf16.mxu1 %v7261_v5  ;;  %v7269_v13 = vld [vmem:[%s9627_s1 + $0xe0] sm:$0xff]   ;;  %v7273_v17 = vld [vmem:[%s9627_s1 + $0xd8] sm:$0xff]   ;;  %v7277_v21 = vld [vmem:[%s9627_s1 + $0xd0] sm:$0xff]  }
   0x7   :  { %v7270_v14 = vld [vmem:[%s9627_s1 + $0x20] sm:$0xff]   ;;  %v7274_v18 = vld [vmem:[%s9627_s1 + $0x18] sm:$0xff]   ;;  %v7278_v22 = vld [vmem:[%s9627_s1 + $0x10] sm:$0xff]  }
   0x8   :  { %6495 = vmatpush3.bf16.msra.mxu0 %v7262_v6  ;;  %v7271_v15 = vld [vmem:[%s9627_s1 + $0xa0] sm:$0xff]   ;;  %v7275_v19 = vld [vmem:[%s9627_s1 + $0x98] sm:$0xff]   ;;  %v7279_v23 = vld [vmem:[%s9627_s1 + $0x90] sm:$0xff]  }
   0x9   :  { %6517 = vmatpush3.bf16.msra.mxu1 %v7263_v7  ;;  %6496 = vmatprep.subr.bf16.mxu0 %v7264_v8  ;;  %v7280_v24 = vld [vmem:[%s9627_s1 + $0x48] sm:$0xff]   ;;  %v7284_v28 = vld [vmem:[%s9627_s1 + $0x40] sm:$0xff]   ;;  %v7292_v38 = vld [vmem:[%s9627_s1 + $0x178] sm:$0xff]  }
   0xa   :  { %6518 = vmatprep.subr.bf16.mxu1 %v7265_v9  ;;  %v7281_v25 = vld [vmem:[%s9627_s1 + $0xc8] sm:$0xff]   ;;  %v7285_v29 = vld [vmem:[%s9627_s1 + $0xc0] sm:$0xff]   ;;  %v7293_v39 = vld [vmem:[%s9627_s1 + $0x1f8] sm:$0xff]  }
   0xb   :  { %v7282_v26 = vld [vmem:[%s9627_s1 + $0x8] sm:$0xff]   ;;  %v7286_v30 = vld [vmem:[%s9627_s1] sm:$0xff]   ;;  %v7294_v40 = vld [vmem:[%s9627_s1 + $0x138] sm:$0xff]  }
   0xc   :  { %6497 = vmatpush3.bf16.msra.mxu0 %v7266_v10  ;;  %v7283_v27 = vld [vmem:[%s9627_s1 + $0x88] sm:$0xff]   ;;  %v7287_v31 = vld [vmem:[%s9627_s1 + $0x80] sm:$0xff]   ;;  %v7295_v41 = vld [vmem:[%s9627_s1 + $0x1b8] sm:$0xff]  }
   0xd   :  { %6519 = vmatpush3.bf16.msra.mxu1 %v7267_v11  ;;  %6498 = vmatprep.subr.bf16.mxu0 %v7268_v12  ;;  %v27_v32 = vld [vmem:[%s9628_s0] sm:$0xff]  ;;  %v28_v33 = vld [vmem:[%s9628_s0 + $0x8] sm:$0xff]  ;;  %v7296_v42 = vld [vmem:[%s9627_s1 + $0x170] sm:$0xff]  }
   0xe   :  { %6520 = vmatprep.subr.bf16.mxu1 %v7269_v13  ;;  %v5898_v34 = vcombine.low %v27_v32, %v27_v32  ;;  %v5899_v35 = vcombine.high %v27_v32, %v27_v32  ;;  %v5900_v36 = vcombine.low %v28_v33, %v28_v33  ;;  %v5901_v37 = vcombine.high %v28_v33, %v28_v33  ;;  %v7297_v43 = vld [vmem:[%s9627_s1 + $0x1f0] sm:$0xff]   ;;  %v7300_v46 = vld [vmem:[%s9627_s1 + $0x168] sm:$0xff]   ;;  %v7304_v50 = vld [vmem:[%s9627_s1 + $0x160] sm:$0xff]  }
   0xf   :  { %v7298_v44 = vld [vmem:[%s9627_s1 + $0x130] sm:$0xff]   ;;  %v7301_v47 = vld [vmem:[%s9627_s1 + $0x1e8] sm:$0xff]   ;;  %v7305_v51 = vld [vmem:[%s9627_s1 + $0x1e0] sm:$0xff]  }
  0x10   :  { %6499 = vmatpush3.bf16.msra.mxu0 %v7270_v14  ;;  %4418 = vmatprep.mubr.bf16.mxu0 %v5899_v35  ;;  %v7299_v45 = vld [vmem:[%s9627_s1 + $0x1b0] sm:$0xff]   ;;  %v7302_v48 = vld [vmem:[%s9627_s1 + $0x128] sm:$0xff]   ;;  %v7306_v52 = vld [vmem:[%s9627_s1 + $0x120] sm:$0xff]  }
  0x11   :  { %6521 = vmatpush3.bf16.msra.mxu1 %v7271_v15  ;;  %6500 = vmatprep.subr.bf16.mxu0 %v7272_v16  ;;  %v7303_v49 = vld [vmem:[%s9627_s1 + $0x1a8] sm:$0xff]   ;;  %v7307_v53 = vld [vmem:[%s9627_s1 + $0x1a0] sm:$0xff]   ;;  %v7308_v54 = vld [vmem:[%s9627_s1 + $0x158] sm:$0xff]  }
  0x12   :  { %6522 = vmatprep.subr.bf16.mxu1 %v7273_v17  ;;  %4458 = vmatprep.mubr.bf16.mxu1 %v5901_v37  ;;  %v7309_v55 = vld [vmem:[%s9627_s1 + $0x1d8] sm:$0xff]   ;;  %v7312_v58 = vld [vmem:[%s9627_s1 + $0x150] sm:$0xff]   ;;  %v7316_v62 = vld [vmem:[%s9627_s1 + $0x148] sm:$0xff]  }
  0x13   :  { %v7310_v56 = vld [vmem:[%s9627_s1 + $0x118] sm:$0xff]   ;;  %v7313_v59 = vld [vmem:[%s9627_s1 + $0x1d0] sm:$0xff]   ;;  %v7317_v63 = vld [vmem:[%s9627_s1 + $0x1c8] sm:$0xff]  }
  0x14   :  { %6501 = vmatpush3.bf16.msra.mxu0 %v7274_v18  ;;  %v7311_v57 = vld [vmem:[%s9627_s1 + $0x198] sm:$0xff]   ;;  %v7314_v60 = vld [vmem:[%s9627_s1 + $0x110] sm:$0xff]   ;;  %v7318_v0 = vld [vmem:[%s9627_s1 + $0x108] sm:$0xff]  }
  0x15   :  { %6523 = vmatpush3.bf16.msra.mxu1 %v7275_v19  ;;  %6502 = vmatprep.subr.bf16.mxu0 %v7276_v20  ;;  %v7315_v61 = vld [vmem:[%s9627_s1 + $0x190] sm:$0xff]   ;;  %v7319_v1 = vld [vmem:[%s9627_s1 + $0x188] sm:$0xff]   ;;  %v7320_v2 = vld [vmem:[%s9627_s1 + $0x140] sm:$0xff]  }
  0x16   :  { %6524 = vmatprep.subr.bf16.mxu1 %v7277_v21  ;;  %v7321_v3 = vld [vmem:[%s9627_s1 + $0x1c0] sm:$0xff]   ;;  %v29_v6 = vld [vmem:[%s9628_s0 + $0x10] sm:$0xff]  ;;  %v30_v9 = vld [vmem:[%s9628_s0 + $0x18] sm:$0xff] }
  0x17   :  { %v7322_v4 = vld [vmem:[%s9627_s1 + $0x100] sm:$0xff]   ;;  %v5902_v7 = vcombine.low %v29_v6, %v29_v6  ;;  %v5903_v8 = vcombine.high %v29_v6, %v29_v6  ;;  %v5904_v10 = vcombine.low %v30_v9, %v30_v9  ;;  %v5905_v11 = vcombine.high %v30_v9, %v30_v9  ;;  %v7328_v12 = vld [vmem:[%s9627_s1 + $0x278] sm:$0xff]   ;;  %v7332_v16 = vld [vmem:[%s9627_s1 + $0x270] sm:$0xff]  }
  0x18   :  { %6503 = vmatpush3.bf16.msra.mxu0 %v7278_v22  ;;  %v7323_v5 = vld [vmem:[%s9627_s1 + $0x180] sm:$0xff]   ;;  %v7329_v13 = vld [vmem:[%s9627_s1 + $0x2f8] sm:$0xff]   ;;  %v7333_v17 = vld [vmem:[%s9627_s1 + $0x2f0] sm:$0xff]  }
  0x19   :  { %6525 = vmatpush3.bf16.msra.mxu1 %v7279_v23  ;;  %6504 = vmatprep.subr.bf16.mxu0 %v7280_v24  ;;  %v7330_v14 = vld [vmem:[%s9627_s1 + $0x238] sm:$0xff]   ;;  %v7334_v18 = vld [vmem:[%s9627_s1 + $0x230] sm:$0xff]   ;;  %v7336_v20 = vld [vmem:[%s9627_s1 + $0x268] sm:$0xff]  }
  0x1a   :  { %6526 = vmatprep.subr.bf16.mxu1 %v7281_v25  ;;  %v7331_v15 = vld [vmem:[%s9627_s1 + $0x2b8] sm:$0xff]   ;;  %v7335_v19 = vld [vmem:[%s9627_s1 + $0x2b0] sm:$0xff]   ;;  %v7337_v21 = vld [vmem:[%s9627_s1 + $0x2e8] sm:$0xff]  }
  0x1b   :  { %v7338_v22 = vld [vmem:[%s9627_s1 + $0x228] sm:$0xff]   ;;  %v7340_v24 = vld [vmem:[%s9627_s1 + $0x260] sm:$0xff]   ;;  %v7348_v32 = vld [vmem:[%s9627_s1 + $0x250] sm:$0xff]  }
  0x1c   :  { %6505 = vmatpush3.bf16.msra.mxu0 %v7282_v26  ;;  %v7339_v23 = vld [vmem:[%s9627_s1 + $0x2a8] sm:$0xff]   ;;  %v7341_v25 = vld [vmem:[%s9627_s1 + $0x2e0] sm:$0xff]   ;;  %v7349_v33 = vld [vmem:[%s9627_s1 + $0x2d0] sm:$0xff]  }
  0x1d   :  { %6527 = vmatpush3.bf16.msra.mxu1 %v7283_v27  ;;  %6506 = vmatprep.subr.bf16.mxu0 %v7284_v28  ;;  %v7342_v26 = vld [vmem:[%s9627_s1 + $0x220] sm:$0xff]   ;;  %v7344_v28 = vld [vmem:[%s9627_s1 + $0x258] sm:$0xff]   ;;  %v7351_v35 = vld [vmem:[%s9627_s1 + $0x290] sm:$0xff]  }
  0x1e   :  { %6528 = vmatprep.subr.bf16.mxu1 %v7285_v29  ;;  %v7343_v27 = vld [vmem:[%s9627_s1 + $0x2a0] sm:$0xff]   ;;  %v7345_v29 = vld [vmem:[%s9627_s1 + $0x2d8] sm:$0xff]   ;;  %v7353_v37 = vld [vmem:[%s9627_s1 + $0x2c8] sm:$0xff]  }
  0x1f   :  { %v7384_v6 = vld [vmem:[%s9627_s1 + $0x350] sm:$0xff]  }
  0x20   :  { %6507 = vmatpush3.bf16.msra.mxu0 %v7286_v30  ;;  %v7346_v30 = vld [vmem:[%s9627_s1 + $0x218] sm:$0xff]   ;;  %v7387_v9 = vld [vmem:[%s9627_s1 + $0x390] sm:$0xff]  }
  0x21   :  { %6529 = vmatpush3.bf16.msra.mxu1 %v7287_v31  ;;  %6536 = vmatprep.subr.bf16.mxu0 %v7292_v38  ;;  %v7347_v31 = vld [vmem:[%s9627_s1 + $0x298] sm:$0xff]   ;;  %v7354_v38 = vld [vmem:[%s9627_s1 + $0x208] sm:$0xff]  }
  0x22   :  { %6558 = vmatprep.subr.bf16.mxu1 %v7293_v39  ;;  %v7355_v39 = vld [vmem:[%s9627_s1 + $0x288] sm:$0xff]  }
  0x23   :  { %4419 = vmatmul.mubr.bf16.vlgmr.msra.gmra.mxu0 %v5898_v34  ;;  %v7350_v34 = vld [vmem:[%s9627_s1 + $0x210] sm:$0xff]  }
  0x24   :  { %4459 = vmatmul.mubr.bf16.vlgmr.msra.gmra.mxu1 %v5900_v36  ;;  %6537 = vmatpush3.bf16.msra.mxu0 %v7294_v40  ;;  %v7352_v36 = vld [vmem:[%s9627_s1 + $0x248] sm:$0xff]   ;;  %v7356_v40 = vld [vmem:[%s9627_s1 + $0x240] sm:$0xff]  }
  0x25   :  { %6559 = vmatpush3.bf16.msra.mxu1 %v7295_v41  ;;  %6538 = vmatprep.subr.bf16.mxu0 %v7296_v42  ;;  %v7357_v41 = vld [vmem:[%s9627_s1 + $0x2c0] sm:$0xff]  }
  0x26   :  { %6560 = vmatprep.subr.bf16.mxu1 %v7297_v43  ;;  %4498 = vmatprep.mubr.bf16.mxu0 %v5903_v8  ;;  %v7358_v42 = vld [vmem:[%s9627_s1 + $0x200] sm:$0xff]   ;;  %v7386_v8 = vld [vmem:[%s9627_s1 + $0x310] sm:$0xff]  }
  0x27   :  { %4538 = vmatprep.mubr.bf16.mxu1 %v5905_v11  ;;  %v7359_v43 = vld [vmem:[%s9627_s1 + $0x280] sm:$0xff]   ;;  %v7389_v11 = vld [vmem:[%s9627_s1 + $0x3c8] sm:$0xff]  }
  0x28   :  { %6539 = vmatpush3.bf16.msra.mxu0 %v7298_v44  ;;  %v31_v44 = vld [vmem:[%s9628_s0 + $0x20] sm:$0xff] }
  0x29   :  { %6561 = vmatpush3.bf16.msra.mxu1 %v7299_v45  ;;  %6540 = vmatprep.subr.bf16.mxu0 %v7300_v46  ;;  %v32_v45 = vld [vmem:[%s9628_s0 + $0x28] sm:$0xff]  ;;  %v5906_v46 = vcombine.low %v31_v44, %v31_v44 }
  0x2a   :  { %6562 = vmatprep.subr.bf16.mxu1 %v7301_v47  ;;  %v5907_v47 = vcombine.high %v31_v44, %v31_v44  ;;  %v7420_v44 = vld [vmem:[%s9627_s1 + $0x450] sm:$0xff]  }
  0x2c   :  { %6541 = vmatpush3.bf16.msra.mxu0 %v7302_v48  ;;  %v5908_v48 = vcombine.low %v32_v45, %v32_v45 }
  0x2d   :  { %6563 = vmatpush3.bf16.msra.mxu1 %v7303_v49  ;;  %6542 = vmatprep.subr.bf16.mxu0 %v7304_v50  ;;  %v5909_v49 = vcombine.high %v32_v45, %v32_v45  ;;  %v7364_v50 = vld [vmem:[%s9627_s1 + $0x378] sm:$0xff]   ;;  %v7421_v45 = vld [vmem:[%s9627_s1 + $0x4d0] sm:$0xff]  }
  0x2e   :  { %6564 = vmatprep.subr.bf16.mxu1 %v7305_v51  ;;  %v7365_v51 = vld [vmem:[%s9627_s1 + $0x3f8] sm:$0xff]  }
  0x30   :  { %6543 = vmatpush3.bf16.msra.mxu0 %v7306_v52  ;;  %v7366_v52 = vld [vmem:[%s9627_s1 + $0x338] sm:$0xff]  }
  0x31   :  { %6565 = vmatpush3.bf16.msra.mxu1 %v7307_v53  ;;  %6544 = vmatprep.subr.bf16.mxu0 %v7308_v54  ;;  %v7367_v53 = vld [vmem:[%s9627_s1 + $0x3b8] sm:$0xff]   ;;  %v7368_v54 = vld [vmem:[%s9627_s1 + $0x370] sm:$0xff]  }
  0x32   :  { %6566 = vmatprep.subr.bf16.mxu1 %v7309_v55  ;;  %v7369_v55 = vld [vmem:[%s9627_s1 + $0x3f0] sm:$0xff]  }
  0x34   :  { %6545 = vmatpush3.bf16.msra.mxu0 %v7310_v56  ;;  %v7370_v56 = vld [vmem:[%s9627_s1 + $0x330] sm:$0xff]  }
  0x35   :  { %6567 = vmatpush3.bf16.msra.mxu1 %v7311_v57  ;;  %6546 = vmatprep.subr.bf16.mxu0 %v7312_v58  ;;  %v7371_v57 = vld [vmem:[%s9627_s1 + $0x3b0] sm:$0xff]   ;;  %v7372_v58 = vld [vmem:[%s9627_s1 + $0x368] sm:$0xff]  }
  0x36   :  { %6568 = vmatprep.subr.bf16.mxu1 %v7313_v59  ;;  %v7373_v59 = vld [vmem:[%s9627_s1 + $0x3e8] sm:$0xff]  }
  0x38   :  { %6547 = vmatpush3.bf16.msra.mxu0 %v7314_v60  ;;  %v7374_v60 = vld [vmem:[%s9627_s1 + $0x328] sm:$0xff]  }
  0x39   :  { %6569 = vmatpush3.bf16.msra.mxu1 %v7315_v61  ;;  %6548 = vmatprep.subr.bf16.mxu0 %v7316_v62  ;;  %v7375_v61 = vld [vmem:[%s9627_s1 + $0x3a8] sm:$0xff]   ;;  %v7376_v62 = vld [vmem:[%s9627_s1 + $0x360] sm:$0xff]  }
  0x3a   :  { %6570 = vmatprep.subr.bf16.mxu1 %v7317_v63  ;;  %v7377_v63 = vld [vmem:[%s9627_s1 + $0x3e0] sm:$0xff]  }
  0x3c   :  { %6549 = vmatpush3.bf16.msra.mxu0 %v7318_v0  ;;  %v7378_v0 = vld [vmem:[%s9627_s1 + $0x320] sm:$0xff]  }
  0x3d   :  { %6571 = vmatpush3.bf16.msra.mxu1 %v7319_v1  ;;  %6550 = vmatprep.subr.bf16.mxu0 %v7320_v2  ;;  %v7379_v1 = vld [vmem:[%s9627_s1 + $0x3a0] sm:$0xff]   ;;  %v7380_v2 = vld [vmem:[%s9627_s1 + $0x358] sm:$0xff]  }
  0x3e   :  { %6572 = vmatprep.subr.bf16.mxu1 %v7321_v3  ;;  %v7381_v3 = vld [vmem:[%s9627_s1 + $0x3d8] sm:$0xff]  }
  0x40   :  { %6551 = vmatpush3.bf16.msra.mxu0 %v7322_v4  ;;  %v7382_v4 = vld [vmem:[%s9627_s1 + $0x318] sm:$0xff]  }
  0x41   :  { %6573 = vmatpush3.bf16.msra.mxu1 %v7323_v5  ;;  %6580 = vmatprep.subr.bf16.mxu0 %v7328_v12  ;;  %v7383_v5 = vld [vmem:[%s9627_s1 + $0x398] sm:$0xff]   ;;  %v7390_v12 = vld [vmem:[%s9627_s1 + $0x308] sm:$0xff]  }
  0x42   :  { %6602 = vmatprep.subr.bf16.mxu1 %v7329_v13  ;;  %v7391_v13 = vld [vmem:[%s9627_s1 + $0x388] sm:$0xff]  }
  0x43   :  { %4499 = vmatmul.mubr.bf16.vlgmr.msra.gmra.mxu0 %v5902_v7  ;;  %v7385_v7 = vld [vmem:[%s9627_s1 + $0x3d0] sm:$0xff]  }
  0x44   :  { %4539 = vmatmul.mubr.bf16.vlgmr.msra.gmra.mxu1 %v5904_v10  ;;  %6581 = vmatpush3.bf16.msra.mxu0 %v7330_v14  ;;  %v7388_v10 = vld [vmem:[%s9627_s1 + $0x348] sm:$0xff]   ;;  %v7392_v14 = vld [vmem:[%s9627_s1 + $0x340] sm:$0xff]  }
  0x45   :  { %6603 = vmatpush3.bf16.msra.mxu1 %v7331_v15  ;;  %6582 = vmatprep.subr.bf16.mxu0 %v7332_v16  ;;  %v7393_v15 = vld [vmem:[%s9627_s1 + $0x3c0] sm:$0xff]  }
  0x46   :  { %6604 = vmatprep.subr.bf16.mxu1 %v7333_v17  ;;  %4578 = vmatprep.mubr.bf16.mxu0 %v5907_v47  ;;  %v7394_v16 = vld [vmem:[%s9627_s1 + $0x300] sm:$0xff]   ;;  %v7423_v47 = vld [vmem:[%s9627_s1 + $0x490] sm:$0xff]  }
  0x47   :  { %4618 = vmatprep.mubr.bf16.mxu1 %v5909_v49  ;;  %v7395_v17 = vld [vmem:[%s9627_s1 + $0x380] sm:$0xff]   ;;  %v7425_v49 = vld [vmem:[%s9627_s1 + $0x4c8] sm:$0xff]  }
  0x48   :  { %6583 = vmatpush3.bf16.msra.mxu0 %v7334_v18  ;;  %v33_v18 = vld [vmem:[%s9628_s0 + $0x30] sm:$0xff] }
  0x49   :  { %6605 = vmatpush3.bf16.msra.mxu1 %v7335_v19  ;;  %6584 = vmatprep.subr.bf16.mxu0 %v7336_v20  ;;  %v34_v19 = vld [vmem:[%s9628_s0 + $0x38] sm:$0xff]  ;;  %v5910_v20 = vcombine.low %v33_v18, %v33_v18 }
  0x4a   :  { %6606 = vmatprep.subr.bf16.mxu1 %v7337_v21  ;;  %v5911_v21 = vcombine.high %v33_v18, %v33_v18  ;;  %v7456_v18 = vld [vmem:[%s9627_s1 + $0x550] sm:$0xff]  }
  0x4c   :  { %6585 = vmatpush3.bf16.msra.mxu0 %v7338_v22  ;;  %v5912_v22 = vcombine.low %v34_v19, %v34_v19 }
  0x4d   :  { %6607 = vmatpush3.bf16.msra.mxu1 %v7339_v23  ;;  %6586 = vmatprep.subr.bf16.mxu0 %v7340_v24  ;;  %v7400_v23 = vld [vmem:[%s9627_s1 + $0x478] sm:$0xff]   ;;  %v5913_v24 = vcombine.high %v34_v19, %v34_v19  ;;  %v7457_v19 = vld [vmem:[%s9627_s1 + $0x5d0] sm:$0xff]  }
  0x4e   :  { %6608 = vmatprep.subr.bf16.mxu1 %v7341_v25  ;;  %v7401_v25 = vld [vmem:[%s9627_s1 + $0x4f8] sm:$0xff]  }
  0x50   :  { %6587 = vmatpush3.bf16.msra.mxu0 %v7342_v26  ;;  %v7402_v26 = vld [vmem:[%s9627_s1 + $0x438] sm:$0xff]  }
  0x51   :  { %6609 = vmatpush3.bf16.msra.mxu1 %v7343_v27  ;;  %6588 = vmatprep.subr.bf16.mxu0 %v7344_v28  ;;  %v7403_v27 = vld [vmem:[%s9627_s1 + $0x4b8] sm:$0xff]   ;;  %v7404_v28 = vld [vmem:[%s9627_s1 + $0x470] sm:$0xff]  }
  0x52   :  { %6610 = vmatprep.subr.bf16.mxu1 %v7345_v29  ;;  %v7405_v29 = vld [vmem:[%s9627_s1 + $0x4f0] sm:$0xff]  }
  0x54   :  { %6589 = vmatpush3.bf16.msra.mxu0 %v7346_v30  ;;  %v7406_v30 = vld [vmem:[%s9627_s1 + $0x430] sm:$0xff]  }
  0x55   :  { %6611 = vmatpush3.bf16.msra.mxu1 %v7347_v31  ;;  %6590 = vmatprep.subr.bf16.mxu0 %v7348_v32  ;;  %v7407_v31 = vld [vmem:[%s9627_s1 + $0x4b0] sm:$0xff]   ;;  %v7408_v32 = vld [vmem:[%s9627_s1 + $0x468] sm:$0xff]  }
  0x56   :  { %6612 = vmatprep.subr.bf16.mxu1 %v7349_v33  ;;  %v7409_v33 = vld [vmem:[%s9627_s1 + $0x4e8] sm:$0xff]  }
  0x58   :  { %6591 = vmatpush3.bf16.msra.mxu0 %v7350_v34  ;;  %v7410_v34 = vld [vmem:[%s9627_s1 + $0x428] sm:$0xff]  }
  0x59   :  { %6613 = vmatpush3.bf16.msra.mxu1 %v7351_v35  ;;  %6592 = vmatprep.subr.bf16.mxu0 %v7352_v36  ;;  %v7411_v35 = vld [vmem:[%s9627_s1 + $0x4a8] sm:$0xff]   ;;  %v7412_v36 = vld [vmem:[%s9627_s1 + $0x460] sm:$0xff]  }
  0x5a   :  { %6614 = vmatprep.subr.bf16.mxu1 %v7353_v37  ;;  %v7413_v37 = vld [vmem:[%s9627_s1 + $0x4e0] sm:$0xff]  }
  0x5c   :  { %6593 = vmatpush3.bf16.msra.mxu0 %v7354_v38  ;;  %v7414_v38 = vld [vmem:[%s9627_s1 + $0x420] sm:$0xff]  }
  0x5d   :  { %6615 = vmatpush3.bf16.msra.mxu1 %v7355_v39  ;;  %6594 = vmatprep.subr.bf16.mxu0 %v7356_v40  ;;  %v7415_v39 = vld [vmem:[%s9627_s1 + $0x4a0] sm:$0xff]   ;;  %v7416_v40 = vld [vmem:[%s9627_s1 + $0x458] sm:$0xff]  }
  0x5e   :  { %6616 = vmatprep.subr.bf16.mxu1 %v7357_v41  ;;  %v7417_v41 = vld [vmem:[%s9627_s1 + $0x4d8] sm:$0xff]  }
  0x60   :  { %6595 = vmatpush3.bf16.msra.mxu0 %v7358_v42  ;;  %v7418_v42 = vld [vmem:[%s9627_s1 + $0x418] sm:$0xff]  }
  0x61   :  { %6617 = vmatpush3.bf16.msra.mxu1 %v7359_v43  ;;  %6624 = vmatprep.subr.bf16.mxu0 %v7364_v50  ;;  %v7419_v43 = vld [vmem:[%s9627_s1 + $0x498] sm:$0xff]   ;;  %v7426_v50 = vld [vmem:[%s9627_s1 + $0x408] sm:$0xff]  }
  0x62   :  { %6646 = vmatprep.subr.bf16.mxu1 %v7365_v51  ;;  %v7427_v51 = vld [vmem:[%s9627_s1 + $0x488] sm:$0xff]  }
  0x63   :  { %4579 = vmatmul.mubr.bf16.vlgmr.msra.gmra.mxu0 %v5906_v46  ;;  %v7422_v46 = vld [vmem:[%s9627_s1 + $0x410] sm:$0xff]  }
  0x64   :  { %4619 = vmatmul.mubr.bf16.vlgmr.msra.gmra.mxu1 %v5908_v48  ;;  %6625 = vmatpush3.bf16.msra.mxu0 %v7366_v52  ;;  %v7424_v48 = vld [vmem:[%s9627_s1 + $0x448] sm:$0xff]   ;;  %v7428_v52 = vld [vmem:[%s9627_s1 + $0x440] sm:$0xff]  }
  0x65   :  { %6647 = vmatpush3.bf16.msra.mxu1 %v7367_v53  ;;  %6626 = vmatprep.subr.bf16.mxu0 %v7368_v54  ;;  %v7429_v53 = vld [vmem:[%s9627_s1 + $0x4c0] sm:$0xff]  }
  0x66   :  { %6648 = vmatprep.subr.bf16.mxu1 %v7369_v55  ;;  %4658 = vmatprep.mubr.bf16.mxu0 %v5911_v21  ;;  %v7430_v54 = vld [vmem:[%s9627_s1 + $0x400] sm:$0xff]   ;;  %v7459_v21 = vld [vmem:[%s9627_s1 + $0x590] sm:$0xff]  }
  0x67   :  { %4698 = vmatprep.mubr.bf16.mxu1 %v5913_v24  ;;  %v7431_v55 = vld [vmem:[%s9627_s1 + $0x480] sm:$0xff]   ;;  %v7462_v24 = vld [vmem:[%s9627_s1 + $0x508] sm:$0xff]  }
  0x68   :  { %6627 = vmatpush3.bf16.msra.mxu0 %v7370_v56  ;;  %v35_v56 = vld [vmem:[%s9628_s0 + $0x40] sm:$0xff] }
  0x69   :  { %6649 = vmatpush3.bf16.msra.mxu1 %v7371_v57  ;;  %6628 = vmatprep.subr.bf16.mxu0 %v7372_v58  ;;  %v5914_v57 = vcombine.low %v35_v56, %v35_v56  ;;  %v5915_v58 = vcombine.high %v35_v56, %v35_v56  ;;  %v7492_v56 = vld [vmem:[%s9627_s1 + $0x650] sm:$0xff]  }
  0x6a   :  { %6650 = vmatprep.subr.bf16.mxu1 %v7373_v59  ;;  %v36_v59 = vld [vmem:[%s9628_s0 + $0x48] sm:$0xff] }
  0x6c   :  { %6629 = vmatpush3.bf16.msra.mxu0 %v7374_v60  ;;  %v5916_v60 = vcombine.low %v36_v59, %v36_v59 }
  0x6d   :  { %6651 = vmatpush3.bf16.msra.mxu1 %v7375_v61  ;;  %6630 = vmatprep.subr.bf16.mxu0 %v7376_v62  ;;  %v5917_v61 = vcombine.high %v36_v59, %v36_v59  ;;  %v7436_v62 = vld [vmem:[%s9627_s1 + $0x578] sm:$0xff]   ;;  %v7495_v59 = vld [vmem:[%s9627_s1 + $0x690] sm:$0xff]  }
  0x6e   :  { %6652 = vmatprep.subr.bf16.mxu1 %v7377_v63  ;;  %v7437_v63 = vld [vmem:[%s9627_s1 + $0x5f8] sm:$0xff]  }
  0x70   :  { %6631 = vmatpush3.bf16.msra.mxu0 %v7378_v0  ;;  %v7438_v0 = vld [vmem:[%s9627_s1 + $0x538] sm:$0xff]  }
  0x71   :  { %6653 = vmatpush3.bf16.msra.mxu1 %v7379_v1  ;;  %6632 = vmatprep.subr.bf16.mxu0 %v7380_v2  ;;  %v7439_v1 = vld [vmem:[%s9627_s1 + $0x5b8] sm:$0xff]   ;;  %v7440_v2 = vld [vmem:[%s9627_s1 + $0x570] sm:$0xff]  }
  0x72   :  { %6654 = vmatprep.subr.bf16.mxu1 %v7381_v3  ;;  %v7441_v3 = vld [vmem:[%s9627_s1 + $0x5f0] sm:$0xff]  }
  0x74   :  { %6633 = vmatpush3.bf16.msra.mxu0 %v7382_v4  ;;  %v7442_v4 = vld [vmem:[%s9627_s1 + $0x530] sm:$0xff]  }
  0x75   :  { %6655 = vmatpush3.bf16.msra.mxu1 %v7383_v5  ;;  %6634 = vmatprep.subr.bf16.mxu0 %v7384_v6  ;;  %v7443_v5 = vld [vmem:[%s9627_s1 + $0x5b0] sm:$0xff]   ;;  %v7444_v6 = vld [vmem:[%s9627_s1 + $0x568] sm:$0xff]  }
  0x76   :  { %6656 = vmatprep.subr.bf16.mxu1 %v7385_v7  ;;  %v7445_v7 = vld [vmem:[%s9627_s1 + $0x5e8] sm:$0xff]  }
  0x78   :  { %6635 = vmatpush3.bf16.msra.mxu0 %v7386_v8  ;;  %v7446_v8 = vld [vmem:[%s9627_s1 + $0x528] sm:$0xff]  }
  0x79   :  { %6657 = vmatpush3.bf16.msra.mxu1 %v7387_v9  ;;  %6636 = vmatprep.subr.bf16.mxu0 %v7388_v10  ;;  %v7447_v9 = vld [vmem:[%s9627_s1 + $0x5a8] sm:$0xff]   ;;  %v7448_v10 = vld [vmem:[%s9627_s1 + $0x560] sm:$0xff]  }
  0x7a   :  { %6658 = vmatprep.subr.bf16.mxu1 %v7389_v11  ;;  %v7449_v11 = vld [vmem:[%s9627_s1 + $0x5e0] sm:$0xff]  }
  0x7c   :  { %6637 = vmatpush3.bf16.msra.mxu0 %v7390_v12  ;;  %v7450_v12 = vld [vmem:[%s9627_s1 + $0x520] sm:$0xff]  }
  0x7d   :  { %6659 = vmatpush3.bf16.msra.mxu1 %v7391_v13  ;;  %6638 = vmatprep.subr.bf16.mxu0 %v7392_v14  ;;  %v7451_v13 = vld [vmem:[%s9627_s1 + $0x5a0] sm:$0xff]   ;;  %v7452_v14 = vld [vmem:[%s9627_s1 + $0x558] sm:$0xff]  }
  0x7e   :  { %6660 = vmatprep.subr.bf16.mxu1 %v7393_v15  ;;  %v7453_v15 = vld [vmem:[%s9627_s1 + $0x5d8] sm:$0xff]  }
  0x80   :  { %6639 = vmatpush3.bf16.msra.mxu0 %v7394_v16  ;;  %v7454_v16 = vld [vmem:[%s9627_s1 + $0x518] sm:$0xff]  }
  0x81   :  { %6661 = vmatpush3.bf16.msra.mxu1 %v7395_v17  ;;  %6668 = vmatprep.subr.bf16.mxu0 %v7400_v23  ;;  %v7455_v17 = vld [vmem:[%s9627_s1 + $0x598] sm:$0xff]   ;;  %v7461_v23 = vld [vmem:[%s9627_s1 + $0x5c8] sm:$0xff]  }
  0x82   :  { %6690 = vmatprep.subr.bf16.mxu1 %v7401_v25  ;;  %v7463_v25 = vld [vmem:[%s9627_s1 + $0x588] sm:$0xff]  }
  0x83   :  { %4659 = vmatmul.mubr.bf16.vlgmr.msra.gmra.mxu0 %v5910_v20  ;;  %v7458_v20 = vld [vmem:[%s9627_s1 + $0x510] sm:$0xff]  }
  0x84   :  { %4699 = vmatmul.mubr.bf16.vlgmr.msra.gmra.mxu1 %v5912_v22  ;;  %6669 = vmatpush3.bf16.msra.mxu0 %v7402_v26  ;;  %v7460_v22 = vld [vmem:[%s9627_s1 + $0x548] sm:$0xff]   ;;  %v7464_v26 = vld [vmem:[%s9627_s1 + $0x540] sm:$0xff]  }
  0x85   :  { %6691 = vmatpush3.bf16.msra.mxu1 %v7403_v27  ;;  %6670 = vmatprep.subr.bf16.mxu0 %v7404_v28  ;;  %v7465_v27 = vld [vmem:[%s9627_s1 + $0x5c0] sm:$0xff]  }
  0x86   :  { %6692 = vmatprep.subr.bf16.mxu1 %v7405_v29  ;;  %4738 = vmatprep.mubr.bf16.mxu0 %v5915_v58  ;;  %v7466_v28 = vld [vmem:[%s9627_s1 + $0x500] sm:$0xff]   ;;  %v7494_v58 = vld [vmem:[%s9627_s1 + $0x610] sm:$0xff]  }
  0x87   :  { %4778 = vmatprep.mubr.bf16.mxu1 %v5917_v61  ;;  %v7467_v29 = vld [vmem:[%s9627_s1 + $0x580] sm:$0xff]   ;;  %v7497_v61 = vld [vmem:[%s9627_s1 + $0x6c8] sm:$0xff]  }
  0x88   :  { %6671 = vmatpush3.bf16.msra.mxu0 %v7406_v30  ;;  %v37_v30 = vld [vmem:[%s9628_s0 + $0x50] sm:$0xff] }
  0x89   :  { %6693 = vmatpush3.bf16.msra.mxu1 %v7407_v31  ;;  %6672 = vmatprep.subr.bf16.mxu0 %v7408_v32  ;;  %v38_v31 = vld [vmem:[%s9628_s0 + $0x58] sm:$0xff]  ;;  %v5918_v32 = vcombine.low %v37_v30, %v37_v30 }
  0x8a   :  { %6694 = vmatprep.subr.bf16.mxu1 %v7409_v33  ;;  %v5919_v33 = vcombine.high %v37_v30, %v37_v30  ;;  %v7515_v30 = vld [vmem:[%s9627_s1 + $0x7b0] sm:$0xff]  }
  0x8c   :  { %6673 = vmatpush3.bf16.msra.mxu0 %v7410_v34  ;;  %v5920_v34 = vcombine.low %v38_v31, %v38_v31 }
  0x8d   :  { %6695 = vmatpush3.bf16.msra.mxu1 %v7411_v35  ;;  %6674 = vmatprep.subr.bf16.mxu0 %v7412_v36  ;;  %v5921_v35 = vcombine.high %v38_v31, %v38_v31  ;;  %v7472_v36 = vld [vmem:[%s9627_s1 + $0x678] sm:$0xff]   ;;  %v7516_v31 = vld [vmem:[%s9627_s1 + $0x768] sm:$0xff]  }
  0x8e   :  { %6696 = vmatprep.subr.bf16.mxu1 %v7413_v37  ;;  %v7473_v37 = vld [vmem:[%s9627_s1 + $0x6f8] sm:$0xff]  }
  0x90   :  { %6675 = vmatpush3.bf16.msra.mxu0 %v7414_v38  ;;  %v7474_v38 = vld [vmem:[%s9627_s1 + $0x638] sm:$0xff]  }
  0x91   :  { %6697 = vmatpush3.bf16.msra.mxu1 %v7415_v39  ;;  %6676 = vmatprep.subr.bf16.mxu0 %v7416_v40  ;;  %v7475_v39 = vld [vmem:[%s9627_s1 + $0x6b8] sm:$0xff]   ;;  %v7476_v40 = vld [vmem:[%s9627_s1 + $0x670] sm:$0xff]  }
  0x92   :  { %6698 = vmatprep.subr.bf16.mxu1 %v7417_v41  ;;  %v7477_v41 = vld [vmem:[%s9627_s1 + $0x6f0] sm:$0xff]  }
  0x94   :  { %6677 = vmatpush3.bf16.msra.mxu0 %v7418_v42  ;;  %v7478_v42 = vld [vmem:[%s9627_s1 + $0x630] sm:$0xff]  }
  0x95   :  { %6699 = vmatpush3.bf16.msra.mxu1 %v7419_v43  ;;  %6678 = vmatprep.subr.bf16.mxu0 %v7420_v44  ;;  %v7479_v43 = vld [vmem:[%s9627_s1 + $0x6b0] sm:$0xff]   ;;  %v7480_v44 = vld [vmem:[%s9627_s1 + $0x668] sm:$0xff]  }
  0x96   :  { %6700 = vmatprep.subr.bf16.mxu1 %v7421_v45  ;;  %v7481_v45 = vld [vmem:[%s9627_s1 + $0x6e8] sm:$0xff]  }
  0x98   :  { %6679 = vmatpush3.bf16.msra.mxu0 %v7422_v46  ;;  %v7482_v46 = vld [vmem:[%s9627_s1 + $0x628] sm:$0xff]  }
  0x99   :  { %6701 = vmatpush3.bf16.msra.mxu1 %v7423_v47  ;;  %6680 = vmatprep.subr.bf16.mxu0 %v7424_v48  ;;  %v7483_v47 = vld [vmem:[%s9627_s1 + $0x6a8] sm:$0xff]   ;;  %v7484_v48 = vld [vmem:[%s9627_s1 + $0x660] sm:$0xff]  }
  0x9a   :  { %6702 = vmatprep.subr.bf16.mxu1 %v7425_v49  ;;  %v7485_v49 = vld [vmem:[%s9627_s1 + $0x6e0] sm:$0xff]  }
  0x9c   :  { %6681 = vmatpush3.bf16.msra.mxu0 %v7426_v50  ;;  %v7486_v50 = vld [vmem:[%s9627_s1 + $0x620] sm:$0xff]  }
  0x9d   :  { %6703 = vmatpush3.bf16.msra.mxu1 %v7427_v51  ;;  %6682 = vmatprep.subr.bf16.mxu0 %v7428_v52  ;;  %v7487_v51 = vld [vmem:[%s9627_s1 + $0x6a0] sm:$0xff]   ;;  %v7488_v52 = vld [vmem:[%s9627_s1 + $0x658] sm:$0xff]  }
  0x9e   :  { %6704 = vmatprep.subr.bf16.mxu1 %v7429_v53  ;;  %v7489_v53 = vld [vmem:[%s9627_s1 + $0x6d8] sm:$0xff]  }
  0xa0   :  { %6683 = vmatpush3.bf16.msra.mxu0 %v7430_v54  ;;  %v7490_v54 = vld [vmem:[%s9627_s1 + $0x618] sm:$0xff]  }
  0xa1   :  { %6705 = vmatpush3.bf16.msra.mxu1 %v7431_v55  ;;  %6712 = vmatprep.subr.bf16.mxu0 %v7436_v62  ;;  %v7491_v55 = vld [vmem:[%s9627_s1 + $0x698] sm:$0xff]   ;;  %v7498_v62 = vld [vmem:[%s9627_s1 + $0x608] sm:$0xff]  }
  0xa2   :  { %6734 = vmatprep.subr.bf16.mxu1 %v7437_v63  ;;  %v7499_v63 = vld [vmem:[%s9627_s1 + $0x688] sm:$0xff]  }
  0xa3   :  { %4739 = vmatmul.mubr.bf16.vlgmr.msra.gmra.mxu0 %v5914_v57  ;;  %v7493_v57 = vld [vmem:[%s9627_s1 + $0x6d0] sm:$0xff]  }
  0xa4   :  { %4779 = vmatmul.mubr.bf16.vlgmr.msra.gmra.mxu1 %v5916_v60  ;;  %6713 = vmatpush3.bf16.msra.mxu0 %v7438_v0  ;;  %v7496_v60 = vld [vmem:[%s9627_s1 + $0x648] sm:$0xff]   ;;  %v7500_v0 = vld [vmem:[%s9627_s1 + $0x640] sm:$0xff]  }
  0xa5   :  { %6735 = vmatpush3.bf16.msra.mxu1 %v7439_v1  ;;  %6714 = vmatprep.subr.bf16.mxu0 %v7440_v2  ;;  %v7501_v1 = vld [vmem:[%s9627_s1 + $0x6c0] sm:$0xff]  }
  0xa6   :  { %6736 = vmatprep.subr.bf16.mxu1 %v7441_v3  ;;  %4818 = vmatprep.mubr.bf16.mxu0 %v5919_v33  ;;  %v7502_v2 = vld [vmem:[%s9627_s1 + $0x600] sm:$0xff]   ;;  %v7518_v33 = vld [vmem:[%s9627_s1 + $0x728] sm:$0xff]  }
  0xa7   :  { %4858 = vmatprep.mubr.bf16.mxu1 %v5921_v35  ;;  %v7503_v3 = vld [vmem:[%s9627_s1 + $0x680] sm:$0xff]  }
  0xa8   :  { %6715 = vmatpush3.bf16.msra.mxu0 %v7442_v4  ;;  %v39_v4 = vld [vmem:[%s9628_s0 + $0x60] sm:$0xff] }
  0xa9   :  { %6737 = vmatpush3.bf16.msra.mxu1 %v7443_v5  ;;  %6716 = vmatprep.subr.bf16.mxu0 %v7444_v6  ;;  %v40_v5 = vld [vmem:[%s9628_s0 + $0x68] sm:$0xff]  ;;  %v7520_v35 = vld [vmem:[%s9627_s1 + $0x760] sm:$0xff]  }
  0xaa   :  { %6738 = vmatprep.subr.bf16.mxu1 %v7445_v7 }
  0xac   :  { %6717 = vmatpush3.bf16.msra.mxu0 %v7446_v8  ;;  %v5922_v8 = vcombine.low %v39_v4, %v39_v4 }
  0xad   :  { %6739 = vmatpush3.bf16.msra.mxu1 %v7447_v9  ;;  %6718 = vmatprep.subr.bf16.mxu0 %v7448_v10  ;;  %v5923_v9 = vcombine.high %v39_v4, %v39_v4  ;;  %v5924_v10 = vcombine.low %v40_v5, %v40_v5 }
  0xae   :  { %6740 = vmatprep.subr.bf16.mxu1 %v7449_v11  ;;  %v7508_v11 = vld [vmem:[%s9627_s1 + $0x778] sm:$0xff]  }
  0xb0   :  { %6719 = vmatpush3.bf16.msra.mxu0 %v7450_v12  ;;  %v5925_v12 = vcombine.high %v40_v5, %v40_v5 }
  0xb1   :  { %6741 = vmatpush3.bf16.msra.mxu1 %v7451_v13  ;;  %6720 = vmatprep.subr.bf16.mxu0 %v7452_v14  ;;  %v7509_v13 = vld [vmem:[%s9627_s1 + $0x7f8] sm:$0xff]  }
  0xb2   :  { %6742 = vmatprep.subr.bf16.mxu1 %v7453_v15 }
  0xb4   :  { %6721 = vmatpush3.bf16.msra.mxu0 %v7454_v16  ;;  %v7510_v16 = vld [vmem:[%s9627_s1 + $0x738] sm:$0xff]  }
  0xb5   :  { %6743 = vmatpush3.bf16.msra.mxu1 %v7455_v17  ;;  %6722 = vmatprep.subr.bf16.mxu0 %v7456_v18 }
  0xb6   :  { %6744 = vmatprep.subr.bf16.mxu1 %v7457_v19  ;;  %v7511_v19 = vld [vmem:[%s9627_s1 + $0x7b8] sm:$0xff]  }
  0xb8   :  { %6723 = vmatpush3.bf16.msra.mxu0 %v7458_v20  ;;  %v5897_v20 = vld [vmem:[%s9629_s2] ss:$0 sm:$0xff] }
  0xb9   :  { %6745 = vmatpush3.bf16.msra.mxu1 %v7459_v21  ;;  %6724 = vmatprep.subr.bf16.mxu0 %v7460_v22 }
  0xba   :  { %6746 = vmatprep.subr.bf16.mxu1 %v7461_v23 }
  0xbc   :  { %6725 = vmatpush3.bf16.msra.mxu0 %v7462_v24  ;;  %v7512_v24 = vld [vmem:[%s9627_s1 + $0x770] sm:$0xff]  }
  0xbd   :  { %6747 = vmatpush3.bf16.msra.mxu1 %v7463_v25  ;;  %6726 = vmatprep.subr.bf16.mxu0 %v7464_v26  ;;  %v7513_v25 = vld [vmem:[%s9627_s1 + $0x7f0] sm:$0xff]  }
  0xbe   :  { %6748 = vmatprep.subr.bf16.mxu1 %v7465_v27 }
  0xc0   :  { %6727 = vmatpush3.bf16.msra.mxu0 %v7466_v28 }
  0xc1   :  { %6749 = vmatpush3.bf16.msra.mxu1 %v7467_v29  ;;  %6756 = vmatprep.subr.bf16.mxu0 %v7472_v36  ;;  %v7514_v29 = vld [vmem:[%s9627_s1 + $0x730] sm:$0xff]   ;;  %v7521_v36 = vld [vmem:[%s9627_s1 + $0x7e0] sm:$0xff]  }
  0xc2   :  { %6778 = vmatprep.subr.bf16.mxu1 %v7473_v37  ;;  %v7522_v37 = vld [vmem:[%s9627_s1 + $0x720] sm:$0xff]  }
  0xc3   :  { %4819 = vmatmul.mubr.bf16.vlgmr.msra.gmra.mxu0 %v5918_v32  ;;  %v7517_v32 = vld [vmem:[%s9627_s1 + $0x7e8] sm:$0xff]  }
  0xc4   :  { %4859 = vmatmul.mubr.bf16.vlgmr.msra.gmra.mxu1 %v5920_v34  ;;  %6757 = vmatpush3.bf16.msra.mxu0 %v7474_v38  ;;  %v7519_v34 = vld [vmem:[%s9627_s1 + $0x7a8] sm:$0xff]   ;;  %v7523_v38 = vld [vmem:[%s9627_s1 + $0x7a0] sm:$0xff]  }
  0xc5   :  { %6779 = vmatpush3.bf16.msra.mxu1 %v7475_v39  ;;  %6758 = vmatprep.subr.bf16.mxu0 %v7476_v40  ;;  %v7524_v39 = vld [vmem:[%s9627_s1 + $0x758] sm:$0xff]  }
  0xc6   :  { %6780 = vmatprep.subr.bf16.mxu1 %v7477_v41  ;;  %4898 = vmatprep.mubr.bf16.mxu0 %v5923_v9  ;;  %v7525_v40 = vld [vmem:[%s9627_s1 + $0x7d8] sm:$0xff]  }
  0xc7   :  { %4938 = vmatprep.mubr.bf16.mxu1 %v5925_v12  ;;  %v7526_v41 = vld [vmem:[%s9627_s1 + $0x718] sm:$0xff]  }
  0xc8   :  { %6759 = vmatpush3.bf16.msra.mxu0 %v7478_v42  ;;  %v7527_v42 = vld [vmem:[%s9627_s1 + $0x798] sm:$0xff]  }
  0xc9   :  { %6781 = vmatpush3.bf16.msra.mxu1 %v7479_v43  ;;  %6760 = vmatprep.subr.bf16.mxu0 %v7480_v44  ;;  %v7528_v43 = vld [vmem:[%s9627_s1 + $0x750] sm:$0xff]  }
  0xca   :  { %6782 = vmatprep.subr.bf16.mxu1 %v7481_v45  ;;  %v7529_v44 = vld [vmem:[%s9627_s1 + $0x7d0] sm:$0xff]  }
  0xcb   :  { %v7530_v45 = vld [vmem:[%s9627_s1 + $0x710] sm:$0xff]  }
  0xcc   :  { %6761 = vmatpush3.bf16.msra.mxu0 %v7482_v46  ;;  %v7531_v46 = vld [vmem:[%s9627_s1 + $0x790] sm:$0xff]  }
  0xcd   :  { %6783 = vmatpush3.bf16.msra.mxu1 %v7483_v47  ;;  %6762 = vmatprep.subr.bf16.mxu0 %v7484_v48  ;;  %v7532_v47 = vld [vmem:[%s9627_s1 + $0x748] sm:$0xff]  }
  0xce   :  { %6784 = vmatprep.subr.bf16.mxu1 %v7485_v49  ;;  %v7533_v48 = vld [vmem:[%s9627_s1 + $0x7c8] sm:$0xff]  }
  0xcf   :  { %v7534_v49 = vld [vmem:[%s9627_s1 + $0x708] sm:$0xff]  }
  0xd0   :  { %6763 = vmatpush3.bf16.msra.mxu0 %v7486_v50  ;;  %v7535_v50 = vld [vmem:[%s9627_s1 + $0x788] sm:$0xff]  }
  0xd1   :  { %6785 = vmatpush3.bf16.msra.mxu1 %v7487_v51  ;;  %6764 = vmatprep.subr.bf16.mxu0 %v7488_v52  ;;  %v7536_v51 = vld [vmem:[%s9627_s1 + $0x740] sm:$0xff]  }
  0xd2   :  { %6786 = vmatprep.subr.bf16.mxu1 %v7489_v53  ;;  %v7537_v52 = vld [vmem:[%s9627_s1 + $0x7c0] sm:$0xff]  }
  0xd3   :  { %v7538_v53 = vld [vmem:[%s9627_s1 + $0x700] sm:$0xff]  }
  0xd4   :  { %6765 = vmatpush3.bf16.msra.mxu0 %v7490_v54  ;;  %v7539_v54 = vld [vmem:[%s9627_s1 + $0x780] sm:$0xff]  }
  0xd5   :  { %6787 = vmatpush3.bf16.msra.mxu1 %v7491_v55  ;;  %6766 = vmatprep.subr.bf16.mxu0 %v7492_v56  ;;  %v41_v55 = vld [vmem:[%s9628_s0 + $0x70] sm:$0xff]  ;;  %v42_v56 = vld [vmem:[%s9628_s0 + $0x78] sm:$0xff] }
  0xd6   :  { %6788 = vmatprep.subr.bf16.mxu1 %v7493_v57 }
  0xd8   :  { %6767 = vmatpush3.bf16.msra.mxu0 %v7494_v58 }
  0xd9   :  { %6789 = vmatpush3.bf16.msra.mxu1 %v7495_v59  ;;  %6768 = vmatprep.subr.bf16.mxu0 %v7496_v60  ;;  %v5926_v59 = vcombine.low %v41_v55, %v41_v55  ;;  %v5927_v60 = vcombine.high %v41_v55, %v41_v55 }
  0xda   :  { %6790 = vmatprep.subr.bf16.mxu1 %v7497_v61  ;;  %v5928_v61 = vcombine.low %v42_v56, %v42_v56 }
  0xdc   :  { %6769 = vmatpush3.bf16.msra.mxu0 %v7498_v62  ;;  %v7544_v62 = vld [vmem:[%s9627_s1 + $0x878] sm:$0xff]  }
  0xdd   :  { %6791 = vmatpush3.bf16.msra.mxu1 %v7499_v63  ;;  %6770 = vmatprep.subr.bf16.mxu0 %v7500_v0  ;;  %v5929_v63 = vcombine.high %v42_v56, %v42_v56  ;;  %v7545_v0 = vld [vmem:[%s9627_s1 + $0x8f8] sm:$0xff]  }
  0xde   :  { %6792 = vmatprep.subr.bf16.mxu1 %v7501_v1 }
  0xe0   :  { %6771 = vmatpush3.bf16.msra.mxu0 %v7502_v2 }
  0xe1   :  { %6793 = vmatpush3.bf16.msra.mxu1 %v7503_v3  ;;  %6800 = vmatprep.subr.bf16.mxu0 %v7508_v11  ;;  %v7546_v3 = vld [vmem:[%s9627_s1 + $0x838] sm:$0xff]   ;;  %v7549_v11 = vld [vmem:[%s9627_s1 + $0x8f0] sm:$0xff]  }
  0xe2   :  { %6822 = vmatprep.subr.bf16.mxu1 %v7509_v13 }
  0xe3   :  { %v6508_v6 = vpop.f32.mrf.mxu0  ;;  %4899 = vmatmul.mubr.bf16.vlgmr.msra.gmra.mxu0 %v5922_v8 }
  0xe4   :  { %v6530_v7 = vpop.f32.mrf.mxu1  ;;  %4939 = vmatmul.mubr.bf16.vlgmr.msra.gmra.mxu1 %v5924_v10  ;;  %6801 = vmatpush3.bf16.msra.mxu0 %v7510_v16  ;;  %v7548_v10 = vld [vmem:[%s9627_s1 + $0x870] sm:$0xff]  }
  0xe5   :  { %v6509_v14 = vpop.f32.mrf.mxu0  ;;  %6823 = vmatpush3.bf16.msra.mxu1 %v7511_v19  ;;  %6802 = vmatprep.subr.bf16.mxu0 %v7512_v24  ;;  %v7551_v16 = vld [vmem:[%s9627_s1 + $0x8b0] sm:$0xff]   ;;  %v7554_v19 = vld [vmem:[%s9627_s1 + $0x828] sm:$0xff]   ;;  %v7559_v24 = vld [vmem:[%s9627_s1 + $0x8a0] sm:$0xff]  }
  0xe6   :  { %v6531_v15 = vpop.f32.mrf.mxu1  ;;  %v6510_v17 = vadd.f32 %v6509_v14, %v6508_v6  ;;  %6824 = vmatprep.subr.bf16.mxu1 %v7513_v25  ;;  %4978 = vmatprep.mubr.bf16.mxu0 %v5927_v60  ;;  %v7547_v6 = vld [vmem:[%s9627_s1 + $0x8b8] sm:$0xff]   ;;  %v7584_v60 = vld [vmem:[%s9627_s1 + $0x970] sm:$0xff]  }
  0xe7   :  { %v6532_v18 = vadd.f32 %v6531_v15, %v6530_v7  ;;  %v6511_v21 = vpop.f32.mrf.mxu0  ;;  %5018 = vmatprep.mubr.bf16.mxu1 %v5929_v63  ;;  %v7550_v15 = vld [vmem:[%s9627_s1 + $0x830] sm:$0xff]   ;;  %v7560_v25 = vld [vmem:[%s9627_s1 + $0x858] sm:$0xff]  }
  0xe8   :  { %v6533_v22 = vpop.f32.mrf.mxu1  ;;  %v4421_v23 = vadd.f32 %v6510_v17, %v5897_v20  ;;  %6803 = vmatpush3.bf16.msra.mxu0 %v7514_v29  ;;  %v7552_v17 = vld [vmem:[%s9627_s1 + $0x868] sm:$0xff]   ;;  %v7556_v21 = vld [vmem:[%s9627_s1 + $0x860] sm:$0xff]   ;;  %v7564_v29 = vld [vmem:[%s9627_s1 + $0x850] sm:$0xff]  }
  0xe9   :  { %v6512_v26 = vpop.f32.mrf.mxu0  ;;  %6825 = vmatpush3.bf16.msra.mxu1 %v7515_v30  ;;  %6804 = vmatprep.subr.bf16.mxu0 %v7516_v31  ;;  %v7555_v20 = vld [vmem:[%s9627_s1 + $0x8a8] sm:$0xff]   ;;  %v7557_v22 = vld [vmem:[%s9627_s1 + $0x8e0] sm:$0xff]   ;;  %v7565_v30 = vld [vmem:[%s9627_s1 + $0x8d0] sm:$0xff]  }
  0xea   :  { %v6534_v27 = vpop.f32.mrf.mxu1  ;;  %v8625_v28 = vadd.f32 %v6532_v18, %v4421_v23  ;;  %6826 = vmatprep.subr.bf16.mxu1 %v7517_v32  ;;  %v7553_v18 = vld [vmem:[%s9627_s1 + $0x8e8] sm:$0xff]   ;;  %v7558_v23 = vld [vmem:[%s9627_s1 + $0x820] sm:$0xff]   ;;  %v7561_v26 = vld [vmem:[%s9627_s1 + $0x8d8] sm:$0xff]  }
  0xeb   :  { %v7562_v27 = vld [vmem:[%s9627_s1 + $0x818] sm:$0xff]   ;;  %v7566_v31 = vld [vmem:[%s9627_s1 + $0x810] sm:$0xff]  }
  0xec   :  { %6805 = vmatpush3.bf16.msra.mxu0 %v7518_v33  ;;  %v7567_v32 = vld [vmem:[%s9627_s1 + $0x890] sm:$0xff]   ;;  %v7568_v33 = vld [vmem:[%s9627_s1 + $0x848] sm:$0xff]  }
  0xed   :  { %6827 = vmatpush3.bf16.msra.mxu1 %v7519_v34  ;;  %6806 = vmatprep.subr.bf16.mxu0 %v7520_v35  ;;  %v7569_v34 = vld [vmem:[%s9627_s1 + $0x8c8] sm:$0xff]   ;;  %v7585_v63 = vld [vmem:[%s9627_s1 + $0x9f0] sm:$0xff]  }
  0xee   :  { %6828 = vmatprep.subr.bf16.mxu1 %v7521_v36  ;;  %v7570_v35 = vld [vmem:[%s9627_s1 + $0x808] sm:$0xff]  }
  0xef   :  { %v7571_v36 = vld [vmem:[%s9627_s1 + $0x888] sm:$0xff]  }
  0xf0   :  { %6807 = vmatpush3.bf16.msra.mxu0 %v7522_v37  ;;  %v7572_v37 = vld [vmem:[%s9627_s1 + $0x840] sm:$0xff]  }
  0xf1   :  { %6829 = vmatpush3.bf16.msra.mxu1 %v7523_v38  ;;  %6808 = vmatprep.subr.bf16.mxu0 %v7524_v39  ;;  %v7573_v38 = vld [vmem:[%s9627_s1 + $0x8c0] sm:$0xff]  }
  0xf2   :  { %6830 = vmatprep.subr.bf16.mxu1 %v7525_v40  ;;  %v7574_v39 = vld [vmem:[%s9627_s1 + $0x800] sm:$0xff]  }
  0xf3   :  { %v7575_v40 = vld [vmem:[%s9627_s1 + $0x880] sm:$0xff]  }
  0xf4   :  { %6809 = vmatpush3.bf16.msra.mxu0 %v7526_v41  ;;  %v43_v41 = vld [vmem:[%s9628_s0 + $0x80] sm:$0xff] }
  0xf5   :  { %6831 = vmatpush3.bf16.msra.mxu1 %v7527_v42  ;;  %6810 = vmatprep.subr.bf16.mxu0 %v7528_v43  ;;  %v5930_v43 = vcombine.low %v43_v41, %v43_v41 }
  0xf6   :  { %6832 = vmatprep.subr.bf16.mxu1 %v7529_v44  ;;  %v5931_v44 = vcombine.high %v43_v41, %v43_v41  ;;  %v7619_v41 = vld [vmem:[%s9627_s1 + $0xab8] sm:$0xff]  }
  0xf8   :  { %6811 = vmatpush3.bf16.msra.mxu0 %v7530_v45  ;;  %v44_v45 = vld [vmem:[%s9628_s0 + $0x88] sm:$0xff] }
  0xf9   :  { %6833 = vmatpush3.bf16.msra.mxu1 %v7531_v46  ;;  %6812 = vmatprep.subr.bf16.mxu0 %v7532_v47  ;;  %v5932_v47 = vcombine.low %v44_v45, %v44_v45 }
  0xfa   :  { %6834 = vmatprep.subr.bf16.mxu1 %v7533_v48  ;;  %v5933_v48 = vcombine.high %v44_v45, %v44_v45 }
  0xfc   :  { %6813 = vmatpush3.bf16.msra.mxu0 %v7534_v49  ;;  %v7580_v49 = vld [vmem:[%s9627_s1 + $0x978] sm:$0xff]  }
  0xfd   :  { %6835 = vmatpush3.bf16.msra.mxu1 %v7535_v50  ;;  %6814 = vmatprep.subr.bf16.mxu0 %v7536_v51  ;;  %v7581_v51 = vld [vmem:[%s9627_s1 + $0x9f8] sm:$0xff]  }
  0xfe   :  { %6836 = vmatprep.subr.bf16.mxu1 %v7537_v52 }
 0x100   :  { %6815 = vmatpush3.bf16.msra.mxu0 %v7538_v53 }
 0x101   :  { %6837 = vmatpush3.bf16.msra.mxu1 %v7539_v54  ;;  %6844 = vmatprep.subr.bf16.mxu0 %v7544_v62  ;;  %v7582_v54 = vld [vmem:[%s9627_s1 + $0x938] sm:$0xff]  }
 0x102   :  { %6866 = vmatprep.subr.bf16.mxu1 %v7545_v0 }
 0x103   :  { %v6552_v57 = vpop.f32.mrf.mxu0  ;;  %4979 = vmatmul.mubr.bf16.vlgmr.msra.gmra.mxu0 %v5926_v59 }
 0x104   :  { %v6574_v58 = vpop.f32.mrf.mxu1  ;;  %5019 = vmatmul.mubr.bf16.vlgmr.msra.gmra.mxu1 %v5928_v61  ;;  %6845 = vmatpush3.bf16.msra.mxu0 %v7546_v3  ;;  %v7588_v3 = vld [vmem:[%s9627_s1 + $0x968] sm:$0xff]  }
 0x105   :  { %v6553_v1 = vpop.f32.mrf.mxu0  ;;  %6867 = vmatpush3.bf16.msra.mxu1 %v7547_v6  ;;  %6846 = vmatprep.subr.bf16.mxu0 %v7548_v10  ;;  %v7591_v6 = vld [vmem:[%s9627_s1 + $0x9a8] sm:$0xff]   ;;  %v7595_v10 = vld [vmem:[%s9627_s1 + $0x9a0] sm:$0xff]  }
 0x106   :  { %v6575_v2 = vpop.f32.mrf.mxu1  ;;  %v6554_v4 = vadd.f32 %v6553_v1, %v6552_v57  ;;  %6868 = vmatprep.subr.bf16.mxu1 %v7549_v11  ;;  %5058 = vmatprep.mubr.bf16.mxu0 %v5931_v44  ;;  %v7583_v57 = vld [vmem:[%s9627_s1 + $0x9b8] sm:$0xff]   ;;  %v7586_v1 = vld [vmem:[%s9627_s1 + $0x930] sm:$0xff]  }
 0x107   :  { %v6576_v5 = vadd.f32 %v6575_v2, %v6574_v58  ;;  %v6555_v7 = vpop.f32.mrf.mxu0  ;;  %5098 = vmatprep.mubr.bf16.mxu1 %v5933_v48  ;;  %v7587_v2 = vld [vmem:[%s9627_s1 + $0x9b0] sm:$0xff]   ;;  %v7596_v11 = vld [vmem:[%s9627_s1 + $0x958] sm:$0xff]  }
 0x108   :  { %v6577_v8 = vpop.f32.mrf.mxu1  ;;  %v4501_v9 = vadd.f32 %v6554_v4, %v8625_v28  ;;  %6847 = vmatpush3.bf16.msra.mxu0 %v7550_v15  ;;  %v7563_v28 = vld [vmem:[%s9627_s1 + $0x898] sm:$0xff]   ;;  %v7589_v4 = vld [vmem:[%s9627_s1 + $0x9e8] sm:$0xff]   ;;  %v7592_v7 = vld [vmem:[%s9627_s1 + $0x960] sm:$0xff]  }
 0x109   :  { %v6556_v12 = vpop.f32.mrf.mxu0  ;;  %6869 = vmatpush3.bf16.msra.mxu1 %v7551_v16  ;;  %6848 = vmatprep.subr.bf16.mxu0 %v7552_v17  ;;  %v7593_v8 = vld [vmem:[%s9627_s1 + $0x9e0] sm:$0xff]   ;;  %v7600_v15 = vld [vmem:[%s9627_s1 + $0x950] sm:$0xff]  }
 0x10a   :  { %v6578_v13 = vpop.f32.mrf.mxu1  ;;  %v8730_v14 = vadd.f32 %v6576_v5, %v4501_v9  ;;  %6870 = vmatprep.subr.bf16.mxu1 %v7553_v18  ;;  %v7590_v5 = vld [vmem:[%s9627_s1 + $0x928] sm:$0xff]   ;;  %v7594_v9 = vld [vmem:[%s9627_s1 + $0x920] sm:$0xff]   ;;  %v7597_v12 = vld [vmem:[%s9627_s1 + $0x9d8] sm:$0xff]  }
 0x10b   :  { %v7598_v13 = vld [vmem:[%s9627_s1 + $0x918] sm:$0xff]   ;;  %v7601_v16 = vld [vmem:[%s9627_s1 + $0x9d0] sm:$0xff]  }
 0x10c   :  { %6849 = vmatpush3.bf16.msra.mxu0 %v7554_v19  ;;  %v7602_v17 = vld [vmem:[%s9627_s1 + $0x910] sm:$0xff]   ;;  %v7604_v19 = vld [vmem:[%s9627_s1 + $0x948] sm:$0xff]  }
 0x10d   :  { %6871 = vmatpush3.bf16.msra.mxu1 %v7555_v20  ;;  %6850 = vmatprep.subr.bf16.mxu0 %v7556_v21  ;;  %v7603_v18 = vld [vmem:[%s9627_s1 + $0x990] sm:$0xff]   ;;  %v7605_v20 = vld [vmem:[%s9627_s1 + $0x9c8] sm:$0xff]  }
 0x10e   :  { %6872 = vmatprep.subr.bf16.mxu1 %v7557_v22  ;;  %v7606_v21 = vld [vmem:[%s9627_s1 + $0x908] sm:$0xff]  }
 0x10f   :  { %v7607_v22 = vld [vmem:[%s9627_s1 + $0x988] sm:$0xff]  }
 0x110   :  { %6851 = vmatpush3.bf16.msra.mxu0 %v7558_v23  ;;  %v7608_v23 = vld [vmem:[%s9627_s1 + $0x940] sm:$0xff]  }
 0x111   :  { %6873 = vmatpush3.bf16.msra.mxu1 %v7559_v24  ;;  %6852 = vmatprep.subr.bf16.mxu0 %v7560_v25  ;;  %v7609_v24 = vld [vmem:[%s9627_s1 + $0x9c0] sm:$0xff]  }
 0x112   :  { %6874 = vmatprep.subr.bf16.mxu1 %v7561_v26  ;;  %v7610_v25 = vld [vmem:[%s9627_s1 + $0x900] sm:$0xff]  }
 0x113   :  { %v7611_v26 = vld [vmem:[%s9627_s1 + $0x980] sm:$0xff]  }
 0x114   :  { %6853 = vmatpush3.bf16.msra.mxu0 %v7562_v27  ;;  %v45_v27 = vld [vmem:[%s9628_s0 + $0x90] sm:$0xff] }
 0x115   :  { %6875 = vmatpush3.bf16.msra.mxu1 %v7563_v28  ;;  %6854 = vmatprep.subr.bf16.mxu0 %v7564_v29  ;;  %v46_v28 = vld [vmem:[%s9628_s0 + $0x98] sm:$0xff] }
 0x116   :  { %6876 = vmatprep.subr.bf16.mxu1 %v7565_v30  ;;  %v5934_v30 = vcombine.low %v45_v27, %v45_v27 }
 0x118   :  { %6855 = vmatpush3.bf16.msra.mxu0 %v7566_v31  ;;  %v5935_v31 = vcombine.high %v45_v27, %v45_v27 }
 0x119   :  { %6877 = vmatpush3.bf16.msra.mxu1 %v7567_v32  ;;  %6856 = vmatprep.subr.bf16.mxu0 %v7568_v33  ;;  %v5936_v32 = vcombine.low %v46_v28, %v46_v28  ;;  %v5937_v33 = vcombine.high %v46_v28, %v46_v28  ;;  %v7655_v28 = vld [vmem:[%s9627_s1 + $0xbb8] sm:$0xff]  }
 0x11a   :  { %6878 = vmatprep.subr.bf16.mxu1 %v7569_v34 }
 0x11c   :  { %6857 = vmatpush3.bf16.msra.mxu0 %v7570_v35  ;;  %v7616_v35 = vld [vmem:[%s9627_s1 + $0xa78] sm:$0xff]  }
 0x11d   :  { %6879 = vmatpush3.bf16.msra.mxu1 %v7571_v36  ;;  %6858 = vmatprep.subr.bf16.mxu0 %v7572_v37  ;;  %v7617_v36 = vld [vmem:[%s9627_s1 + $0xaf8] sm:$0xff]  }
 0x11e   :  { %6880 = vmatprep.subr.bf16.mxu1 %v7573_v38  ;;  %v7618_v38 = vld [vmem:[%s9627_s1 + $0xa38] sm:$0xff]  }
 0x120   :  { %6859 = vmatpush3.bf16.msra.mxu0 %v7574_v39 }
 0x121   :  { %6881 = vmatpush3.bf16.msra.mxu1 %v7575_v40  ;;  %6888 = vmatprep.subr.bf16.mxu0 %v7580_v49 }
 0x122   :  { %6910 = vmatprep.subr.bf16.mxu1 %v7581_v51 }
 0x123   :  { %v6596_v42 = vpop.f32.mrf.mxu0  ;;  %5059 = vmatmul.mubr.bf16.vlgmr.msra.gmra.mxu0 %v5930_v43 }
 0x124   :  { %v6618_v46 = vpop.f32.mrf.mxu1  ;;  %5099 = vmatmul.mubr.bf16.vlgmr.msra.gmra.mxu1 %v5932_v47  ;;  %6889 = vmatpush3.bf16.msra.mxu0 %v7582_v54  ;;  %v7621_v47 = vld [vmem:[%s9627_s1 + $0xaf0] sm:$0xff]   ;;  %v7625_v54 = vld [vmem:[%s9627_s1 + $0xae8] sm:$0xff]  }
 0x125   :  { %v6597_v50 = vpop.f32.mrf.mxu0  ;;  %6911 = vmatpush3.bf16.msra.mxu1 %v7583_v57  ;;  %6890 = vmatprep.subr.bf16.mxu0 %v7584_v60  ;;  %v7628_v57 = vld [vmem:[%s9627_s1 + $0xa60] sm:$0xff]  }
 0x126   :  { %v6598_v52 = vadd.f32 %v6597_v50, %v6596_v42  ;;  %v6619_v53 = vpop.f32.mrf.mxu1  ;;  %6912 = vmatprep.subr.bf16.mxu1 %v7585_v63  ;;  %5138 = vmatprep.mubr.bf16.mxu0 %v5935_v31  ;;  %v7622_v50 = vld [vmem:[%s9627_s1 + $0xa30] sm:$0xff]   ;;  %v7631_v60 = vld [vmem:[%s9627_s1 + $0xaa0] sm:$0xff]   ;;  %v7634_v63 = vld [vmem:[%s9627_s1 + $0xa18] sm:$0xff]  }
 0x127   :  { %v6620_v55 = vadd.f32 %v6619_v53, %v6618_v46  ;;  %v6599_v56 = vpop.f32.mrf.mxu0  ;;  %5178 = vmatprep.mubr.bf16.mxu1 %v5937_v33  ;;  %v7620_v46 = vld [vmem:[%s9627_s1 + $0xa70] sm:$0xff]   ;;  %v7624_v53 = vld [vmem:[%s9627_s1 + $0xa68] sm:$0xff]  }
 0x128   :  { %v4581_v58 = vadd.f32 %v6598_v52, %v8730_v14  ;;  %v6621_v59 = vpop.f32.mrf.mxu1  ;;  %6891 = vmatpush3.bf16.msra.mxu0 %v7586_v1  ;;  %v7599_v14 = vld [vmem:[%s9627_s1 + $0x998] sm:$0xff]   ;;  %v7623_v52 = vld [vmem:[%s9627_s1 + $0xab0] sm:$0xff]   ;;  %v7627_v56 = vld [vmem:[%s9627_s1 + $0xaa8] sm:$0xff]  }
 0x129   :  { %v6600_v61 = vpop.f32.mrf.mxu0  ;;  %6913 = vmatpush3.bf16.msra.mxu1 %v7587_v2  ;;  %6892 = vmatprep.subr.bf16.mxu0 %v7588_v3  ;;  %v7630_v59 = vld [vmem:[%s9627_s1 + $0xa20] sm:$0xff]   ;;  %v7636_v1 = vld [vmem:[%s9627_s1 + $0xa50] sm:$0xff]  }
 0x12a   :  { %v8832_v62 = vadd.f32 %v6620_v55, %v4581_v58  ;;  %v6622_v0 = vpop.f32.mrf.mxu1  ;;  %6914 = vmatprep.subr.bf16.mxu1 %v7589_v4  ;;  %v7626_v55 = vld [vmem:[%s9627_s1 + $0xa28] sm:$0xff]   ;;  %v7629_v58 = vld [vmem:[%s9627_s1 + $0xae0] sm:$0xff]   ;;  %v7632_v61 = vld [vmem:[%s9627_s1 + $0xa58] sm:$0xff]  }
 0x12b   :  { %v7635_v0 = vld [vmem:[%s9627_s1 + $0xa98] sm:$0xff]   ;;  %v7637_v2 = vld [vmem:[%s9627_s1 + $0xad0] sm:$0xff]  }
 0x12c   :  { %6893 = vmatpush3.bf16.msra.mxu0 %v7590_v5  ;;  %v7638_v3 = vld [vmem:[%s9627_s1 + $0xa10] sm:$0xff]   ;;  %v7640_v5 = vld [vmem:[%s9627_s1 + $0xa48] sm:$0xff]  }
 0x12d   :  { %6915 = vmatpush3.bf16.msra.mxu1 %v7591_v6  ;;  %6894 = vmatprep.subr.bf16.mxu0 %v7592_v7  ;;  %v7639_v4 = vld [vmem:[%s9627_s1 + $0xa90] sm:$0xff]   ;;  %v7641_v6 = vld [vmem:[%s9627_s1 + $0xac8] sm:$0xff]  }
 0x12e   :  { %6916 = vmatprep.subr.bf16.mxu1 %v7593_v8  ;;  %v7642_v7 = vld [vmem:[%s9627_s1 + $0xa08] sm:$0xff]   ;;  %v7657_v33 = vld [vmem:[%s9627_s1 + $0xbf0] sm:$0xff]  }
 0x12f   :  { %v7643_v8 = vld [vmem:[%s9627_s1 + $0xa88] sm:$0xff]  }
 0x130   :  { %6895 = vmatpush3.bf16.msra.mxu0 %v7594_v9  ;;  %v7644_v9 = vld [vmem:[%s9627_s1 + $0xa40] sm:$0xff]  }
 0x131   :  { %6917 = vmatpush3.bf16.msra.mxu1 %v7595_v10  ;;  %6896 = vmatprep.subr.bf16.mxu0 %v7596_v11  ;;  %v7645_v10 = vld [vmem:[%s9627_s1 + $0xac0] sm:$0xff]  }
 0x132   :  { %6918 = vmatprep.subr.bf16.mxu1 %v7597_v12  ;;  %v7646_v11 = vld [vmem:[%s9627_s1 + $0xa00] sm:$0xff]  }
 0x133   :  { %v7647_v12 = vld [vmem:[%s9627_s1 + $0xa80] sm:$0xff]  }
 0x134   :  { %6897 = vmatpush3.bf16.msra.mxu0 %v7598_v13  ;;  %v47_v13 = vld [vmem:[%s9628_s0 + $0xa0] sm:$0xff] }
 0x135   :  { %6919 = vmatpush3.bf16.msra.mxu1 %v7599_v14  ;;  %6898 = vmatprep.subr.bf16.mxu0 %v7600_v15  ;;  %v48_v14 = vld [vmem:[%s9628_s0 + $0xa8] sm:$0xff] }
 0x136   :  { %6920 = vmatprep.subr.bf16.mxu1 %v7601_v16 }
 0x138   :  { %6899 = vmatpush3.bf16.msra.mxu0 %v7602_v17  ;;  %v5938_v17 = vcombine.low %v47_v13, %v47_v13 }
 0x139   :  { %6921 = vmatpush3.bf16.msra.mxu1 %v7603_v18  ;;  %6900 = vmatprep.subr.bf16.mxu0 %v7604_v19  ;;  %v5939_v18 = vcombine.high %v47_v13, %v47_v13  ;;  %v5940_v19 = vcombine.low %v48_v14, %v48_v14 }
 0x13a   :  { %6922 = vmatprep.subr.bf16.mxu1 %v7605_v20  ;;  %v7652_v20 = vld [vmem:[%s9627_s1 + $0xb78] sm:$0xff]  }
 0x13c   :  { %6901 = vmatpush3.bf16.msra.mxu0 %v7606_v21  ;;  %v5941_v21 = vcombine.high %v48_v14, %v48_v14 }
 0x13d   :  { %6923 = vmatpush3.bf16.msra.mxu1 %v7607_v22  ;;  %6902 = vmatprep.subr.bf16.mxu0 %v7608_v23  ;;  %v7653_v22 = vld [vmem:[%s9627_s1 + $0xbf8] sm:$0xff]  }
 0x13e   :  { %6924 = vmatprep.subr.bf16.mxu1 %v7609_v24 }
 0x140   :  { %6903 = vmatpush3.bf16.msra.mxu0 %v7610_v25  ;;  %v7654_v25 = vld [vmem:[%s9627_s1 + $0xb38] sm:$0xff]  }
 0x141   :  { %6925 = vmatpush3.bf16.msra.mxu1 %v7611_v26  ;;  %6932 = vmatprep.subr.bf16.mxu0 %v7616_v35 }
 0x142   :  { %6954 = vmatprep.subr.bf16.mxu1 %v7617_v36 }
 0x143   :  { %v6640_v29 = vpop.f32.mrf.mxu0  ;;  %5139 = vmatmul.mubr.bf16.vlgmr.msra.gmra.mxu0 %v5934_v30 }
 0x144   :  { %v6662_v34 = vpop.f32.mrf.mxu1  ;;  %5179 = vmatmul.mubr.bf16.vlgmr.msra.gmra.mxu1 %v5936_v32  ;;  %6933 = vmatpush3.bf16.msra.mxu0 %v7618_v38  ;;  %v7656_v32 = vld [vmem:[%s9627_s1 + $0xb70] sm:$0xff]  }
 0x145   :  { %v6641_v37 = vpop.f32.mrf.mxu0  ;;  %6955 = vmatpush3.bf16.msra.mxu1 %v7619_v41  ;;  %6934 = vmatprep.subr.bf16.mxu0 %v7620_v46  ;;  %v7659_v38 = vld [vmem:[%s9627_s1 + $0xbb0] sm:$0xff]   ;;  %v7662_v41 = vld [vmem:[%s9627_s1 + $0xb28] sm:$0xff]   ;;  %v7667_v46 = vld [vmem:[%s9627_s1 + $0xba0] sm:$0xff]  }
 0x146   :  { %v6642_v39 = vadd.f32 %v6641_v37, %v6640_v29  ;;  %v6663_v40 = vpop.f32.mrf.mxu1  ;;  %6956 = vmatprep.subr.bf16.mxu1 %v7621_v47  ;;  %5218 = vmatprep.mubr.bf16.mxu0 %v5939_v18  ;;  %v7658_v37 = vld [vmem:[%s9627_s1 + $0xb30] sm:$0xff]   ;;  %v7668_v47 = vld [vmem:[%s9627_s1 + $0xb58] sm:$0xff]  }
 0x147   :  { %v6664_v42 = vadd.f32 %v6663_v40, %v6662_v34  ;;  %v6643_v43 = vpop.f32.mrf.mxu0  ;;  %5258 = vmatprep.mubr.bf16.mxu1 %v5941_v21  ;;  %v7661_v40 = vld [vmem:[%s9627_s1 + $0xbe8] sm:$0xff]   ;;  %v7692_v18 = vld [vmem:[%s9627_s1 + $0xc70] sm:$0xff]  }
 0x148   :  { %v4661_v44 = vadd.f32 %v6642_v39, %v8832_v62  ;;  %v6665_v45 = vpop.f32.mrf.mxu1  ;;  %6935 = vmatpush3.bf16.msra.mxu0 %v7622_v50  ;;  %v7633_v62 = vld [vmem:[%s9627_s1 + $0xad8] sm:$0xff]   ;;  %v7660_v39 = vld [vmem:[%s9627_s1 + $0xb68] sm:$0xff]   ;;  %v7664_v43 = vld [vmem:[%s9627_s1 + $0xb60] sm:$0xff]  }
 0x149   :  { %v6644_v48 = vpop.f32.mrf.mxu0  ;;  %6957 = vmatpush3.bf16.msra.mxu1 %v7623_v52  ;;  %6936 = vmatprep.subr.bf16.mxu0 %v7624_v53  ;;  %v7666_v45 = vld [vmem:[%s9627_s1 + $0xb20] sm:$0xff]   ;;  %v7671_v50 = vld [vmem:[%s9627_s1 + $0xb98] sm:$0xff]   ;;  %v7673_v52 = vld [vmem:[%s9627_s1 + $0xbd0] sm:$0xff]  }
 0x14a   :  { %v8940_v49 = vadd.f32 %v6664_v42, %v4661_v44  ;;  %v6666_v51 = vpop.f32.mrf.mxu1  ;;  %6958 = vmatprep.subr.bf16.mxu1 %v7625_v54  ;;  %v7663_v42 = vld [vmem:[%s9627_s1 + $0xba8] sm:$0xff]   ;;  %v7665_v44 = vld [vmem:[%s9627_s1 + $0xbe0] sm:$0xff]   ;;  %v7669_v48 = vld [vmem:[%s9627_s1 + $0xbd8] sm:$0xff]  }
 0x14b   :  { %v7672_v51 = vld [vmem:[%s9627_s1 + $0xb50] sm:$0xff]  }
 0x14c   :  { %6937 = vmatpush3.bf16.msra.mxu0 %v7626_v55  ;;  %v7674_v53 = vld [vmem:[%s9627_s1 + $0xb10] sm:$0xff]   ;;  %v7676_v55 = vld [vmem:[%s9627_s1 + $0xb48] sm:$0xff]  }
 0x14d   :  { %6959 = vmatpush3.bf16.msra.mxu1 %v7627_v56  ;;  %6938 = vmatprep.subr.bf16.mxu0 %v7628_v57  ;;  %v7675_v54 = vld [vmem:[%s9627_s1 + $0xb90] sm:$0xff]   ;;  %v7677_v56 = vld [vmem:[%s9627_s1 + $0xbc8] sm:$0xff]  }
 0x14e   :  { %6960 = vmatprep.subr.bf16.mxu1 %v7629_v58  ;;  %v7678_v57 = vld [vmem:[%s9627_s1 + $0xb08] sm:$0xff]   ;;  %v7693_v21 = vld [vmem:[%s9627_s1 + $0xcf0] sm:$0xff]  }
 0x14f   :  { %v7679_v58 = vld [vmem:[%s9627_s1 + $0xb88] sm:$0xff]  }
 0x150   :  { %6939 = vmatpush3.bf16.msra.mxu0 %v7630_v59  ;;  %v7680_v59 = vld [vmem:[%s9627_s1 + $0xb40] sm:$0xff]  }
 0x151   :  { %6961 = vmatpush3.bf16.msra.mxu1 %v7631_v60  ;;  %6940 = vmatprep.subr.bf16.mxu0 %v7632_v61  ;;  %v7681_v60 = vld [vmem:[%s9627_s1 + $0xbc0] sm:$0xff]  }
 0x152   :  { %6962 = vmatprep.subr.bf16.mxu1 %v7633_v62  ;;  %v7682_v61 = vld [vmem:[%s9627_s1 + $0xb00] sm:$0xff]  }
 0x153   :  { %v7683_v62 = vld [vmem:[%s9627_s1 + $0xb80] sm:$0xff]  }
 0x154   :  { %6941 = vmatpush3.bf16.msra.mxu0 %v7634_v63  ;;  %v49_v63 = vld [vmem:[%s9628_s0 + $0xb0] sm:$0xff] }
 0x155   :  { %6963 = vmatpush3.bf16.msra.mxu1 %v7635_v0  ;;  %6942 = vmatprep.subr.bf16.mxu0 %v7636_v1  ;;  %v5942_v1 = vcombine.low %v49_v63, %v49_v63 }
 0x156   :  { %6964 = vmatprep.subr.bf16.mxu1 %v7637_v2  ;;  %v5943_v2 = vcombine.high %v49_v63, %v49_v63  ;;  %v7727_v63 = vld [vmem:[%s9627_s1 + $0xdb8] sm:$0xff]  }
 0x158   :  { %6943 = vmatpush3.bf16.msra.mxu0 %v7638_v3  ;;  %v50_v3 = vld [vmem:[%s9628_s0 + $0xb8] sm:$0xff] }
 0x159   :  { %6965 = vmatpush3.bf16.msra.mxu1 %v7639_v4  ;;  %6944 = vmatprep.subr.bf16.mxu0 %v7640_v5  ;;  %v5944_v5 = vcombine.low %v50_v3, %v50_v3 }
 0x15a   :  { %6966 = vmatprep.subr.bf16.mxu1 %v7641_v6  ;;  %v5945_v6 = vcombine.high %v50_v3, %v50_v3 }
 0x15c   :  { %6945 = vmatpush3.bf16.msra.mxu0 %v7642_v7  ;;  %v7688_v7 = vld [vmem:[%s9627_s1 + $0xc78] sm:$0xff]  }
 0x15d   :  { %6967 = vmatpush3.bf16.msra.mxu1 %v7643_v8  ;;  %6946 = vmatprep.subr.bf16.mxu0 %v7644_v9  ;;  %v7689_v9 = vld [vmem:[%s9627_s1 + $0xcf8] sm:$0xff]  }
 0x15e   :  { %6968 = vmatprep.subr.bf16.mxu1 %v7645_v10 }
 0x160   :  { %6947 = vmatpush3.bf16.msra.mxu0 %v7646_v11 }
 0x161   :  { %6969 = vmatpush3.bf16.msra.mxu1 %v7647_v12  ;;  %6976 = vmatprep.subr.bf16.mxu0 %v7652_v20  ;;  %v7690_v12 = vld [vmem:[%s9627_s1 + $0xc38] sm:$0xff]  }
 0x162   :  { %6998 = vmatprep.subr.bf16.mxu1 %v7653_v22 }
 0x163   :  { %v6684_v15 = vpop.f32.mrf.mxu0  ;;  %5219 = vmatmul.mubr.bf16.vlgmr.msra.gmra.mxu0 %v5938_v17 }
 0x164   :  { %v6706_v16 = vpop.f32.mrf.mxu1  ;;  %5259 = vmatmul.mubr.bf16.vlgmr.msra.gmra.mxu1 %v5940_v19  ;;  %6977 = vmatpush3.bf16.msra.mxu0 %v7654_v25  ;;  %v7696_v25 = vld [vmem:[%s9627_s1 + $0xc68] sm:$0xff]  }
 0x165   :  { %v6685_v23 = vpop.f32.mrf.mxu0  ;;  %6999 = vmatpush3.bf16.msra.mxu1 %v7655_v28  ;;  %6978 = vmatprep.subr.bf16.mxu0 %v7656_v32  ;;  %v7699_v28 = vld [vmem:[%s9627_s1 + $0xca8] sm:$0xff]   ;;  %v7703_v32 = vld [vmem:[%s9627_s1 + $0xca0] sm:$0xff]  }
 0x166   :  { %v6707_v24 = vpop.f32.mrf.mxu1  ;;  %v6686_v26 = vadd.f32 %v6685_v23, %v6684_v15  ;;  %7000 = vmatprep.subr.bf16.mxu1 %v7657_v33  ;;  %5298 = vmatprep.mubr.bf16.mxu0 %v5943_v2  ;;  %v7691_v15 = vld [vmem:[%s9627_s1 + $0xcb8] sm:$0xff]   ;;  %v7694_v23 = vld [vmem:[%s9627_s1 + $0xc30] sm:$0xff]  }
 0x167   :  { %v6708_v27 = vadd.f32 %v6707_v24, %v6706_v16  ;;  %v6687_v29 = vpop.f32.mrf.mxu0  ;;  %5338 = vmatprep.mubr.bf16.mxu1 %v5945_v6  ;;  %v7695_v24 = vld [vmem:[%s9627_s1 + $0xcb0] sm:$0xff]   ;;  %v7704_v33 = vld [vmem:[%s9627_s1 + $0xc58] sm:$0xff]  }
 0x168   :  { %v6709_v30 = vpop.f32.mrf.mxu1  ;;  %v4741_v31 = vadd.f32 %v6686_v26, %v8940_v49  ;;  %6979 = vmatpush3.bf16.msra.mxu0 %v7658_v37  ;;  %v7670_v49 = vld [vmem:[%s9627_s1 + $0xb18] sm:$0xff]   ;;  %v7697_v26 = vld [vmem:[%s9627_s1 + $0xce8] sm:$0xff]   ;;  %v7700_v29 = vld [vmem:[%s9627_s1 + $0xc60] sm:$0xff]  }
 0x169   :  { %v6688_v34 = vpop.f32.mrf.mxu0  ;;  %7001 = vmatpush3.bf16.msra.mxu1 %v7659_v38  ;;  %6980 = vmatprep.subr.bf16.mxu0 %v7660_v39  ;;  %v7701_v30 = vld [vmem:[%s9627_s1 + $0xce0] sm:$0xff]   ;;  %v7708_v37 = vld [vmem:[%s9627_s1 + $0xc50] sm:$0xff]  }
 0x16a   :  { %v6710_v35 = vpop.f32.mrf.mxu1  ;;  %v9045_v36 = vadd.f32 %v6708_v27, %v4741_v31  ;;  %7002 = vmatprep.subr.bf16.mxu1 %v7661_v40  ;;  %v7698_v27 = vld [vmem:[%s9627_s1 + $0xc28] sm:$0xff]   ;;  %v7702_v31 = vld [vmem:[%s9627_s1 + $0xc20] sm:$0xff]   ;;  %v7705_v34 = vld [vmem:[%s9627_s1 + $0xcd8] sm:$0xff]  }
 0x16b   :  { %v7706_v35 = vld [vmem:[%s9627_s1 + $0xc18] sm:$0xff]   ;;  %v7709_v38 = vld [vmem:[%s9627_s1 + $0xcd0] sm:$0xff]  }
 0x16c   :  { %6981 = vmatpush3.bf16.msra.mxu0 %v7662_v41  ;;  %v7710_v39 = vld [vmem:[%s9627_s1 + $0xc10] sm:$0xff]   ;;  %v7712_v41 = vld [vmem:[%s9627_s1 + $0xc48] sm:$0xff]  }
 0x16d   :  { %7003 = vmatpush3.bf16.msra.mxu1 %v7663_v42  ;;  %6982 = vmatprep.subr.bf16.mxu0 %v7664_v43  ;;  %v7711_v40 = vld [vmem:[%s9627_s1 + $0xc90] sm:$0xff]   ;;  %v7713_v42 = vld [vmem:[%s9627_s1 + $0xcc8] sm:$0xff]  }
 0x16e   :  { %7004 = vmatprep.subr.bf16.mxu1 %v7665_v44  ;;  %v7714_v43 = vld [vmem:[%s9627_s1 + $0xc08] sm:$0xff]  }
 0x16f   :  { %v7715_v44 = vld [vmem:[%s9627_s1 + $0xc88] sm:$0xff]  }
 0x170   :  { %6983 = vmatpush3.bf16.msra.mxu0 %v7666_v45  ;;  %v7716_v45 = vld [vmem:[%s9627_s1 + $0xc40] sm:$0xff]  }
 0x171   :  { %7005 = vmatpush3.bf16.msra.mxu1 %v7667_v46  ;;  %6984 = vmatprep.subr.bf16.mxu0 %v7668_v47  ;;  %v7717_v46 = vld [vmem:[%s9627_s1 + $0xcc0] sm:$0xff]  }
 0x172   :  { %7006 = vmatprep.subr.bf16.mxu1 %v7669_v48  ;;  %v7718_v47 = vld [vmem:[%s9627_s1 + $0xc00] sm:$0xff]  }
 0x173   :  { %v7719_v48 = vld [vmem:[%s9627_s1 + $0xc80] sm:$0xff]  }
 0x174   :  { %6985 = vmatpush3.bf16.msra.mxu0 %v7670_v49  ;;  %v51_v49 = vld [vmem:[%s9628_s0 + $0xc0] sm:$0xff] }
 0x175   :  { %7007 = vmatpush3.bf16.msra.mxu1 %v7671_v50  ;;  %6986 = vmatprep.subr.bf16.mxu0 %v7672_v51  ;;  %v52_v50 = vld [vmem:[%s9628_s0 + $0xc8] sm:$0xff] }
 0x176   :  { %7008 = vmatprep.subr.bf16.mxu1 %v7673_v52  ;;  %v5946_v52 = vcombine.low %v51_v49, %v51_v49 }
 0x178   :  { %6987 = vmatpush3.bf16.msra.mxu0 %v7674_v53  ;;  %v5947_v53 = vcombine.high %v51_v49, %v51_v49  ;;  %v7763_v49 = vld [vmem:[%s9627_s1 + $0xeb8] sm:$0xff]  }
 0x179   :  { %7009 = vmatpush3.bf16.msra.mxu1 %v7675_v54  ;;  %6988 = vmatprep.subr.bf16.mxu0 %v7676_v55  ;;  %v5948_v54 = vcombine.low %v52_v50, %v52_v50  ;;  %v5949_v55 = vcombine.high %v52_v50, %v52_v50 }
 0x17a   :  { %7010 = vmatprep.subr.bf16.mxu1 %v7677_v56 }
 0x17c   :  { %6989 = vmatpush3.bf16.msra.mxu0 %v7678_v57  ;;  %v7724_v57 = vld [vmem:[%s9627_s1 + $0xd78] sm:$0xff]  }
 0x17d   :  { %7011 = vmatpush3.bf16.msra.mxu1 %v7679_v58  ;;  %6990 = vmatprep.subr.bf16.mxu0 %v7680_v59  ;;  %v7725_v58 = vld [vmem:[%s9627_s1 + $0xdf8] sm:$0xff]  }
 0x17e   :  { %7012 = vmatprep.subr.bf16.mxu1 %v7681_v60  ;;  %v7726_v60 = vld [vmem:[%s9627_s1 + $0xd38] sm:$0xff]  }
 0x180   :  { %6991 = vmatpush3.bf16.msra.mxu0 %v7682_v61 }
 0x181   :  { %7013 = vmatpush3.bf16.msra.mxu1 %v7683_v62  ;;  %7020 = vmatprep.subr.bf16.mxu0 %v7688_v7 }
 0x182   :  { %7042 = vmatprep.subr.bf16.mxu1 %v7689_v9 }
 0x183   :  { %v6728_v0 = vpop.f32.mrf.mxu0  ;;  %5299 = vmatmul.mubr.bf16.vlgmr.msra.gmra.mxu0 %v5942_v1 }
 0x184   :  { %v6750_v4 = vpop.f32.mrf.mxu1  ;;  %5339 = vmatmul.mubr.bf16.vlgmr.msra.gmra.mxu1 %v5944_v5  ;;  %7021 = vmatpush3.bf16.msra.mxu0 %v7690_v12  ;;  %v7729_v5 = vld [vmem:[%s9627_s1 + $0xdf0] sm:$0xff]   ;;  %v7733_v12 = vld [vmem:[%s9627_s1 + $0xde8] sm:$0xff]  }
 0x185   :  { %v6729_v8 = vpop.f32.mrf.mxu0  ;;  %7043 = vmatpush3.bf16.msra.mxu1 %v7691_v15  ;;  %7022 = vmatprep.subr.bf16.mxu0 %v7692_v18  ;;  %v7736_v15 = vld [vmem:[%s9627_s1 + $0xd60] sm:$0xff]  }
 0x186   :  { %v6730_v10 = vadd.f32 %v6729_v8, %v6728_v0  ;;  %v6751_v11 = vpop.f32.mrf.mxu1  ;;  %7044 = vmatprep.subr.bf16.mxu1 %v7693_v21  ;;  %5378 = vmatprep.mubr.bf16.mxu0 %v5947_v53  ;;  %v7730_v8 = vld [vmem:[%s9627_s1 + $0xd30] sm:$0xff]   ;;  %v7739_v18 = vld [vmem:[%s9627_s1 + $0xda0] sm:$0xff]   ;;  %v7742_v21 = vld [vmem:[%s9627_s1 + $0xd18] sm:$0xff]  }
 0x187   :  { %v6752_v13 = vadd.f32 %v6751_v11, %v6750_v4  ;;  %v6731_v14 = vpop.f32.mrf.mxu0  ;;  %5418 = vmatprep.mubr.bf16.mxu1 %v5949_v55  ;;  %v7728_v4 = vld [vmem:[%s9627_s1 + $0xd70] sm:$0xff]   ;;  %v7732_v11 = vld [vmem:[%s9627_s1 + $0xd68] sm:$0xff]  }
 0x188   :  { %v4821_v16 = vadd.f32 %v6730_v10, %v9045_v36  ;;  %v6753_v17 = vpop.f32.mrf.mxu1  ;;  %7023 = vmatpush3.bf16.msra.mxu0 %v7694_v23  ;;  %v7707_v36 = vld [vmem:[%s9627_s1 + $0xc98] sm:$0xff]   ;;  %v7731_v10 = vld [vmem:[%s9627_s1 + $0xdb0] sm:$0xff]   ;;  %v7735_v14 = vld [vmem:[%s9627_s1 + $0xda8] sm:$0xff]  }
 0x189   :  { %v6732_v19 = vpop.f32.mrf.mxu0  ;;  %7045 = vmatpush3.bf16.msra.mxu1 %v7695_v24  ;;  %7024 = vmatprep.subr.bf16.mxu0 %v7696_v25  ;;  %v7738_v17 = vld [vmem:[%s9627_s1 + $0xd20] sm:$0xff]   ;;  %v7744_v23 = vld [vmem:[%s9627_s1 + $0xd50] sm:$0xff]  }
 0x18a   :  { %v9147_v20 = vadd.f32 %v6752_v13, %v4821_v16  ;;  %v6754_v22 = vpop.f32.mrf.mxu1  ;;  %7046 = vmatprep.subr.bf16.mxu1 %v7697_v26  ;;  %v7734_v13 = vld [vmem:[%s9627_s1 + $0xd28] sm:$0xff]   ;;  %v7737_v16 = vld [vmem:[%s9627_s1 + $0xde0] sm:$0xff]   ;;  %v7740_v19 = vld [vmem:[%s9627_s1 + $0xd58] sm:$0xff]  }
 0x18b   :  { %v7743_v22 = vld [vmem:[%s9627_s1 + $0xd98] sm:$0xff]   ;;  %v7745_v24 = vld [vmem:[%s9627_s1 + $0xdd0] sm:$0xff]  }
 0x18c   :  { %7025 = vmatpush3.bf16.msra.mxu0 %v7698_v27  ;;  %v7746_v25 = vld [vmem:[%s9627_s1 + $0xd10] sm:$0xff]   ;;  %v7748_v27 = vld [vmem:[%s9627_s1 + $0xd48] sm:$0xff]  }
 0x18d   :  { %7047 = vmatpush3.bf16.msra.mxu1 %v7699_v28  ;;  %7026 = vmatprep.subr.bf16.mxu0 %v7700_v29  ;;  %v7747_v26 = vld [vmem:[%s9627_s1 + $0xd90] sm:$0xff]   ;;  %v7749_v28 = vld [vmem:[%s9627_s1 + $0xdc8] sm:$0xff]  }
 0x18e   :  { %7048 = vmatprep.subr.bf16.mxu1 %v7701_v30  ;;  %v7750_v29 = vld [vmem:[%s9627_s1 + $0xd08] sm:$0xff]   ;;  %v7765_v55 = vld [vmem:[%s9627_s1 + $0xef0] sm:$0xff]  }
 0x18f   :  { %v7751_v30 = vld [vmem:[%s9627_s1 + $0xd88] sm:$0xff]  }
 0x190   :  { %7027 = vmatpush3.bf16.msra.mxu0 %v7702_v31  ;;  %v7752_v31 = vld [vmem:[%s9627_s1 + $0xd40] sm:$0xff]  }
 0x191   :  { %7049 = vmatpush3.bf16.msra.mxu1 %v7703_v32  ;;  %7028 = vmatprep.subr.bf16.mxu0 %v7704_v33  ;;  %v7753_v32 = vld [vmem:[%s9627_s1 + $0xdc0] sm:$0xff]  }
 0x192   :  { %7050 = vmatprep.subr.bf16.mxu1 %v7705_v34  ;;  %v7754_v33 = vld [vmem:[%s9627_s1 + $0xd00] sm:$0xff]  }
 0x193   :  { %v7755_v34 = vld [vmem:[%s9627_s1 + $0xd80] sm:$0xff]  }
 0x194   :  { %7029 = vmatpush3.bf16.msra.mxu0 %v7706_v35  ;;  %v53_v35 = vld [vmem:[%s9628_s0 + $0xd0] sm:$0xff] }
 0x195   :  { %7051 = vmatpush3.bf16.msra.mxu1 %v7707_v36  ;;  %7030 = vmatprep.subr.bf16.mxu0 %v7708_v37  ;;  %v54_v36 = vld [vmem:[%s9628_s0 + $0xd8] sm:$0xff] }
 0x196   :  { %7052 = vmatprep.subr.bf16.mxu1 %v7709_v38  ;;  %v5950_v38 = vcombine.low %v53_v35, %v53_v35 }
 0x198   :  { %7031 = vmatpush3.bf16.msra.mxu0 %v7710_v39  ;;  %v5951_v39 = vcombine.high %v53_v35, %v53_v35 }
 0x199   :  { %7053 = vmatpush3.bf16.msra.mxu1 %v7711_v40  ;;  %7032 = vmatprep.subr.bf16.mxu0 %v7712_v41  ;;  %v5952_v40 = vcombine.low %v54_v36, %v54_v36 }
 0x19a   :  { %7054 = vmatprep.subr.bf16.mxu1 %v7713_v42  ;;  %v7760_v42 = vld [vmem:[%s9627_s1 + $0xe78] sm:$0xff]  }
 0x19c   :  { %7033 = vmatpush3.bf16.msra.mxu0 %v7714_v43  ;;  %v5953_v43 = vcombine.high %v54_v36, %v54_v36  ;;  %v7799_v36 = vld [vmem:[%s9627_s1 + $0xfb8] sm:$0xff]  }
 0x19d   :  { %7055 = vmatpush3.bf16.msra.mxu1 %v7715_v44  ;;  %7034 = vmatprep.subr.bf16.mxu0 %v7716_v45  ;;  %v7761_v44 = vld [vmem:[%s9627_s1 + $0xef8] sm:$0xff]  }
 0x19e   :  { %7056 = vmatprep.subr.bf16.mxu1 %v7717_v46  ;;  %v7762_v46 = vld [vmem:[%s9627_s1 + $0xe38] sm:$0xff]  }
 0x1a0   :  { %7035 = vmatpush3.bf16.msra.mxu0 %v7718_v47 }
 0x1a1   :  { %7057 = vmatpush3.bf16.msra.mxu1 %v7719_v48  ;;  %7064 = vmatprep.subr.bf16.mxu0 %v7724_v57 }
 0x1a2   :  { %7086 = vmatprep.subr.bf16.mxu1 %v7725_v58  ;;  %v7766_v58 = vld [vmem:[%s9627_s1 + $0xe30] sm:$0xff]  }
 0x1a3   :  { %v6772_v51 = vpop.f32.mrf.mxu0  ;;  %5379 = vmatmul.mubr.bf16.vlgmr.msra.gmra.mxu0 %v5946_v52 }
 0x1a4   :  { %v6794_v56 = vpop.f32.mrf.mxu1  ;;  %5419 = vmatmul.mubr.bf16.vlgmr.msra.gmra.mxu1 %v5948_v54  ;;  %7065 = vmatpush3.bf16.msra.mxu0 %v7726_v60  ;;  %v7764_v54 = vld [vmem:[%s9627_s1 + $0xe70] sm:$0xff]  }
 0x1a5   :  { %v6773_v59 = vpop.f32.mrf.mxu0  ;;  %7087 = vmatpush3.bf16.msra.mxu1 %v7727_v63  ;;  %7066 = vmatprep.subr.bf16.mxu0 %v7728_v4  ;;  %v7767_v60 = vld [vmem:[%s9627_s1 + $0xeb0] sm:$0xff]   ;;  %v7770_v63 = vld [vmem:[%s9627_s1 + $0xe28] sm:$0xff]   ;;  %v7775_v4 = vld [vmem:[%s9627_s1 + $0xea0] sm:$0xff]  }
 0x1a6   :  { %v6774_v61 = vadd.f32 %v6773_v59, %v6772_v51  ;;  %v6795_v62 = vpop.f32.mrf.mxu1  ;;  %7088 = vmatprep.subr.bf16.mxu1 %v7729_v5  ;;  %5458 = vmatprep.mubr.bf16.mxu0 %v5951_v39  ;;  %v7776_v5 = vld [vmem:[%s9627_s1 + $0xe58] sm:$0xff]  }
 0x1a7   :  { %v6796_v0 = vadd.f32 %v6795_v62, %v6794_v56  ;;  %v6775_v1 = vpop.f32.mrf.mxu0  ;;  %5498 = vmatprep.mubr.bf16.mxu1 %v5953_v43  ;;  %v7769_v62 = vld [vmem:[%s9627_s1 + $0xee8] sm:$0xff]  }
 0x1a8   :  { %v4901_v2 = vadd.f32 %v6774_v61, %v9147_v20  ;;  %v6797_v3 = vpop.f32.mrf.mxu1  ;;  %7067 = vmatpush3.bf16.msra.mxu0 %v7730_v8  ;;  %v7741_v20 = vld [vmem:[%s9627_s1 + $0xdd8] sm:$0xff]   ;;  %v7768_v61 = vld [vmem:[%s9627_s1 + $0xe68] sm:$0xff]   ;;  %v7772_v1 = vld [vmem:[%s9627_s1 + $0xe60] sm:$0xff]  }
 0x1a9   :  { %v6776_v6 = vpop.f32.mrf.mxu0  ;;  %7089 = vmatpush3.bf16.msra.mxu1 %v7731_v10  ;;  %7068 = vmatprep.subr.bf16.mxu0 %v7732_v11  ;;  %v7774_v3 = vld [vmem:[%s9627_s1 + $0xe20] sm:$0xff]   ;;  %v7779_v8 = vld [vmem:[%s9627_s1 + $0xe98] sm:$0xff]   ;;  %v7781_v10 = vld [vmem:[%s9627_s1 + $0xed0] sm:$0xff]  }
 0x1aa   :  { %v9255_v7 = vadd.f32 %v6796_v0, %v4901_v2  ;;  %v6798_v9 = vpop.f32.mrf.mxu1  ;;  %7090 = vmatprep.subr.bf16.mxu1 %v7733_v12  ;;  %v7771_v0 = vld [vmem:[%s9627_s1 + $0xea8] sm:$0xff]   ;;  %v7773_v2 = vld [vmem:[%s9627_s1 + $0xee0] sm:$0xff]   ;;  %v7777_v6 = vld [vmem:[%s9627_s1 + $0xed8] sm:$0xff]  }
 0x1ab   :  { %v7780_v9 = vld [vmem:[%s9627_s1 + $0xe50] sm:$0xff]  }
 0x1ac   :  { %7069 = vmatpush3.bf16.msra.mxu0 %v7734_v13  ;;  %v7782_v11 = vld [vmem:[%s9627_s1 + $0xe10] sm:$0xff]   ;;  %v7784_v13 = vld [vmem:[%s9627_s1 + $0xe48] sm:$0xff]  }
 0x1ad   :  { %7091 = vmatpush3.bf16.msra.mxu1 %v7735_v14  ;;  %7070 = vmatprep.subr.bf16.mxu0 %v7736_v15  ;;  %v7783_v12 = vld [vmem:[%s9627_s1 + $0xe90] sm:$0xff]   ;;  %v7785_v14 = vld [vmem:[%s9627_s1 + $0xec8] sm:$0xff]  }
 0x1ae   :  { %7092 = vmatprep.subr.bf16.mxu1 %v7737_v16  ;;  %v7786_v15 = vld [vmem:[%s9627_s1 + $0xe08] sm:$0xff]  }
 0x1af   :  { %v7787_v16 = vld [vmem:[%s9627_s1 + $0xe88] sm:$0xff]  }
 0x1b0   :  { %7071 = vmatpush3.bf16.msra.mxu0 %v7738_v17  ;;  %v7788_v17 = vld [vmem:[%s9627_s1 + $0xe40] sm:$0xff]  }
 0x1b1   :  { %7093 = vmatpush3.bf16.msra.mxu1 %v7739_v18  ;;  %7072 = vmatprep.subr.bf16.mxu0 %v7740_v19  ;;  %v7789_v18 = vld [vmem:[%s9627_s1 + $0xec0] sm:$0xff]  }
 0x1b2   :  { %7094 = vmatprep.subr.bf16.mxu1 %v7741_v20  ;;  %v7790_v19 = vld [vmem:[%s9627_s1 + $0xe00] sm:$0xff]  }
 0x1b3   :  { %v7791_v20 = vld [vmem:[%s9627_s1 + $0xe80] sm:$0xff]  }
 0x1b4   :  { %7073 = vmatpush3.bf16.msra.mxu0 %v7742_v21  ;;  %v55_v21 = vld [vmem:[%s9628_s0 + $0xe0] sm:$0xff] }
 0x1b5   :  { %7095 = vmatpush3.bf16.msra.mxu1 %v7743_v22  ;;  %7074 = vmatprep.subr.bf16.mxu0 %v7744_v23  ;;  %v5954_v22 = vcombine.low %v55_v21, %v55_v21  ;;  %v5955_v23 = vcombine.high %v55_v21, %v55_v21 }
 0x1b6   :  { %7096 = vmatprep.subr.bf16.mxu1 %v7745_v24  ;;  %v56_v24 = vld [vmem:[%s9628_s0 + $0xe8] sm:$0xff] }
 0x1b8   :  { %7075 = vmatpush3.bf16.msra.mxu0 %v7746_v25 }
 0x1b9   :  { %7097 = vmatpush3.bf16.msra.mxu1 %v7747_v26  ;;  %7076 = vmatprep.subr.bf16.mxu0 %v7748_v27  ;;  %v5956_v27 = vcombine.low %v56_v24, %v56_v24 }
 0x1ba   :  { %7098 = vmatprep.subr.bf16.mxu1 %v7749_v28  ;;  %v5957_v28 = vcombine.high %v56_v24, %v56_v24 }
 0x1bc   :  { %7077 = vmatpush3.bf16.msra.mxu0 %v7750_v29  ;;  %v7796_v29 = vld [vmem:[%s9627_s1 + $0xf78] sm:$0xff]  }
 0x1bd   :  { %7099 = vmatpush3.bf16.msra.mxu1 %v7751_v30  ;;  %7078 = vmatprep.subr.bf16.mxu0 %v7752_v31  ;;  %v7797_v30 = vld [vmem:[%s9627_s1 + $0xff8] sm:$0xff]  }
 0x1be   :  { %7100 = vmatprep.subr.bf16.mxu1 %v7753_v32 }
 0x1c0   :  { %7079 = vmatpush3.bf16.msra.mxu0 %v7754_v33  ;;  %v7798_v33 = vld [vmem:[%s9627_s1 + $0xf38] sm:$0xff]  }
 0x1c1   :  { %7101 = vmatpush3.bf16.msra.mxu1 %v7755_v34  ;;  %7108 = vmatprep.subr.bf16.mxu0 %v7760_v42 }
 0x1c2   :  { %7130 = vmatprep.subr.bf16.mxu1 %v7761_v44 }
 0x1c3   :  { %v6816_v37 = vpop.f32.mrf.mxu0  ;;  %5459 = vmatmul.mubr.bf16.vlgmr.msra.gmra.mxu0 %v5950_v38 }
 0x1c4   :  { %v6838_v41 = vpop.f32.mrf.mxu1  ;;  %5499 = vmatmul.mubr.bf16.vlgmr.msra.gmra.mxu1 %v5952_v40  ;;  %7109 = vmatpush3.bf16.msra.mxu0 %v7762_v46  ;;  %v7800_v40 = vld [vmem:[%s9627_s1 + $0xf70] sm:$0xff]  }
 0x1c5   :  { %v6817_v45 = vpop.f32.mrf.mxu0  ;;  %7131 = vmatpush3.bf16.msra.mxu1 %v7763_v49  ;;  %7110 = vmatprep.subr.bf16.mxu0 %v7764_v54  ;;  %v7803_v46 = vld [vmem:[%s9627_s1 + $0xfb0] sm:$0xff]   ;;  %v7806_v49 = vld [vmem:[%s9627_s1 + $0xf28] sm:$0xff]   ;;  %v7811_v54 = vld [vmem:[%s9627_s1 + $0xfa0] sm:$0xff]  }
 0x1c6   :  { %v6818_v47 = vadd.f32 %v6817_v45, %v6816_v37  ;;  %v6839_v48 = vpop.f32.mrf.mxu1  ;;  %7132 = vmatprep.subr.bf16.mxu1 %v7765_v55  ;;  %5538 = vmatprep.mubr.bf16.mxu0 %v5955_v23  ;;  %v7802_v45 = vld [vmem:[%s9627_s1 + $0xf30] sm:$0xff]   ;;  %v7812_v55 = vld [vmem:[%s9627_s1 + $0xf58] sm:$0xff]  }
 0x1c7   :  { %v6840_v50 = vadd.f32 %v6839_v48, %v6838_v41  ;;  %v6819_v51 = vpop.f32.mrf.mxu0  ;;  %5578 = vmatprep.mubr.bf16.mxu1 %v5957_v28  ;;  %v7801_v41 = vld [vmem:[%s9627_s1 + $0xff0] sm:$0xff]   ;;  %v7805_v48 = vld [vmem:[%s9627_s1 + $0xfe8] sm:$0xff]  }
 0x1c8   :  { %v4981_v52 = vadd.f32 %v6818_v47, %v9255_v7  ;;  %v6841_v53 = vpop.f32.mrf.mxu1  ;;  %7111 = vmatpush3.bf16.msra.mxu0 %v7766_v58  ;;  %v7778_v7 = vld [vmem:[%s9627_s1 + $0xe18] sm:$0xff]   ;;  %v7804_v47 = vld [vmem:[%s9627_s1 + $0xf68] sm:$0xff]   ;;  %v7808_v51 = vld [vmem:[%s9627_s1 + $0xf60] sm:$0xff]  }
 0x1c9   :  { %v6820_v56 = vpop.f32.mrf.mxu0  ;;  %7133 = vmatpush3.bf16.msra.mxu1 %v7767_v60  ;;  %7112 = vmatprep.subr.bf16.mxu0 %v7768_v61  ;;  %v7810_v53 = vld [vmem:[%s9627_s1 + $0xf20] sm:$0xff]   ;;  %v7815_v58 = vld [vmem:[%s9627_s1 + $0xf98] sm:$0xff]   ;;  %v7817_v60 = vld [vmem:[%s9627_s1 + $0xfd0] sm:$0xff]  }
 0x1ca   :  { %v9360_v57 = vadd.f32 %v6840_v50, %v4981_v52  ;;  %v6842_v59 = vpop.f32.mrf.mxu1  ;;  %7134 = vmatprep.subr.bf16.mxu1 %v7769_v62  ;;  %v7807_v50 = vld [vmem:[%s9627_s1 + $0xfa8] sm:$0xff]   ;;  %v7809_v52 = vld [vmem:[%s9627_s1 + $0xfe0] sm:$0xff]   ;;  %v7813_v56 = vld [vmem:[%s9627_s1 + $0xfd8] sm:$0xff]  }
 0x1cb   :  { %v7816_v59 = vld [vmem:[%s9627_s1 + $0xf50] sm:$0xff]  }
 0x1cc   :  { %7113 = vmatpush3.bf16.msra.mxu0 %v7770_v63  ;;  %v7818_v61 = vld [vmem:[%s9627_s1 + $0xf10] sm:$0xff]   ;;  %v7820_v63 = vld [vmem:[%s9627_s1 + $0xf48] sm:$0xff]  }
 0x1cd   :  { %7135 = vmatpush3.bf16.msra.mxu1 %v7771_v0  ;;  %7114 = vmatprep.subr.bf16.mxu0 %v7772_v1  ;;  %v7819_v62 = vld [vmem:[%s9627_s1 + $0xf90] sm:$0xff]   ;;  %v7821_v0 = vld [vmem:[%s9627_s1 + $0xfc8] sm:$0xff]  }
 0x1ce   :  { %7136 = vmatprep.subr.bf16.mxu1 %v7773_v2  ;;  %v7822_v1 = vld [vmem:[%s9627_s1 + $0xf08] sm:$0xff]  }
 0x1cf   :  { %v7823_v2 = vld [vmem:[%s9627_s1 + $0xf88] sm:$0xff]  }
 0x1d0   :  { %7115 = vmatpush3.bf16.msra.mxu0 %v7774_v3  ;;  %v7824_v3 = vld [vmem:[%s9627_s1 + $0xf40] sm:$0xff]  }
 0x1d1   :  { %7137 = vmatpush3.bf16.msra.mxu1 %v7775_v4  ;;  %7116 = vmatprep.subr.bf16.mxu0 %v7776_v5  ;;  %v7825_v4 = vld [vmem:[%s9627_s1 + $0xfc0] sm:$0xff]  }
 0x1d2   :  { %7138 = vmatprep.subr.bf16.mxu1 %v7777_v6  ;;  %v7826_v5 = vld [vmem:[%s9627_s1 + $0xf00] sm:$0xff]  }
 0x1d3   :  { %v7827_v6 = vld [vmem:[%s9627_s1 + $0xf80] sm:$0xff]  }
 0x1d4   :  { %7117 = vmatpush3.bf16.msra.mxu0 %v7778_v7  ;;  %v57_v7 = vld [vmem:[%s9628_s0 + $0xf0] sm:$0xff] }
 0x1d5   :  { %7139 = vmatpush3.bf16.msra.mxu1 %v7779_v8  ;;  %7118 = vmatprep.subr.bf16.mxu0 %v7780_v9  ;;  %v58_v8 = vld [vmem:[%s9628_s0 + $0xf8] sm:$0xff] }
 0x1d6   :  { %7140 = vmatprep.subr.bf16.mxu1 %v7781_v10  ;;  %v5958_v10 = vcombine.low %v57_v7, %v57_v7 }
 0x1d8   :  { %7119 = vmatpush3.bf16.msra.mxu0 %v7782_v11  ;;  %v5959_v11 = vcombine.high %v57_v7, %v57_v7 }
 0x1d9   :  { %7141 = vmatpush3.bf16.msra.mxu1 %v7783_v12  ;;  %7120 = vmatprep.subr.bf16.mxu0 %v7784_v13  ;;  %v5960_v12 = vcombine.low %v58_v8, %v58_v8  ;;  %v5961_v13 = vcombine.high %v58_v8, %v58_v8 }
 0x1da   :  { %7142 = vmatprep.subr.bf16.mxu1 %v7785_v14 }
 0x1dc   :  { %7121 = vmatpush3.bf16.msra.mxu0 %v7786_v15 }
 0x1dd   :  { %7143 = vmatpush3.bf16.msra.mxu1 %v7787_v16  ;;  %7122 = vmatprep.subr.bf16.mxu0 %v7788_v17 }
 0x1de   :  { %7144 = vmatprep.subr.bf16.mxu1 %v7789_v18 }
 0x1e0   :  { %7123 = vmatpush3.bf16.msra.mxu0 %v7790_v19 }
 0x1e1   :  { %7145 = vmatpush3.bf16.msra.mxu1 %v7791_v20  ;;  %7152 = vmatprep.subr.bf16.mxu0 %v7796_v29 }
 0x1e2   :  { %7174 = vmatprep.subr.bf16.mxu1 %v7797_v30 }
 0x1e3   :  { %v6860_v25 = vpop.f32.mrf.mxu0  ;;  %5539 = vmatmul.mubr.bf16.vlgmr.msra.gmra.mxu0 %v5954_v22 }
 0x1e4   :  { %v6882_v26 = vpop.f32.mrf.mxu1  ;;  %5579 = vmatmul.mubr.bf16.vlgmr.msra.gmra.mxu1 %v5956_v27  ;;  %7153 = vmatpush3.bf16.msra.mxu0 %v7798_v33 }
 0x1e5   :  { %v6861_v31 = vpop.f32.mrf.mxu0  ;;  %7175 = vmatpush3.bf16.msra.mxu1 %v7799_v36  ;;  %7154 = vmatprep.subr.bf16.mxu0 %v7800_v40  ;;  %v7834_v40 = vld [vmem:[%s9630_s3 + $0x28] sm:$0xff]  }
 0x1e6   :  { %v6883_v32 = vpop.f32.mrf.mxu1  ;;  %v6862_v34 = vadd.f32 %v6861_v31, %v6860_v25  ;;  %7176 = vmatprep.subr.bf16.mxu1 %v7801_v41  ;;  %5618 = vmatprep.mubr.bf16.mxu0 %v5959_v11  ;;  %v7835_v41 = vld [vmem:[%s9630_s3 + $0x20] sm:$0xff]  }
 0x1e7   :  { %v6884_v35 = vadd.f32 %v6883_v32, %v6882_v26  ;;  %v6863_v37 = vpop.f32.mrf.mxu0  ;;  %5658 = vmatprep.mubr.bf16.mxu1 %v5961_v13 }
 0x1e8   :  { %v6885_v38 = vpop.f32.mrf.mxu1  ;;  %v5061_v39 = vadd.f32 %v6862_v34, %v9360_v57  ;;  %7155 = vmatpush3.bf16.msra.mxu0 %v7802_v45  ;;  %v7814_v57 = vld [vmem:[%s9627_s1 + $0xf18] sm:$0xff]   ;;  %v7848_v37 = vmov 0.0  }
 0x1e9   :  { %v6864_v42 = vpop.f32.mrf.mxu0  ;;  %7177 = vmatpush3.bf16.msra.mxu1 %v7803_v46  ;;  %7156 = vmatprep.subr.bf16.mxu0 %v7804_v47  ;;  %v7832_v38 = vld [vmem:[%s9630_s3 + $0x38] sm:$0xff]  }
 0x1ea   :  { %v6886_v43 = vpop.f32.mrf.mxu1  ;;  %v9465_v44 = vadd.f32 %v6884_v35, %v5061_v39  ;;  %7178 = vmatprep.subr.bf16.mxu1 %v7805_v48  ;;  %v7833_v39 = vld [vmem:[%s9630_s3 + $0x30] sm:$0xff]   ;;  %v7836_v42 = vld [vmem:[%s9630_s3 + $0x18] sm:$0xff]  }
 0x1ec   :  { %7157 = vmatpush3.bf16.msra.mxu0 %v7806_v49  ;;  %v7837_v49 = vld [vmem:[%s9630_s3 + $0x10] sm:$0xff]  }
 0x1ed   :  { %7179 = vmatpush3.bf16.msra.mxu1 %v7807_v50  ;;  %7158 = vmatprep.subr.bf16.mxu0 %v7808_v51 }
 0x1ee   :  { %7180 = vmatprep.subr.bf16.mxu1 %v7809_v52 }
 0x1f0   :  { %7159 = vmatpush3.bf16.msra.mxu0 %v7810_v53 }
 0x1f1   :  { %7181 = vmatpush3.bf16.msra.mxu1 %v7811_v54  ;;  %7160 = vmatprep.subr.bf16.mxu0 %v7812_v55 }
 0x1f2   :  { %7182 = vmatprep.subr.bf16.mxu1 %v7813_v56  ;;  %v7838_v56 = vld [vmem:[%s9630_s3 + $0x8] sm:$0xff]  }
 0x1f4   :  { %7161 = vmatpush3.bf16.msra.mxu0 %v7814_v57  ;;  %v7839_v57 = vld [vmem:[%s9630_s3] sm:$0xff]  }
 0x1f5   :  { %7183 = vmatpush3.bf16.msra.mxu1 %v7815_v58  ;;  %7162 = vmatprep.subr.bf16.mxu0 %v7816_v59  ;;  %v7840_v58 = vld [vmem:[%s9631_s5 + $0x38] sm:$0xff]   ;;  %v7841_v59 = vld [vmem:[%s9631_s5 + $0x30] sm:$0xff]  }
 0x1f6   :  { %7184 = vmatprep.subr.bf16.mxu1 %v7817_v60  ;;  %v7842_v60 = vld [vmem:[%s9631_s5 + $0x28] sm:$0xff]  }
 0x1f8   :  { %7163 = vmatpush3.bf16.msra.mxu0 %v7818_v61  ;;  %v7843_v61 = vld [vmem:[%s9631_s5 + $0x20] sm:$0xff]  }
 0x1f9   :  { %7185 = vmatpush3.bf16.msra.mxu1 %v7819_v62  ;;  %7164 = vmatprep.subr.bf16.mxu0 %v7820_v63  ;;  %v7844_v62 = vld [vmem:[%s9631_s5 + $0x18] sm:$0xff]  }
 0x1fa   :  { %7186 = vmatprep.subr.bf16.mxu1 %v7821_v0 }
 0x1fc   :  { %7165 = vmatpush3.bf16.msra.mxu0 %v7822_v1 }
 0x1fd   :  { %7187 = vmatpush3.bf16.msra.mxu1 %v7823_v2  ;;  %7166 = vmatprep.subr.bf16.mxu0 %v7824_v3  ;;  %v7845_v2 = vld [vmem:[%s9631_s5 + $0x10] sm:$0xff]  }
 0x1fe   :  { %7188 = vmatprep.subr.bf16.mxu1 %v7825_v4 }
 0x200   :  { %7167 = vmatpush3.bf16.msra.mxu0 %v7826_v5 }
 0x201   :  { %7189 = vmatpush3.bf16.msra.mxu1 %v7827_v6  ;;  %7214 = vmatprep.subr.bf16.mxu0 %v7848_v37 }
 0x202   :  { %7234 = vmatprep.subr.bf16.mxu1 %v7848_v37 }
 0x203   :  { %v6904_v9 = vpop.f32.mrf.mxu0  ;;  %5619 = vmatmul.mubr.bf16.vlgmr.msra.gmra.mxu0 %v5958_v10 }
 0x204   :  { %v6926_v14 = vpop.f32.mrf.mxu1  ;;  %5659 = vmatmul.mubr.bf16.vlgmr.msra.gmra.mxu1 %v5960_v12  ;;  %7215 = vmatpush3.bf16.msra.mxu0 %v7832_v38 }
 0x205   :  { %v6905_v15 = vpop.f32.mrf.mxu0  ;;  %7216 = vmatprep.subr.bf16.mxu0 %v7848_v37  ;;  %7230 = vmatprep.mubr.msk.bf16.mxu0 %vm7849_vm0, %v7848_v37 }
 0x206   :  { %v6906_v16 = vadd.f32 %v6905_v15, %v6904_v9  ;;  %v6927_v17 = vpop.f32.mrf.mxu1  ;;  %7250 = vmatprep.mubr.msk.bf16.mxu1 %vm7849_vm0, %v7848_v37  ;;  %7235 = vmatpush3.bf16.msra.mxu1 %v7840_v58 }
 0x207   :  { %v6928_v18 = vadd.f32 %v6927_v17, %v6926_v14  ;;  %v6907_v19 = vpop.f32.mrf.mxu0  ;;  %7236 = vmatprep.subr.bf16.mxu1 %v7848_v37 }
 0x208   :  { %v5141_v20 = vadd.f32 %v6906_v16, %v9465_v44  ;;  %v6929_v21 = vpop.f32.mrf.mxu1  ;;  %7217 = vmatpush3.bf16.msra.mxu0 %v7833_v39 }
 0x209   :  { %v6908_v22 = vpop.f32.mrf.mxu0  ;;  %7218 = vmatprep.subr.bf16.mxu0 %v7848_v37 }
 0x20a   :  { %v5181_v23 = vadd.f32 %v6928_v18, %v5141_v20  ;;  %v6930_v24 = vpop.f32.mrf.mxu1  ;;  %7237 = vmatpush3.bf16.msra.mxu1 %v7841_v59 }
 0x20b   :  { %7238 = vmatprep.subr.bf16.mxu1 %v7848_v37 }
 0x20c   :  { %7219 = vmatpush3.bf16.msra.mxu0 %v7834_v40 }
 0x20d   :  { %7220 = vmatprep.subr.bf16.mxu0 %v7848_v37 }
 0x20e   :  { %7239 = vmatpush3.bf16.msra.mxu1 %v7842_v60 }
 0x20f   :  { %7240 = vmatprep.subr.bf16.mxu1 %v7848_v37 }
 0x210   :  { %7221 = vmatpush3.bf16.msra.mxu0 %v7835_v41 }
 0x211   :  { %7222 = vmatprep.subr.bf16.mxu0 %v7848_v37 }
 0x212   :  { %7241 = vmatpush3.bf16.msra.mxu1 %v7843_v61 }
 0x213   :  { %7242 = vmatprep.subr.bf16.mxu1 %v7848_v37 }
 0x214   :  { %7223 = vmatpush3.bf16.msra.mxu0 %v7836_v42 }
 0x215   :  { %7224 = vmatprep.subr.bf16.mxu0 %v7848_v37 }
 0x216   :  { %7243 = vmatpush3.bf16.msra.mxu1 %v7844_v62 }
 0x217   :  { %7244 = vmatprep.subr.bf16.mxu1 %v7848_v37 }
 0x218   :  { %7225 = vmatpush3.bf16.msra.mxu0 %v7837_v49 }
 0x219   :  { %7226 = vmatprep.subr.bf16.mxu0 %v7848_v37 }
 0x21a   :  { %7245 = vmatpush3.bf16.msra.mxu1 %v7845_v2 }
 0x21b   :  { %7246 = vmatprep.subr.bf16.mxu1 %v7848_v37 }
 0x21c   :  { %7227 = vmatpush3.bf16.msra.mxu0 %v7838_v56 }
 0x21d   :  { %7228 = vmatprep.subr.bf16.mxu0 %v7848_v37 }
 0x220   :  { %7229 = vmatpush3.bf16.msra.mxu0 %v7839_v57 }
 0x223   :  { %v6948_v25 = vpop.f32.mrf.mxu0 }
 0x224   :  { %v6970_v26 = vpop.f32.mrf.mxu1 }
 0x225   :  { %v6949_v27 = vpop.f32.mrf.mxu0 }
 0x226   :  { %v6950_v28 = vadd.f32 %v6949_v27, %v6948_v25  ;;  %v6971_v29 = vpop.f32.mrf.mxu1 }
 0x227   :  { %v6972_v30 = vadd.f32 %v6971_v29, %v6970_v26  ;;  %v6951_v31 = vpop.f32.mrf.mxu0 }
 0x228   :  { %v5221_v32 = vadd.f32 %v6950_v28, %v5181_v23  ;;  %v6973_v33 = vpop.f32.mrf.mxu1 }
 0x229   :  { %v6952_v34 = vpop.f32.mrf.mxu0 }
 0x22a   :  { %v5261_v35 = vadd.f32 %v6972_v30, %v5221_v32  ;;  %v6974_v36 = vpop.f32.mrf.mxu1 }
 0x243   :  { %v6992_v43 = vpop.f32.mrf.mxu0 }
 0x244   :  { %v7014_v44 = vpop.f32.mrf.mxu1 }
 0x245   :  { %v6993_v45 = vpop.f32.mrf.mxu0 }
 0x246   :  { %v7015_v46 = vpop.f32.mrf.mxu1  ;;  %v6994_v47 = vadd.f32 %v6993_v45, %v6992_v43 }
 0x247   :  { %v7016_v48 = vadd.f32 %v7015_v46, %v7014_v44  ;;  %v6995_v50 = vpop.f32.mrf.mxu0 }
 0x248   :  { %v7017_v51 = vpop.f32.mrf.mxu1  ;;  %v5301_v52 = vadd.f32 %v6994_v47, %v5261_v35 }
 0x249   :  { %v6996_v53 = vpop.f32.mrf.mxu0  ;;  %v7846_v51 = vld [vmem:[%s9631_s5 + $0x8] sm:$0xff]  }
 0x24a   :  { %v7018_v54 = vpop.f32.mrf.mxu1  ;;  %v5341_v55 = vadd.f32 %v7016_v48, %v5301_v52  ;;  %7247 = vmatpush3.bf16.msra.mxu1 %v7846_v51  ;;  %v7847_v52 = vld [vmem:[%s9631_s5] sm:$0xff]  }
 0x24b   :  { %7248 = vmatprep.subr.bf16.mxu1 %v7848_v37  ;;  %v6474_v53 = vld [vmem:[%s9632_s4] ss:$0 sm:$0xff] }
 0x24c   :  { %v6483_v37 = vld [vmem:[%s9633_s6] ss:$0 sm:$0xff] }
 0x24e   :  { %7249 = vmatpush3.bf16.msra.mxu1 %v7847_v52 }
 0x263   :  { %v7036_v63 = vpop.f32.mrf.mxu0 }
 0x264   :  { %v7058_v0 = vpop.f32.mrf.mxu1 }
 0x265   :  { %v7037_v1 = vpop.f32.mrf.mxu0 }
 0x266   :  { %v7038_v3 = vadd.f32 %v7037_v1, %v7036_v63  ;;  %v7059_v4 = vpop.f32.mrf.mxu1 }
 0x267   :  { %v7060_v5 = vadd.f32 %v7059_v4, %v7058_v0  ;;  %v7039_v6 = vpop.f32.mrf.mxu0 }
 0x268   :  { %v5381_v7 = vadd.f32 %v7038_v3, %v5341_v55  ;;  %v7061_v8 = vpop.f32.mrf.mxu1 }
 0x269   :  { %v7040_v9 = vpop.f32.mrf.mxu0 }
 0x26a   :  { %v5421_v10 = vadd.f32 %v7060_v5, %v5381_v7  ;;  %v7062_v11 = vpop.f32.mrf.mxu1 }
 0x283   :  { %v7080_v12 = vpop.f32.mrf.mxu0 }
 0x284   :  { %v7102_v13 = vpop.f32.mrf.mxu1 }
 0x285   :  { %v7081_v14 = vpop.f32.mrf.mxu0 }
 0x286   :  { %v7103_v15 = vpop.f32.mrf.mxu1  ;;  %v7082_v28 = vadd.f32 %v7081_v14, %v7080_v12 }
 0x287   :  { %v7083_v16 = vpop.f32.mrf.mxu0  ;;  %v7104_v30 = vadd.f32 %v7103_v15, %v7102_v13 }
 0x288   :  { %v7105_v17 = vpop.f32.mrf.mxu1  ;;  %v5461_v29 = vadd.f32 %v7082_v28, %v5421_v10 }
 0x289   :  { %v7084_v18 = vpop.f32.mrf.mxu0 }
 0x28a   :  { %v7106_v19 = vpop.f32.mrf.mxu1  ;;  %v5501_v32 = vadd.f32 %v7104_v30, %v5461_v29 }
 0x2a3   :  { %v7124_v20 = vpop.f32.mrf.mxu0 }
 0x2a4   :  { %v7146_v21 = vpop.f32.mrf.mxu1 }
 0x2a5   :  { %v7125_v22 = vpop.f32.mrf.mxu0 }
 0x2a6   :  { %v7147_v23 = vpop.f32.mrf.mxu1  ;;  %v7126_v31 = vadd.f32 %v7125_v22, %v7124_v20 }
 0x2a7   :  { %v7127_v24 = vpop.f32.mrf.mxu0  ;;  %v7148_v34 = vadd.f32 %v7147_v23, %v7146_v21 }
 0x2a8   :  { %v7149_v25 = vpop.f32.mrf.mxu1  ;;  %v5541_v33 = vadd.f32 %v7126_v31, %v5501_v32 }
 0x2a9   :  { %v7128_v26 = vpop.f32.mrf.mxu0 }
 0x2aa   :  { %v7150_v27 = vpop.f32.mrf.mxu1  ;;  %v5581_v39 = vadd.f32 %v7148_v34, %v5541_v33 }
 0x2c3   :  { %v7168_v35 = vpop.f32.mrf.mxu0 }
 0x2c4   :  { %v7190_v36 = vpop.f32.mrf.mxu1 }
 0x2c5   :  { %v7169_v38 = vpop.f32.mrf.mxu0 }
 0x2c6   :  { %v7170_v40 = vadd.f32 %v7169_v38, %v7168_v35  ;;  %v7191_v41 = vpop.f32.mrf.mxu1 }
 0x2c7   :  { %v7171_v42 = vpop.f32.mrf.mxu0  ;;  %v7192_v44 = vadd.f32 %v7191_v41, %v7190_v36 }
 0x2c8   :  { %v5621_v43 = vadd.f32 %v7170_v40, %v5581_v39  ;;  %v7193_v45 = vpop.f32.mrf.mxu1 }
 0x2c9   :  { %v7172_v46 = vpop.f32.mrf.mxu0 }
 0x2ca   :  { %v5661_v47 = vadd.f32 %v7192_v44, %v5621_v43  ;;  %v7194_v48 = vpop.f32.mrf.mxu1 }
 0x2cc   :  { %v5666_v49 = vmax.f32 %v5661_v47, 0.0 }
 0x2ce   :  { %v5667_v50 = vpack.c.bf16 %v5666_v49, %v5666_v49 }
 0x2d0   :  { %7231 = vmatmul.mubr.bf16.vlgmr.msra.gmra.mxu0 %v5667_v50 }
 0x390   :  { %v5773_v54 = vpop.f32.mrf.mxu0 }
 0x391   :  { %v5774_v55 = vadd.f32 %v6474_v53, %v5773_v54 }
 0x392   :  { %v7232_v56 = vpop.f32.mrf.mxu0 }
 0x393   :  { %v5779_v57 = vmax.f32 %v5774_v55, 0.0 }
 0x394   :  { %v5776_v58 = vpop.f32.mrf.mxu0 }
 0x395   :  { %v5780_v59 = vpack.c.bf16 %v5779_v57, %v5779_v57 }
 0x396   :  { %v7233_v60 = vpop.f32.mrf.mxu0 }
 0x397   :  { %7251 = vmatmul.mubr.bf16.vlgmr.msra.gmra.mxu1 %v5780_v59 }
 0x457   :  { %v5886_v61 = vpop.f32.mrf.mxu1 }
 0x458   :  { %v5887_v62 = vadd.f32 %v6483_v37, %v5886_v61 }
 0x459   :  { %v7252_v63 = vpop.f32.mrf.mxu1 }
 0x45a   :  { %5892 = vst [vmem:[%s9634_s7] sm:$0xff] %v5887_v62 }
 0x45b   :  { %v5889_v0 = vpop.f32.mrf.mxu1 }
 0x45d   :  { %v7253_v1 = vpop.f32.mrf.mxu1 }

</bundles_post_ra>
